<compile_context>
chip_gen: v7x
topology: tpu7x:2x2x1
jax: 0.10.0
libtpu: 0.0.40
codegen_flags: <defaults>
</compile_context>

<pallas_src>
import functools

import jax
import jax.numpy as jnp
from jax.experimental import pallas as pl
from jax.experimental.pallas import tpu as pltpu

LANE = 128                          # all channel axes are zero-padded to this
_VMEM_LIMIT = 32 * 1024 * 1024      # safe scoped-VMEM budget on v5e/v6e/v7x


def _round_up(v, m):
    return ((v + m - 1) // m) * m


def _pick_divisor(total, cap):
    """Largest divisor of `total` that is <= cap (>=1)."""
    for d in range(min(cap, total), 0, -1):
        if total % d == 0:
            return d
    return total


def _pad_to(a, shape):
    return jnp.pad(a, [(0, t - s) for s, t in zip(a.shape, shape)])


# ---------------------------------------------------------------------------
# 1) Tiled fused matmul:  out = act(x @ w (+ b)) (+ res)
#    bf16 MXU operands, f32 VMEM accumulator, pl.when init/finalize on K.
# ---------------------------------------------------------------------------
def _make_mm_kernel(act, has_bias, has_res):
    def kernel(*refs):
        refs = list(refs)
        x_ref = refs.pop(0)
        w_ref = refs.pop(0)
        b_ref = refs.pop(0) if has_bias else None
        r_ref = refs.pop(0) if has_res else None
        o_ref = refs.pop(0)
        acc_ref = refs.pop(0)

        k = pl.program_id(2)

        @pl.when(k == 0)
        def _():
            acc_ref[...] = jnp.zeros_like(acc_ref)

        acc_ref[...] += jnp.dot(
            x_ref[...].astype(jnp.bfloat16),
            w_ref[...].astype(jnp.bfloat16),
            preferred_element_type=jnp.float32)

        @pl.when(k == pl.num_programs(2) - 1)
        def _():
            y = acc_ref[...]
            if has_bias:
                y = y + b_ref[...]
            if act == "swish":
                y = y * jax.nn.sigmoid(y)
            elif act == "sigmoid":
                y = jax.nn.sigmoid(y)
            if has_res:
                y = y + r_ref[...]
            o_ref[...] = y.astype(o_ref.dtype)

    return kernel


def pallas_matmul(x, w, b=None, act="none", res=None, out_dtype=jnp.bfloat16,
                  tm=512, tn=256, tk=256):
    """x:[M,K] @ w:[K,N] (+b) with fused activation / residual, M/N/K tiled."""
    M, K = x.shape
    K2, N = w.shape
    assert K == K2
    tm = min(tm, _round_up(M, 8))
    tn = min(tn, _round_up(N, LANE))
    tk = min(tk, _round_up(K, LANE))
    Mp, Kp, Np = _round_up(M, tm), _round_up(K, tk), _round_up(N, tn)

    xp = x if (Mp == M and Kp == K) else jnp.pad(x, ((0, Mp - M), (0, Kp - K)))
    wp = w if (Kp == K and Np == N) else jnp.pad(w, ((0, Kp - K), (0, Np - N)))
    args = [xp, wp]
    in_specs = [
        pl.BlockSpec((tm, tk), lambda i, j, k: (i, k)),
        pl.BlockSpec((tk, tn), lambda i, j, k: (k, j)),
    ]
    if b is not None:
        bp = b.reshape(1, N)
        if Np != N:
            bp = jnp.pad(bp, ((0, 0), (0, Np - N)))
        args.append(bp)
        in_specs.append(pl.BlockSpec((1, tn), lambda i, j, k: (0, j)))
    if res is not None:
        rp = res if (Mp == M and Np == N) else jnp.pad(
            res, ((0, Mp - M), (0, Np - N)))
        args.append(rp)
        in_specs.append(pl.BlockSpec((tm, tn), lambda i, j, k: (i, j)))

    out = pl.pallas_call(
        _make_mm_kernel(act, b is not None, res is not None),
        out_shape=jax.ShapeDtypeStruct((Mp, Np), out_dtype),
        grid=(Mp // tm, Np // tn, Kp // tk),
        in_specs=in_specs,
        out_specs=pl.BlockSpec((tm, tn), lambda i, j, k: (i, j)),
        scratch_shapes=[pltpu.VMEM((tm, tn), jnp.float32)],
        compiler_params=pltpu.CompilerParams(
            dimension_semantics=("parallel", "parallel", "arbitrary"),
            vmem_limit_bytes=_VMEM_LIMIT),
    )(*args)
    if Mp == M and Np == N:
        return out
    return out[:M, :N]


# ---------------------------------------------------------------------------
# 2) Depthwise 3x3 (stride 1, SAME) + BN-folded bias + swish.
#    Row-tiled grid=(N, H/th); SAME padding handled in-kernel: the two halo
#    rows come in as extra single-row blocks (clamped index maps) and are
#    zeroed at the image edges -> no HBM pad copy.  The three W-shifted slabs
#    are hoisted once and reused by all three H taps.
# ---------------------------------------------------------------------------
def _dw_kernel(xc_ref, xt_ref, xb_ref, w_ref, b_ref, o_ref):
    t = pl.program_id(1)
    nt = pl.num_programs(1)
    th, W, C = o_ref.shape[1], o_ref.shape[2], o_ref.shape[3]

    # Halo rows, zeroed at the top/bottom image boundaries.
    top = xt_ref[0] * (t > 0).astype(xt_ref.dtype)            # (1, W, C)
    bot = xb_ref[0] * (t < nt - 1).astype(xb_ref.dtype)       # (1, W, C)
    xs = jnp.concatenate([top, xc_ref[0], bot], axis=0)       # (th+2, W, C)

    # Hoisted W-shifted slabs (2 sublane-shifted copies total, reused 3x each).
    zc = jnp.zeros((th + 2, 1, C), xs.dtype)
    x_l = jnp.concatenate([zc, xs[:, :W - 1, :]], axis=1)     # value = x[., w-1, .]
    x_r = jnp.concatenate([xs[:, 1:, :], zc], axis=1)         # value = x[., w+1, .]
    slabs = (x_l, xs, x_r)                                    # dj = 0, 1, 2

    w9 = w_ref[...]                                           # (9, C) f32
    acc = None
    for di in range(3):                                       # H taps: cheap plane slices
        for dj in range(3):
            term = slabs[dj][di:di + th] * w9[di * 3 + dj]
            acc = term if acc is None else acc + term
    y = acc + b_ref[...]
    o_ref[0] = (y * jax.nn.sigmoid(y)).astype(o_ref.dtype)


def pallas_depthwise3x3(x_nhwc, w, b):
    N, H, W, C = x_nhwc.shape
    th = _pick_divisor(H, 64)                                 # row-tile height

    def center_map(n, t):
        return (n, t, 0, 0)

    def top_map(n, t):
        return (n, jnp.maximum(t * th - 1, 0), 0, 0)          # row above the tile

    def bot_map(n, t):
        return (n, jnp.minimum(t * th + th, H - 1), 0, 0)     # row below the tile

    return pl.pallas_call(
        _dw_kernel,
        out_shape=jax.ShapeDtypeStruct((N, H, W, C), x_nhwc.dtype),
        grid=(N, H // th),
        in_specs=[
            pl.BlockSpec((1, th, W, C), center_map),
            pl.BlockSpec((1, 1, W, C), top_map),
            pl.BlockSpec((1, 1, W, C), bot_map),
            pl.BlockSpec((9, C), lambda n, t: (0, 0)),
            pl.BlockSpec((1, C), lambda n, t: (0, 0)),
        ],
        out_specs=pl.BlockSpec((1, th, W, C), center_map),
        compiler_params=pltpu.CompilerParams(
            dimension_semantics=("parallel", "parallel"),
            vmem_limit_bytes=_VMEM_LIMIT),
    )(x_nhwc, x_nhwc, x_nhwc, w, b.reshape(1, C))


# ---------------------------------------------------------------------------
# 3) Fused global-average-pool + SE squeeze FCs:
#       scales = sigmoid(swish(mean(x) @ w1 + b1) @ w2 + b2)
#    Tiled sum with a VMEM accumulator; FCs run in the finalize step.
#    (Divides by the real HW while summing zero-padded spatial rows — correct
#     because padding is exactly zero.)
# ---------------------------------------------------------------------------
def _make_gap_se_kernel(inv_hw):
    def kernel(x_ref, w1_ref, b1_ref, w2_ref, b2_ref, o_ref, acc_ref):
        t = pl.program_id(1)

        @pl.when(t == 0)
        def _():
            acc_ref[...] = jnp.zeros_like(acc_ref)

        acc_ref[...] += jnp.sum(x_ref[0].astype(jnp.float32), axis=0,
                                keepdims=True)

        @pl.when(t == pl.num_programs(1) - 1)
        def _():
            s = acc_ref[...] * inv_hw
            h = jnp.dot(s.astype(jnp.bfloat16), w1_ref[...],
                        preferred_element_type=jnp.float32) + b1_ref[...]
            h = h * jax.nn.sigmoid(h)
            y = jnp.dot(h.astype(jnp.bfloat16), w2_ref[...],
                        preferred_element_type=jnp.float32) + b2_ref[...]
            o_ref[0] = jax.nn.sigmoid(y)

    return kernel


def pallas_gap_se(x, w1, b1, w2, b2):
    """x: [N, HW, C] -> SE channel scales [N, C] (f32)."""
    N, HW, C = x.shape
    Cse = w1.shape[1]
    thw = min(512, _round_up(HW, 8))
    HWp = _round_up(HW, thw)
    xp = x if HWp == HW else jnp.pad(x, ((0, 0), (0, HWp - HW), (0, 0)))
    out = pl.pallas_call(
        _make_gap_se_kernel(1.0 / HW),
        out_shape=jax.ShapeDtypeStruct((N, 1, C), jnp.float32),
        grid=(N, HWp // thw),
        in_specs=[
            pl.BlockSpec((1, thw, C), lambda n, t: (n, t, 0)),
            pl.BlockSpec((C, Cse), lambda n, t: (0, 0)),
            pl.BlockSpec((1, Cse), lambda n, t: (0, 0)),
            pl.BlockSpec((Cse, C), lambda n, t: (0, 0)),
            pl.BlockSpec((1, C), lambda n, t: (0, 0)),
        ],
        out_specs=pl.BlockSpec((1, 1, C), lambda n, t: (n, 0, 0)),
        scratch_shapes=[pltpu.VMEM((1, C), jnp.float32)],
        compiler_params=pltpu.CompilerParams(
            dimension_semantics=("parallel", "arbitrary"),
            vmem_limit_bytes=_VMEM_LIMIT),
    )(xp, w1, b1.reshape(1, Cse), w2, b2.reshape(1, C))
    return out.reshape(N, C)


# ---------------------------------------------------------------------------
# 4) Fused MBConv tail:  out = (x * se_scale) @ w_proj + b_proj (+ residual)
# ---------------------------------------------------------------------------
def _make_proj_kernel(has_res):
    def kernel(*refs):
        refs = list(refs)
        x_ref = refs.pop(0)
        s_ref = refs.pop(0)
        w_ref = refs.pop(0)
        b_ref = refs.pop(0)
        r_ref = refs.pop(0) if has_res else None
        o_ref = refs.pop(0)

        xs = (x_ref[0] * s_ref[0]).astype(jnp.bfloat16)            # SE scale
        y = jnp.dot(xs, w_ref[...].astype(jnp.bfloat16),
                    preferred_element_type=jnp.float32) + b_ref[...]
        if has_res:
            y = y + r_ref[0]
        o_ref[0] = y.astype(o_ref.dtype)

    return kernel


def pallas_se_scale_project(x, s, w, b, res=None):
    """x:[N,HW,Cexp] * s:[N,Cexp] -> @ w:[Cexp,Cout] + b (+ res:[N,HW,Cout])."""
    N, HW, Cexp = x.shape
    Cout = w.shape[1]
    thw = min(512, _round_up(HW, 8))
    HWp = _round_up(HW, thw)
    if HWp != HW:
        x = jnp.pad(x, ((0, 0), (0, HWp - HW), (0, 0)))
        if res is not None:
            res = jnp.pad(res, ((0, 0), (0, HWp - HW), (0, 0)))

    in_specs = [
        pl.BlockSpec((1, thw, Cexp), lambda n, t: (n, t, 0)),
        pl.BlockSpec((1, 1, Cexp), lambda n, t: (n, 0, 0)),
        pl.BlockSpec((Cexp, Cout), lambda n, t: (0, 0)),
        pl.BlockSpec((1, Cout), lambda n, t: (0, 0)),
    ]
    args = [x, s.reshape(N, 1, Cexp), w, b.reshape(1, Cout)]
    if res is not None:
        in_specs.append(pl.BlockSpec((1, thw, Cout), lambda n, t: (n, t, 0)))
        args.append(res)

    out = pl.pallas_call(
        _make_proj_kernel(res is not None),
        out_shape=jax.ShapeDtypeStruct((N, HWp, Cout), jnp.bfloat16),
        grid=(N, HWp // thw),
        in_specs=in_specs,
        out_specs=pl.BlockSpec((1, thw, Cout), lambda n, t: (n, t, 0)),
        compiler_params=pltpu.CompilerParams(
            dimension_semantics=("parallel", "parallel"),
            vmem_limit_bytes=_VMEM_LIMIT),
    )(*args)
    return out if HWp == HW else out[:, :HW, :]


# ---------------------------------------------------------------------------
# 5) FiLM:  out = gamma_fc(x) * x + beta_fc(x), Linear over the W axis of the
#    NCHW tensor, computed on NHWC row-blocks of TB rows per grid step with a
#    single concatenated [2W, W] gamma/beta weight (batched einsum, no HBM
#    transposes).
# ---------------------------------------------------------------------------
def _film_kernel(x_ref, wgb_ref, bgb_ref, o_ref):
    X = x_ref[...].astype(jnp.float32)                            # (TB, W, C)
    TB, Wd = X.shape[0], X.shape[1]
    wgb = jnp.broadcast_to(wgb_ref[...], (TB,) + tuple(wgb_ref.shape))
    gb = jnp.einsum("bow,bwc->boc", wgb, X,
                    preferred_element_type=jnp.float32) + bgb_ref[...]
    g = gb[:, :Wd, :]
    bta = gb[:, Wd:, :]
    o_ref[...] = (g * X + bta).astype(o_ref.dtype)


def pallas_film(x_nhwc, wgb, bgb):
    N, H, W, C = x_nhwc.shape
    assert wgb.shape == (2 * W, W)
    NH = N * H
    TB = _pick_divisor(NH, 128)                                   # rows per step
    x3 = x_nhwc.reshape(NH, W, C)                                 # contiguous reshape
    out = pl.pallas_call(
        _film_kernel,
        out_shape=jax.ShapeDtypeStruct((NH, W, C), x_nhwc.dtype),
        grid=(NH // TB,),
        in_specs=[
            pl.BlockSpec((TB, W, C), lambda i: (i, 0, 0)),
            pl.BlockSpec((2 * W, W), lambda i: (0, 0)),
            pl.BlockSpec((2 * W, 1), lambda i: (0, 0)),
        ],
        out_specs=pl.BlockSpec((TB, W, C), lambda i: (i, 0, 0)),
        compiler_params=pltpu.CompilerParams(
            dimension_semantics=("parallel",),
            vmem_limit_bytes=_VMEM_LIMIT),
    )(x3, wgb, bgb)
    return out.reshape(N, H, W, C)


# ---------------------------------------------------------------------------
# 6) Fused global-average-pool + conv_head (1x1, bias-free, linear) + fc.
#    (GAP commutes exactly with the linear conv_head, so pool first; head and
#     fc run in the GAP finalize — the [N,HW,Chead] slab never hits HBM.)
# ---------------------------------------------------------------------------
def _make_gap_head_fc_kernel(inv_hw):
    def kernel(x_ref, wh_ref, wf_ref, bf_ref, o_ref, acc_ref):
        t = pl.program_id(1)

        @pl.when(t == 0)
        def _():
            acc_ref[...] = jnp.zeros_like(acc_ref)

        acc_ref[...] += jnp.sum(x_ref[0].astype(jnp.float32), axis=0,
                                keepdims=True)

        @pl.when(t == pl.num_programs(1) - 1)
        def _():
            s = acc_ref[...] * inv_hw
            h = jnp.dot(s.astype(jnp.bfloat16), wh_ref[...],
                        preferred_element_type=jnp.float32)
            y = jnp.dot(h.astype(jnp.bfloat16), wf_ref[...],
                        preferred_element_type=jnp.float32) + bf_ref[...]
            o_ref[0] = y

    return kernel


def pallas_gap_head_fc(x, w_head, w_fc, b_fc):
    """x: [N, HW, C] -> logits [N, Ncls_padded] (f32)."""
    N, HW, C = x.shape
    Ch = w_head.shape[1]
    Ncls = w_fc.shape[1]
    thw = min(512, _round_up(HW, 8))
    HWp = _round_up(HW, thw)
    xp = x if HWp == HW else jnp.pad(x, ((0, 0), (0, HWp - HW), (0, 0)))
    out = pl.pallas_call(
        _make_gap_head_fc_kernel(1.0 / HW),
        out_shape=jax.ShapeDtypeStruct((N, 1, Ncls), jnp.float32),
        grid=(N, HWp // thw),
        in_specs=[
            pl.BlockSpec((1, thw, C), lambda n, t: (n, t, 0)),
            pl.BlockSpec((C, Ch), lambda n, t: (0, 0)),
            pl.BlockSpec((Ch, Ncls), lambda n, t: (0, 0)),
            pl.BlockSpec((1, Ncls), lambda n, t: (0, 0)),
        ],
        out_specs=pl.BlockSpec((1, 1, Ncls), lambda n, t: (n, 0, 0)),
        scratch_shapes=[pltpu.VMEM((1, C), jnp.float32)],
        compiler_params=pltpu.CompilerParams(
            dimension_semantics=("parallel", "arbitrary"),
            vmem_limit_bytes=_VMEM_LIMIT),
    )(xp, w_head, w_fc, b_fc.reshape(1, Ncls))
    return out.reshape(N, Ncls)


# ---------------------------------------------------------------------------
# Glue: SAME padding / im2col for the (tiny, 3-channel) stem conv only.
# ---------------------------------------------------------------------------
def _same_pad(in_size, k, s):
    out = -(-in_size // s)
    total = max((out - 1) * s + k - in_size, 0)
    return total // 2, total - total // 2


def _im2col(x_nhwc, k, stride):
    """x: [N,H,W,C] -> patches [N,Ho,Wo,k*k,C] with TF/EfficientNet SAME pad."""
    N, H, W, C = x_nhwc.shape
    pt, pb = _same_pad(H, k, stride)
    plft, prgt = _same_pad(W, k, stride)
    xp = jnp.pad(x_nhwc, ((0, 0), (pt, pb), (plft, prgt), (0, 0)))
    Hp, Wp = xp.shape[1], xp.shape[2]
    Ho = (Hp - k) // stride + 1
    Wo = (Wp - k) // stride + 1
    taps = []
    for di in range(k):
        for dj in range(k):
            taps.append(
                xp[:, di:di + Ho * stride:stride, dj:dj + Wo * stride:stride, :])
    patches = jnp.stack(taps, axis=3)  # [N, Ho, Wo, k*k, C]
    return patches, Ho, Wo


# ---------------------------------------------------------------------------
# Model pieces
# ---------------------------------------------------------------------------
def mbconv_block(x, p):
    """Simplified MBConv (stride 1): expand(1x1) -> dw3x3 -> SE -> project (+skip).

    drop_connect is identity at inference time; BN folded into biases.
    """
    # TODO(synk): stride-2 / 5x5 depthwise MBConv variants not implemented.
    N, H, W, C = x.shape
    identity = x

    if p["expand"] != 1:
        y = pallas_matmul(x.reshape(N * H * W, C), p["w_exp"], p["b_exp"],
                          act="swish", out_dtype=jnp.bfloat16)
        x = y.reshape(N, H, W, C)

    # depthwise 3x3, stride 1, SAME padding, swish (row-tiled halo kernel)
    x = pallas_depthwise3x3(x, p["w_dw"], p["b_dw"])

    # squeeze & excite (GAP + both FCs fused into one kernel)
    s = pallas_gap_se(x.reshape(N, H * W, C),
                      p["w_se1"], p["b_se1"], p["w_se2"], p["b_se2"])

    # SE scale fused with the 1x1 project (+ residual when has_skip)
    res = identity.reshape(N, H * W, C) if p["has_skip"] else None
    out = pallas_se_scale_project(x.reshape(N, H * W, C), s,
                                  p["w_proj"], p["b_proj"], res=res)
    return out.reshape(N, H, W, C)


def film_efficientnet_forward(x_nchw, params):
    """Mirrors FiLMEfficientNet.forward (inference semantics)."""
    x = jnp.transpose(x_nchw, (0, 2, 3, 1)).astype(jnp.bfloat16)    # NHWC bf16

    # stem: conv 3x3 stride 2 (BN folded) + swish as a tiled im2col matmul.
    # (input has only 3 channels, so im2col stays in JAX for the stem only;
    #  the hot depthwise convs use in-kernel halo reads instead.)
    patches, Ho, Wo = _im2col(x, 3, 2)                  # [N,Ho,Wo,9,Cin]
    N = x.shape[0]
    Cin = x.shape[-1]
    flat = patches.reshape(N * Ho * Wo, 9 * Cin)
    C = params["w_stem"].shape[1]
    x = pallas_matmul(flat, params["w_stem"], params["b_stem"], act="swish",
                      out_dtype=jnp.bfloat16)
    x = x.reshape(N, Ho, Wo, C)

    # MBConv blocks; FiLM modulation after the last block
    blocks = params["blocks"]
    for idx, bp in enumerate(blocks):
        x = mbconv_block(x, bp)
        if idx == len(blocks) - 1:
            x = pallas_film(x, params["film_wgb"], params["film_bgb"])

    # conv_head (1x1, no bias; reference forward skips bn1/swish) + GAP + fc,
    # all fused into one kernel on the pooled features.
    Nb, Hb, Wb, Cb = x.shape
    logits = pallas_gap_head_fc(x.reshape(Nb, Hb * Wb, Cb),
                                params["w_head"], params["w_fc"],
                                params["b_fc"])
    return logits[:, :params["num_classes"]]


# ---------------------------------------------------------------------------
# Deterministic synthetic parameter init (no checkpoint loading).
# All channel axes are zero-padded to LANE=128 so every kernel is lane-dense;
# zero rows/columns keep the math exact on the real channels.  Matmul weights
# are stored bf16 in HBM (half the DMA on the bandwidth-bound matmuls).
# ---------------------------------------------------------------------------
def init_params(key, cin=3, c_stem=8, c_head=32, num_classes=10, film_dim=8):
    keys = iter(jax.random.split(key, 64))
    C = LANE
    BF = jnp.bfloat16

    def rnd(logical_shape, fan_in, padded_shape=None, dtype=jnp.float32):
        a = jax.random.normal(next(keys), logical_shape, jnp.float32)
        a = a / jnp.sqrt(jnp.float32(max(fan_in, 1)))
        if padded_shape is not None:
            a = _pad_to(a, padded_shape)          # zero-pad invariant
        return a.astype(dtype)

    def block(c_in, c_out, expand):
        c_exp = c_in * expand
        c_se = max(1, c_in // 4)
        p = {"expand": expand, "has_skip": (c_in == c_out)}
        if expand != 1:
            p["w_exp"] = rnd((c_in, c_exp), c_in, (C, C), BF)
            p["b_exp"] = rnd((c_exp,), c_in, (C,))
        p["w_dw"] = rnd((9, c_exp), 9, (9, C))
        p["b_dw"] = rnd((c_exp,), 9, (C,))
        p["w_se1"] = rnd((c_exp, c_se), c_exp, (C, C), BF)
        p["b_se1"] = rnd((c_se,), c_exp, (C,))
        p["w_se2"] = rnd((c_se, c_exp), c_se, (C, C), BF)
        p["b_se2"] = rnd((c_exp,), c_se, (C,))
        p["w_proj"] = rnd((c_exp, c_out), c_exp, (C, C), BF)
        p["b_proj"] = rnd((c_out,), c_exp, (C,))
        return p

    # gamma_fc / beta_fc: Linear(film_dim, film_dim) over the W axis of the
    # NCHW tensor (original module hard-codes 2048; scaled to the actual W=8
    # of this synthetic run).  Weights stored as left-multiply [out, in] and
    # concatenated gamma-then-beta into a single [2W, W] matrix (kept f32).
    wg = rnd((film_dim, film_dim), film_dim)
    bg = rnd((film_dim,), film_dim)
    wb = rnd((film_dim, film_dim), film_dim)
    bb = rnd((film_dim,), film_dim)

    params = {
        "num_classes": num_classes,
        "w_stem": rnd((9 * cin, c_stem), 9 * cin, (9 * cin, C), BF),
        "b_stem": rnd((c_stem,), 9 * cin, (C,)),
        "blocks": [
            block(c_stem, 16, expand=1),
            block(16, 16, expand=4),
            block(16, 24, expand=4),          # last block (FiLM follows)
        ],
        "film_wgb": jnp.concatenate([wg, wb], axis=0),                 # [2W, W]
        "film_bgb": jnp.concatenate([bg, bb], axis=0).reshape(2 * film_dim, 1),
        "w_head": rnd((24, c_head), 24, (C, C), BF),
        "w_fc": rnd((c_head, num_classes), c_head, (C, C), BF),
        "b_fc": rnd((num_classes,), c_head, (C,)),
    }
    return params


# ---------------------------------------------------------------------------
if __name__ == "__main__":
    key = jax.random.PRNGKey(0)
    k_x, k_p = jax.random.split(key)

    # small NCHW image input consistent with the module
    x = jax.random.normal(k_x, (2, 3, 16, 16), jnp.float32)   # [N, C, H, W]

    # spatial after the stride-2 stem is 8x8, so the FiLM Linear acts on dim 8
    params = init_params(k_p, cin=3, c_stem=8, c_head=32,
                         num_classes=10, film_dim=8)

    fwd = jax.jit(functools.partial(film_efficientnet_forward, params=params))
    out = jax.block_until_ready(fwd(x))

    assert out.shape == (2, 10), out.shape
    assert bool(jnp.all(jnp.isfinite(out)))
    print("KERNEL_OK")
</pallas_src>

<mosaic_0001>
module attributes {stable_mosaic.version = 11 : i64} {
  func.func @kernel(%arg0: i32, %arg1: i32, %arg2: i32, %arg3: memref<128x128xbf16, #tpu.memory_space<vmem>>, %arg4: memref<128x128xbf16, #tpu.memory_space<vmem>>, %arg5: memref<1x128xf32, #tpu.memory_space<vmem>>, %arg6: memref<128x128xbf16, #tpu.memory_space<vmem>>, %arg7: memref<128x128xf32, #tpu.memory_space<vmem>>) attributes {dimension_semantics = [#tpu.dimension_semantics<parallel>, #tpu.dimension_semantics<parallel>, #tpu.dimension_semantics<arbitrary>], iteration_bounds = array<i64: 1, 1, 1>, scalar_prefetch = 0 : i64, scratch_operands = 1 : i64, tpu.core_type = #tpu.core_type<tc>, window_params = [{transform_indices = @transform_0, window_bounds = array<i64: 128, 128>}, {transform_indices = @transform_1, window_bounds = array<i64: 128, 128>}, {transform_indices = @transform_2, window_bounds = array<i64: 1, 128>}, {transform_indices = @transform_3, window_bounds = array<i64: 128, 128>}]} {
    %c0_i32 = arith.constant 0 : i32
    %0 = arith.cmpi eq, %arg2, %c0_i32 : i32
    %1 = arith.extui %0 : i1 to i32
    %c0_i32_0 = arith.constant 0 : i32
    %2 = arith.cmpi ne, %1, %c0_i32_0 : i32
    scf.if %2 {
      %cst_10 = arith.constant 0.000000e+00 : f32
      %12 = vector.broadcast %cst_10 : f32 to vector<128x128xf32>
      %c0_11 = arith.constant 0 : index
      %c0_12 = arith.constant 0 : index
      %13 = vector.load %arg7[%c0_11, %c0_12] : memref<128x128xf32, #tpu.memory_space<vmem>>, vector<128x128xf32>
      tpu.vector_store %arg7[%c0_11, %c0_12], %12 {strides = array<i32>} : memref<128x128xf32, #tpu.memory_space<vmem>>, vector<128x128xf32>,
    } else {
    }
    %c0 = arith.constant 0 : index
    %c0_1 = arith.constant 0 : index
    %3 = vector.load %arg7[%c0, %c0_1] : memref<128x128xf32, #tpu.memory_space<vmem>>, vector<128x128xf32>
    %c0_2 = arith.constant 0 : index
    %c0_3 = arith.constant 0 : index
    %4 = vector.load %arg3[%c0_2, %c0_3] : memref<128x128xbf16, #tpu.memory_space<vmem>>, vector<128x128xbf16>
    %c0_4 = arith.constant 0 : index
    %c0_5 = arith.constant 0 : index
    %5 = vector.load %arg4[%c0_4, %c0_5] : memref<128x128xbf16, #tpu.memory_space<vmem>>, vector<128x128xbf16>
    %cst = arith.constant dense<0.000000e+00> : vector<128x128xf32>
    %6 = tpu.matmul %4, %5, %cst {dimension_numbers = #tpu.dot_dimension_numbers<[1], [0], [0], [1], [0, 0, 1, 1], [], []>} : vector<128x128xbf16>, vector<128x128xbf16>, vector<128x128xf32> -> vector<128x128xf32>
    %7 = arith.addf %3, %6 : vector<128x128xf32>
    %c0_6 = arith.constant 0 : index
    %c0_7 = arith.constant 0 : index
    %8 = vector.load %arg7[%c0_6, %c0_7] : memref<128x128xf32, #tpu.memory_space<vmem>>, vector<128x128xf32>
    tpu.vector_store %arg7[%c0_6, %c0_7], %7 {strides = array<i32>} : memref<128x128xf32, #tpu.memory_space<vmem>>, vector<128x128xf32>,
    %c0_i32_8 = arith.constant 0 : i32
    %9 = arith.cmpi eq, %arg2, %c0_i32_8 : i32
    %10 = arith.extui %9 : i1 to i32
    %c0_i32_9 = arith.constant 0 : i32
    %11 = arith.cmpi ne, %10, %c0_i32_9 : i32
    scf.if %11 {
      %c0_10 = arith.constant 0 : index
      %c0_11 = arith.constant 0 : index
      %12 = vector.load %arg7[%c0_10, %c0_11] : memref<128x128xf32, #tpu.memory_space<vmem>>, vector<128x128xf32>
      %c0_12 = arith.constant 0 : index
      %c0_13 = arith.constant 0 : index
      %13 = vector.load %arg5[%c0_12, %c0_13] : memref<1x128xf32, #tpu.memory_space<vmem>>, vector<1x128xf32>
      %14 = vector.broadcast %13 : vector<1x128xf32> to vector<128x128xf32>
      %15 = arith.addf %12, %14 : vector<128x128xf32>
      %16 = arith.negf %15 : vector<128x128xf32>
      %17 = math.exp %16 : vector<128x128xf32>
      %cst_14 = arith.constant 1.000000e+00 : f32
      %18 = vector.broadcast %cst_14 : f32 to vector<128x128xf32>
      %19 = arith.addf %18, %17 : vector<128x128xf32>
      %20 = arith.divf %18, %19 : vector<128x128xf32>
      %21 = arith.mulf %15, %20 : vector<128x128xf32>
      %22 = arith.truncf %21 : vector<128x128xf32> to vector<128x128xbf16>
      %c0_15 = arith.constant 0 : index
      %c0_16 = arith.constant 0 : index
      %23 = vector.load %arg6[%c0_15, %c0_16] : memref<128x128xbf16, #tpu.memory_space<vmem>>, vector<128x128xbf16>
      tpu.vector_store %arg6[%c0_15, %c0_16], %22 {strides = array<i32>} : memref<128x128xbf16, #tpu.memory_space<vmem>>, vector<128x128xbf16>,
    } else {
    }
    return
  }
  func.func @transform_0(%arg0: i32, %arg1: i32, %arg2: i32) -> (i32, i32) {
    %c0_i32 = arith.constant 0 : i32
    return %arg0, %arg2 : i32, i32
  }
  func.func @transform_1(%arg0: i32, %arg1: i32, %arg2: i32) -> (i32, i32) {
    %c0_i32 = arith.constant 0 : i32
    return %arg2, %arg1 : i32, i32
  }
  func.func @transform_2(%arg0: i32, %arg1: i32, %arg2: i32) -> (i32, i32) {
    %c0_i32 = arith.constant 0 : i32
    %c0_i32_0 = arith.constant 0 : i32
    return %c0_i32, %arg1 : i32, i32
  }
  func.func @transform_3(%arg0: i32, %arg1: i32, %arg2: i32) -> (i32, i32) {
    %c0_i32 = arith.constant 0 : i32
    return %arg0, %arg1 : i32, i32
  }
}

module attributes {stable_mosaic.version = 11 : i64} {
  func.func @kernel(%arg0: i32, %arg1: i32, %arg2: memref<1x64x128xbf16, #tpu.memory_space<vmem>>, %arg3: memref<128x128xbf16, #tpu.memory_space<vmem>>, %arg4: memref<1x128xf32, #tpu.memory_space<vmem>>, %arg5: memref<128x128xbf16, #tpu.memory_space<vmem>>, %arg6: memref<1x128xf32, #tpu.memory_space<vmem>>, %arg7: memref<1x1x128xf32, #tpu.memory_space<vmem>>, %arg8: memref<1x128xf32, #tpu.memory_space<vmem>>) attributes {dimension_semantics = [#tpu.dimension_semantics<parallel>, #tpu.dimension_semantics<arbitrary>], iteration_bounds = array<i64: 2, 1>, scalar_prefetch = 0 : i64, scratch_operands = 1 : i64, tpu.core_type = #tpu.core_type<tc>, window_params = [{transform_indices = @transform_0, window_bounds = array<i64: 1, 64, 128>}, {pipeline_mode = #tpu.pipeline_mode<synchronous>, transform_indices = @transform_1, window_bounds = array<i64: 128, 128>}, {pipeline_mode = #tpu.pipeline_mode<synchronous>, transform_indices = @transform_2, window_bounds = array<i64: 1, 128>}, {pipeline_mode = #tpu.pipeline_mode<synchronous>, transform_indices = @transform_3, window_bounds = array<i64: 128, 128>}, {pipeline_mode = #tpu.pipeline_mode<synchronous>, transform_indices = @transform_4, window_bounds = array<i64: 1, 128>}, {transform_indices = @transform_5, window_bounds = array<i64: 1, 1, 128>}]} {
    %c0_i32 = arith.constant 0 : i32
    %0 = arith.cmpi eq, %arg1, %c0_i32 : i32
    %1 = arith.extui %0 : i1 to i32
    %c0_i32_0 = arith.constant 0 : i32
    %2 = arith.cmpi ne, %1, %c0_i32_0 : i32
    scf.if %2 {
      %cst_9 = arith.constant 0.000000e+00 : f32
      %14 = vector.broadcast %cst_9 : f32 to vector<1x128xf32>
      %c0_10 = arith.constant 0 : index
      %c0_11 = arith.constant 0 : index
      %15 = vector.load %arg8[%c0_10, %c0_11] : memref<1x128xf32, #tpu.memory_space<vmem>>, vector<1x128xf32>
      tpu.vector_store %arg8[%c0_10, %c0_11], %14 {strides = array<i32>} : memref<1x128xf32, #tpu.memory_space<vmem>>, vector<1x128xf32>,
    } else {
    }
    %c0 = arith.constant 0 : index
    %c0_1 = arith.constant 0 : index
    %3 = vector.load %arg8[%c0, %c0_1] : memref<1x128xf32, #tpu.memory_space<vmem>>, vector<1x128xf32>
    %c0_2 = arith.constant 0 : index
    %c0_3 = arith.constant 0 : index
    %c0_4 = arith.constant 0 : index
    %4 = vector.load %arg2[%c0_2, %c0_3, %c0_4] : memref<1x64x128xbf16, #tpu.memory_space<vmem>>, vector<1x64x128xbf16>
    %5 = vector.shape_cast %4 : vector<1x64x128xbf16> to vector<64x128xbf16>
    %6 = arith.extf %5 : vector<64x128xbf16> to vector<64x128xf32>
    %cst = arith.constant dense<0.000000e+00> : vector<128xf32>
    %7 = vector.multi_reduction <add>, %6, %cst [0] : vector<64x128xf32> to vector<128xf32>
    %8 = vector.shape_cast %7 : vector<128xf32> to vector<1x128xf32>
    %9 = arith.addf %3, %8 : vector<1x128xf32>
    %c0_5 = arith.constant 0 : index
    %c0_6 = arith.constant 0 : index
    %10 = vector.load %arg8[%c0_5, %c0_6] : memref<1x128xf32, #tpu.memory_space<vmem>>, vector<1x128xf32>
    tpu.vector_store %arg8[%c0_5, %c0_6], %9 {strides = array<i32>} : memref<1x128xf32, #tpu.memory_space<vmem>>, vector<1x128xf32>,
    %c0_i32_7 = arith.constant 0 : i32
    %11 = arith.cmpi eq, %arg1, %c0_i32_7 : i32
    %12 = arith.extui %11 : i1 to i32
    %c0_i32_8 = arith.constant 0 : i32
    %13 = arith.cmpi ne, %12, %c0_i32_8 : i32
    scf.if %13 {
      %c0_9 = arith.constant 0 : index
      %c0_10 = arith.constant 0 : index
      %14 = vector.load %arg8[%c0_9, %c0_10] : memref<1x128xf32, #tpu.memory_space<vmem>>, vector<1x128xf32>
      %cst_11 = arith.constant 1.562500e-02 : f32
      %15 = vector.broadcast %cst_11 : f32 to vector<1x128xf32>
      %16 = arith.mulf %14, %15 : vector<1x128xf32>
      %17 = arith.truncf %16 : vector<1x128xf32> to vector<1x128xbf16>
      %c0_12 = arith.constant 0 : index
      %c0_13 = arith.constant 0 : index
      %18 = vector.load %arg3[%c0_12, %c0_13] : memref<128x128xbf16, #tpu.memory_space<vmem>>, vector<128x128xbf16>
      %cst_14 = arith.constant dense<0.000000e+00> : vector<1x128xf32>
      %19 = tpu.matmul %17, %18, %cst_14 {dimension_numbers = #tpu.dot_dimension_numbers<[1], [0], [0], [1], [0, 0, 1, 1], [], []>} : vector<1x128xbf16>, vector<128x128xbf16>, vector<1x128xf32> -> vector<1x128xf32>
      %c0_15 = arith.constant 0 : index
      %c0_16 = arith.constant 0 : index
      %20 = vector.load %arg4[%c0_15, %c0_16] : memref<1x128xf32, #tpu.memory_space<vmem>>, vector<1x128xf32>
      %21 = arith.addf %19, %20 : vector<1x128xf32>
      %22 = arith.negf %21 : vector<1x128xf32>
      %23 = math.exp %22 : vector<1x128xf32>
      %cst_17 = arith.constant 1.000000e+00 : f32
      %24 = vector.broadcast %cst_17 : f32 to vector<1x128xf32>
      %25 = arith.addf %24, %23 : vector<1x128xf32>
      %26 = arith.divf %24, %25 : vector<1x128xf32>
      %27 = arith.mulf %21, %26 : vector<1x128xf32>
      %28 = arith.truncf %27 : vector<1x128xf32> to vector<1x128xbf16>
      %c0_18 = arith.constant 0 : index
      %c0_19 = arith.constant 0 : index
      %29 = vector.load %arg5[%c0_18, %c0_19] : memref<128x128xbf16, #tpu.memory_space<vmem>>, vector<128x128xbf16>
      %cst_20 = arith.constant dense<0.000000e+00> : vector<1x128xf32>
      %30 = tpu.matmul %28, %29, %cst_20 {dimension_numbers = #tpu.dot_dimension_numbers<[1], [0], [0], [1], [0, 0, 1, 1], [], []>} : vector<1x128xbf16>, vector<128x128xbf16>, vector<1x128xf32> -> vector<1x128xf32>
      %c0_21 = arith.constant 0 : index
      %c0_22 = arith.constant 0 : index
      %31 = vector.load %arg6[%c0_21, %c0_22] : memref<1x128xf32, #tpu.memory_space<vmem>>, vector<1x128xf32>
      %32 = arith.addf %30, %31 : vector<1x128xf32>
      %33 = arith.negf %32 : vector<1x128xf32>
      %34 = math.exp %33 : vector<1x128xf32>
      %cst_23 = arith.constant 1.000000e+00 : f32
      %35 = vector.broadcast %cst_23 : f32 to vector<1x128xf32>
      %36 = arith.addf %35, %34 : vector<1x128xf32>
      %37 = arith.divf %35, %36 : vector<1x128xf32>
      %c0_24 = arith.constant 0 : index
      %c0_25 = arith.constant 0 : index
      %c0_26 = arith.constant 0 : index
      %38 = vector.load %arg7[%c0_24, %c0_25, %c0_26] : memref<1x1x128xf32, #tpu.memory_space<vmem>>, vector<1x1x128xf32>
      %39 = vector.shape_cast %38 : vector<1x1x128xf32> to vector<1x128xf32>
      %40 = vector.shape_cast %37 : vector<1x128xf32> to vector<1x1x128xf32>
      tpu.vector_store %arg7[%c0_24, %c0_25, %c0_26], %40 {strides = array<i32>} : memref<1x1x128xf32, #tpu.memory_space<vmem>>, vector<1x1x128xf32>,
    } else {
    }
    return
  }
  func.func @transform_0(%arg0: i32, %arg1: i32) -> (i32, i32, i32) {
    %c0_i32 = arith.constant 0 : i32
    %c0_i32_0 = arith.constant 0 : i32
    return %arg0, %arg1, %c0_i32 : i32, i32, i32
  }
  func.func @transform_1(%arg0: i32, %arg1: i32) -> (i32, i32) {
    %c0_i32 = arith.constant 0 : i32
    %c0_i32_0 = arith.constant 0 : i32
    %c0_i32_1 = arith.constant 0 : i32
    return %c0_i32, %c0_i32_0 : i32, i32
  }
  func.func @transform_2(%arg0: i32, %arg1: i32) -> (i32, i32) {
    %c0_i32 = arith.constant 0 : i32
    %c0_i32_0 = arith.constant 0 : i32
    %c0_i32_1 = arith.constant 0 : i32
    return %c0_i32, %c0_i32_0 : i32, i32
  }
  func.func @transform_3(%arg0: i32, %arg1: i32) -> (i32, i32) {
    %c0_i32 = arith.constant 0 : i32
    %c0_i32_0 = arith.constant 0 : i32
    %c0_i32_1 = arith.constant 0 : i32
    return %c0_i32, %c0_i32_0 : i32, i32
  }
  func.func @transform_4(%arg0: i32, %arg1: i32) -> (i32, i32) {
    %c0_i32 = arith.constant 0 : i32
    %c0_i32_0 = arith.constant 0 : i32
    %c0_i32_1 = arith.constant 0 : i32
    return %c0_i32, %c0_i32_0 : i32, i32
  }
  func.func @transform_5(%arg0: i32, %arg1: i32) -> (i32, i32, i32) {
    %c0_i32 = arith.constant 0 : i32
    %c0_i32_0 = arith.constant 0 : i32
    %c0_i32_1 = arith.constant 0 : i32
    return %arg0, %c0_i32, %c0_i32_0 : i32, i32, i32
  }
}

module attributes {stable_mosaic.version = 11 : i64} {
  func.func @_dw_kernel(%arg0: i32, %arg1: i32, %arg2: memref<1x8x8x128xbf16, #tpu.memory_space<vmem>>, %arg3: memref<1x1x8x128xbf16, #tpu.memory_space<vmem>>, %arg4: memref<1x1x8x128xbf16, #tpu.memory_space<vmem>>, %arg5: memref<9x128xf32, #tpu.memory_space<vmem>>, %arg6: memref<1x128xf32, #tpu.memory_space<vmem>>, %arg7: memref<1x8x8x128xbf16, #tpu.memory_space<vmem>>) attributes {dimension_semantics = [#tpu.dimension_semantics<parallel>, #tpu.dimension_semantics<parallel>], iteration_bounds = array<i64: 2, 1>, scalar_prefetch = 0 : i64, scratch_operands = 0 : i64, tpu.core_type = #tpu.core_type<tc>, window_params = [{transform_indices = @transform_0, window_bounds = array<i64: 1, 8, 8, 128>}, {transform_indices = @transform_1, window_bounds = array<i64: 1, 1, 8, 128>}, {transform_indices = @transform_2, window_bounds = array<i64: 1, 1, 8, 128>}, {pipeline_mode = #tpu.pipeline_mode<synchronous>, transform_indices = @transform_3, window_bounds = array<i64: 9, 128>}, {pipeline_mode = #tpu.pipeline_mode<synchronous>, transform_indices = @transform_4, window_bounds = array<i64: 1, 128>}, {transform_indices = @transform_5, window_bounds = array<i64: 1, 8, 8, 128>}]} {
    %c0 = arith.constant 0 : index
    %c0_0 = arith.constant 0 : index
    %c0_1 = arith.constant 0 : index
    %c0_2 = arith.constant 0 : index
    %0 = vector.load %arg3[%c0, %c0_0, %c0_1, %c0_2] : memref<1x1x8x128xbf16, #tpu.memory_space<vmem>>, vector<1x1x8x128xbf16>
    %1 = vector.shape_cast %0 : vector<1x1x8x128xbf16> to vector<1x8x128xbf16>
    %c0_i32 = arith.constant 0 : i32
    %2 = arith.cmpi sgt, %arg1, %c0_i32 : i32
    %3 = arith.extui %2 : i1 to i32
    %4 = arith.sitofp %3 : i32 to f32
    %5 = arith.truncf %4 : f32 to bf16
    %6 = vector.broadcast %5 : bf16 to vector<1x8x128xbf16>
    %7 = arith.mulf %1, %6 : vector<1x8x128xbf16>
    %c0_3 = arith.constant 0 : index
    %c0_4 = arith.constant 0 : index
    %c0_5 = arith.constant 0 : index
    %c0_6 = arith.constant 0 : index
    %8 = vector.load %arg4[%c0_3, %c0_4, %c0_5, %c0_6] : memref<1x1x8x128xbf16, #tpu.memory_space<vmem>>, vector<1x1x8x128xbf16>
    %9 = vector.shape_cast %8 : vector<1x1x8x128xbf16> to vector<1x8x128xbf16>
    %c0_i32_7 = arith.constant 0 : i32
    %10 = arith.cmpi slt, %arg1, %c0_i32_7 : i32
    %11 = arith.extui %10 : i1 to i32
    %12 = arith.sitofp %11 : i32 to f32
    %13 = arith.truncf %12 : f32 to bf16
    %14 = vector.broadcast %13 : bf16 to vector<1x8x128xbf16>
    %15 = arith.mulf %9, %14 : vector<1x8x128xbf16>
    %c0_8 = arith.constant 0 : index
    %c0_9 = arith.constant 0 : index
    %c0_10 = arith.constant 0 : index
    %c0_11 = arith.constant 0 : index
    %16 = vector.load %arg2[%c0_8, %c0_9, %c0_10, %c0_11] : memref<1x8x8x128xbf16, #tpu.memory_space<vmem>>, vector<1x8x8x128xbf16>
    %17 = vector.shape_cast %16 : vector<1x8x8x128xbf16> to vector<8x8x128xbf16>
    %18 = tpu.concatenate %7, %17, %15 in 0 : vector<1x8x128xbf16>, vector<8x8x128xbf16>, vector<1x8x128xbf16> -> vector<10x8x128xbf16>
    %cst = arith.constant 0.000000e+00 : bf16
    %19 = vector.broadcast %cst : bf16 to vector<10x1x128xbf16>
    %20 = vector.extract_strided_slice %18 {offsets = [0, 0, 0], sizes = [10, 7, 128], strides = [1, 1, 1]} : vector<10x8x128xbf16> to vector<10x7x128xbf16>
    %21 = tpu.concatenate %19, %20 in 1 : vector<10x1x128xbf16>, vector<10x7x128xbf16> -> vector<10x8x128xbf16>
    %22 = vector.extract_strided_slice %18 {offsets = [0, 1, 0], sizes = [10, 7, 128], strides = [1, 1, 1]} : vector<10x8x128xbf16> to vector<10x7x128xbf16>
    %23 = tpu.concatenate %22, %19 in 1 : vector<10x7x128xbf16>, vector<10x1x128xbf16> -> vector<10x8x128xbf16>
    %c0_12 = arith.constant 0 : index
    %c0_13 = arith.constant 0 : index
    %24 = vector.load %arg5[%c0_12, %c0_13] : memref<9x128xf32, #tpu.memory_space<vmem>>, vector<9x128xf32>
    %25 = vector.extract_strided_slice %21 {offsets = [0, 0, 0], sizes = [8, 8, 128], strides = [1, 1, 1]} : vector<10x8x128xbf16> to vector<8x8x128xbf16>
    %26 = vector.extract_strided_slice %24 {offsets = [0, 0], sizes = [1, 128], strides = [1, 1]} : vector<9x128xf32> to vector<1x128xf32>
    %27 = vector.shape_cast %26 : vector<1x128xf32> to vector<128xf32>
    %28 = arith.extf %25 : vector<8x8x128xbf16> to vector<8x8x128xf32>
    %29 = vector.shape_cast %27 : vector<128xf32> to vector<1x1x128xf32>
    %30 = vector.broadcast %29 : vector<1x1x128xf32> to vector<8x8x128xf32>
    %31 = arith.mulf %28, %30 : vector<8x8x128xf32>
    %32 = vector.extract_strided_slice %18 {offsets = [0, 0, 0], sizes = [8, 8, 128], strides = [1, 1, 1]} : vector<10x8x128xbf16> to vector<8x8x128xbf16>
    %33 = vector.extract_strided_slice %24 {offsets = [1, 0], sizes = [1, 128], strides = [1, 1]} : vector<9x128xf32> to vector<1x128xf32>
    %34 = vector.shape_cast %33 : vector<1x128xf32> to vector<128xf32>
    %35 = arith.extf %32 : vector<8x8x128xbf16> to vector<8x8x128xf32>
    %36 = vector.shape_cast %34 : vector<128xf32> to vector<1x1x128xf32>
    %37 = vector.broadcast %36 : vector<1x1x128xf32> to vector<8x8x128xf32>
    %38 = arith.mulf %35, %37 : vector<8x8x128xf32>
    %39 = arith.addf %31, %38 : vector<8x8x128xf32>
    %40 = vector.extract_strided_slice %23 {offsets = [0, 0, 0], sizes = [8, 8, 128], strides = [1, 1, 1]} : vector<10x8x128xbf16> to vector<8x8x128xbf16>
    %41 = vector.extract_strided_slice %24 {offsets = [2, 0], sizes = [1, 128], strides = [1, 1]} : vector<9x128xf32> to vector<1x128xf32>
    %42 = vector.shape_cast %41 : vector<1x128xf32> to vector<128xf32>
    %43 = arith.extf %40 : vector<8x8x128xbf16> to vector<8x8x128xf32>
    %44 = vector.shape_cast %42 : vector<128xf32> to vector<1x1x128xf32>
    %45 = vector.broadcast %44 : vector<1x1x128xf32> to vector<8x8x128xf32>
    %46 = arith.mulf %43, %45 : vector<8x8x128xf32>
    %47 = arith.addf %39, %46 : vector<8x8x128xf32>
    %48 = vector.extract_strided_slice %21 {offsets = [1, 0, 0], sizes = [8, 8, 128], strides = [1, 1, 1]} : vector<10x8x128xbf16> to vector<8x8x128xbf16>
    %49 = vector.extract_strided_slice %24 {offsets = [3, 0], sizes = [1, 128], strides = [1, 1]} : vector<9x128xf32> to vector<1x128xf32>
    %50 = vector.shape_cast %49 : vector<1x128xf32> to vector<128xf32>
    %51 = arith.extf %48 : vector<8x8x128xbf16> to vector<8x8x128xf32>
    %52 = vector.shape_cast %50 : vector<128xf32> to vector<1x1x128xf32>
    %53 = vector.broadcast %52 : vector<1x1x128xf32> to vector<8x8x128xf32>
    %54 = arith.mulf %51, %53 : vector<8x8x128xf32>
    %55 = arith.addf %47, %54 : vector<8x8x128xf32>
    %56 = vector.extract_strided_slice %18 {offsets = [1, 0, 0], sizes = [8, 8, 128], strides = [1, 1, 1]} : vector<10x8x128xbf16> to vector<8x8x128xbf16>
    %57 = vector.extract_strided_slice %24 {offsets = [4, 0], sizes = [1, 128], strides = [1, 1]} : vector<9x128xf32> to vector<1x128xf32>
    %58 = vector.shape_cast %57 : vector<1x128xf32> to vector<128xf32>
    %59 = arith.extf %56 : vector<8x8x128xbf16> to vector<8x8x128xf32>
    %60 = vector.shape_cast %58 : vector<128xf32> to vector<1x1x128xf32>
    %61 = vector.broadcast %60 : vector<1x1x128xf32> to vector<8x8x128xf32>
    %62 = arith.mulf %59, %61 : vector<8x8x128xf32>
    %63 = arith.addf %55, %62 : vector<8x8x128xf32>
    %64 = vector.extract_strided_slice %23 {offsets = [1, 0, 0], sizes = [8, 8, 128], strides = [1, 1, 1]} : vector<10x8x128xbf16> to vector<8x8x128xbf16>
    %65 = vector.extract_strided_slice %24 {offsets = [5, 0], sizes = [1, 128], strides = [1, 1]} : vector<9x128xf32> to vector<1x128xf32>
    %66 = vector.shape_cast %65 : vector<1x128xf32> to vector<128xf32>
    %67 = arith.extf %64 : vector<8x8x128xbf16> to vector<8x8x128xf32>
    %68 = vector.shape_cast %66 : vector<128xf32> to vector<1x1x128xf32>
    %69 = vector.broadcast %68 : vector<1x1x128xf32> to vector<8x8x128xf32>
    %70 = arith.mulf %67, %69 : vector<8x8x128xf32>
    %71 = arith.addf %63, %70 : vector<8x8x128xf32>
    %72 = vector.extract_strided_slice %21 {offsets = [2, 0, 0], sizes = [8, 8, 128], strides = [1, 1, 1]} : vector<10x8x128xbf16> to vector<8x8x128xbf16>
    %73 = vector.extract_strided_slice %24 {offsets = [6, 0], sizes = [1, 128], strides = [1, 1]} : vector<9x128xf32> to vector<1x128xf32>
    %74 = vector.shape_cast %73 : vector<1x128xf32> to vector<128xf32>
    %75 = arith.extf %72 : vector<8x8x128xbf16> to vector<8x8x128xf32>
    %76 = vector.shape_cast %74 : vector<128xf32> to vector<1x1x128xf32>
    %77 = vector.broadcast %76 : vector<1x1x128xf32> to vector<8x8x128xf32>
    %78 = arith.mulf %75, %77 : vector<8x8x128xf32>
    %79 = arith.addf %71, %78 : vector<8x8x128xf32>
    %80 = vector.extract_strided_slice %18 {offsets = [2, 0, 0], sizes = [8, 8, 128], strides = [1, 1, 1]} : vector<10x8x128xbf16> to vector<8x8x128xbf16>
    %81 = vector.extract_strided_slice %24 {offsets = [7, 0], sizes = [1, 128], strides = [1, 1]} : vector<9x128xf32> to vector<1x128xf32>
    %82 = vector.shape_cast %81 : vector<1x128xf32> to vector<128xf32>
    %83 = arith.extf %80 : vector<8x8x128xbf16> to vector<8x8x128xf32>
    %84 = vector.shape_cast %82 : vector<128xf32> to vector<1x1x128xf32>
    %85 = vector.broadcast %84 : vector<1x1x128xf32> to vector<8x8x128xf32>
    %86 = arith.mulf %83, %85 : vector<8x8x128xf32>
    %87 = arith.addf %79, %86 : vector<8x8x128xf32>
    %88 = vector.extract_strided_slice %23 {offsets = [2, 0, 0], sizes = [8, 8, 128], strides = [1, 1, 1]} : vector<10x8x128xbf16> to vector<8x8x128xbf16>
    %89 = vector.extract_strided_slice %24 {offsets = [8, 0], sizes = [1, 128], strides = [1, 1]} : vector<9x128xf32> to vector<1x128xf32>
    %90 = vector.shape_cast %89 : vector<1x128xf32> to vector<128xf32>
    %91 = arith.extf %88 : vector<8x8x128xbf16> to vector<8x8x128xf32>
    %92 = vector.shape_cast %90 : vector<128xf32> to vector<1x1x128xf32>
    %93 = vector.broadcast %92 : vector<1x1x128xf32> to vector<8x8x128xf32>
    %94 = arith.mulf %91, %93 : vector<8x8x128xf32>
    %95 = arith.addf %87, %94 : vector<8x8x128xf32>
    %c0_14 = arith.constant 0 : index
    %c0_15 = arith.constant 0 : index
    %96 = vector.load %arg6[%c0_14, %c0_15] : memref<1x128xf32, #tpu.memory_space<vmem>>, vector<1x128xf32>
    %97 = vector.shape_cast %96 : vector<1x128xf32> to vector<1x1x128xf32>
    %98 = vector.broadcast %97 : vector<1x1x128xf32> to vector<8x8x128xf32>
    %99 = arith.addf %95, %98 : vector<8x8x128xf32>
    %100 = arith.negf %99 : vector<8x8x128xf32>
    %101 = math.exp %100 : vector<8x8x128xf32>
    %cst_16 = arith.constant 1.000000e+00 : f32
    %102 = vector.broadcast %cst_16 : f32 to vector<8x8x128xf32>
    %103 = arith.addf %102, %101 : vector<8x8x128xf32>
    %104 = arith.divf %102, %103 : vector<8x8x128xf32>
    %105 = arith.mulf %99, %104 : vector<8x8x128xf32>
    %106 = arith.truncf %105 : vector<8x8x128xf32> to vector<8x8x128xbf16>
    %c0_17 = arith.constant 0 : index
    %c0_18 = arith.constant 0 : index
    %c0_19 = arith.constant 0 : index
    %c0_20 = arith.constant 0 : index
    %107 = vector.load %arg7[%c0_17, %c0_18, %c0_19, %c0_20] : memref<1x8x8x128xbf16, #tpu.memory_space<vmem>>, vector<1x8x8x128xbf16>
    %108 = vector.shape_cast %107 : vector<1x8x8x128xbf16> to vector<8x8x128xbf16>
    %109 = vector.shape_cast %106 : vector<8x8x128xbf16> to vector<1x8x8x128xbf16>
    tpu.vector_store %arg7[%c0_17, %c0_18, %c0_19, %c0_20], %109 {strides = array<i32>} : memref<1x8x8x128xbf16, #tpu.memory_space<vmem>>, vector<1x8x8x128xbf16>,
    return
  }
  func.func @transform_0(%arg0: i32, %arg1: i32) -> (i32, i32, i32, i32) {
    %c0_i32 = arith.constant 0 : i32
    %c0_i32_0 = arith.constant 0 : i32
    %c0_i32_1 = arith.constant 0 : i32
    return %arg0, %arg1, %c0_i32, %c0_i32_0 : i32, i32, i32, i32
  }
  func.func @transform_1(%arg0: i32, %arg1: i32) -> (i32, i32, i32, i32) {
    %c8_i32 = arith.constant 8 : i32
    %0 = arith.muli %arg1, %c8_i32 : i32
    %c1_i32 = arith.constant 1 : i32
    %1 = arith.subi %0, %c1_i32 : i32
    %c0_i32 = arith.constant 0 : i32
    %2 = arith.maxsi %1, %c0_i32 : i32
    %c0_i32_0 = arith.constant 0 : i32
    %c0_i32_1 = arith.constant 0 : i32
    %c0_i32_2 = arith.constant 0 : i32
    return %arg0, %2, %c0_i32_0, %c0_i32_1 : i32, i32, i32, i32
  }
  func.func @transform_2(%arg0: i32, %arg1: i32) -> (i32, i32, i32, i32) {
    %c8_i32 = arith.constant 8 : i32
    %0 = arith.muli %arg1, %c8_i32 : i32
    %c8_i32_0 = arith.constant 8 : i32
    %1 = arith.addi %0, %c8_i32_0 : i32
    %c7_i32 = arith.constant 7 : i32
    %2 = arith.minsi %1, %c7_i32 : i32
    %c0_i32 = arith.constant 0 : i32
    %c0_i32_1 = arith.constant 0 : i32
    %c0_i32_2 = arith.constant 0 : i32
    return %arg0, %2, %c0_i32, %c0_i32_1 : i32, i32, i32, i32
  }
  func.func @transform_3(%arg0: i32, %arg1: i32) -> (i32, i32) {
    %c0_i32 = arith.constant 0 : i32
    %c0_i32_0 = arith.constant 0 : i32
    %c0_i32_1 = arith.constant 0 : i32
    return %c0_i32, %c0_i32_0 : i32, i32
  }
  func.func @transform_4(%arg0: i32, %arg1: i32) -> (i32, i32) {
    %c0_i32 = arith.constant 0 : i32
    %c0_i32_0 = arith.constant 0 : i32
    %c0_i32_1 = arith.constant 0 : i32
    return %c0_i32, %c0_i32_0 : i32, i32
  }
  func.func @transform_5(%arg0: i32, %arg1: i32) -> (i32, i32, i32, i32) {
    %c0_i32 = arith.constant 0 : i32
    %c0_i32_0 = arith.constant 0 : i32
    %c0_i32_1 = arith.constant 0 : i32
    return %arg0, %arg1, %c0_i32, %c0_i32_0 : i32, i32, i32, i32
  }
}

module attributes {stable_mosaic.version = 11 : i64} {
  func.func @kernel(%arg0: i32, %arg1: i32, %arg2: memref<1x64x128xbf16, #tpu.memory_space<vmem>>, %arg3: memref<1x1x128xf32, #tpu.memory_space<vmem>>, %arg4: memref<128x128xbf16, #tpu.memory_space<vmem>>, %arg5: memref<1x128xf32, #tpu.memory_space<vmem>>, %arg6: memref<1x64x128xbf16, #tpu.memory_space<vmem>>) attributes {dimension_semantics = [#tpu.dimension_semantics<parallel>, #tpu.dimension_semantics<parallel>], iteration_bounds = array<i64: 2, 1>, scalar_prefetch = 0 : i64, scratch_operands = 0 : i64, tpu.core_type = #tpu.core_type<tc>, window_params = [{transform_indices = @transform_0, window_bounds = array<i64: 1, 64, 128>}, {transform_indices = @transform_1, window_bounds = array<i64: 1, 1, 128>}, {pipeline_mode = #tpu.pipeline_mode<synchronous>, transform_indices = @transform_2, window_bounds = array<i64: 128, 128>}, {pipeline_mode = #tpu.pipeline_mode<synchronous>, transform_indices = @transform_3, window_bounds = array<i64: 1, 128>}, {transform_indices = @transform_4, window_bounds = array<i64: 1, 64, 128>}]} {
    %c0 = arith.constant 0 : index
    %c0_0 = arith.constant 0 : index
    %c0_1 = arith.constant 0 : index
    %0 = vector.load %arg2[%c0, %c0_0, %c0_1] : memref<1x64x128xbf16, #tpu.memory_space<vmem>>, vector<1x64x128xbf16>
    %1 = vector.shape_cast %0 : vector<1x64x128xbf16> to vector<64x128xbf16>
    %c0_2 = arith.constant 0 : index
    %c0_3 = arith.constant 0 : index
    %c0_4 = arith.constant 0 : index
    %2 = vector.load %arg3[%c0_2, %c0_3, %c0_4] : memref<1x1x128xf32, #tpu.memory_space<vmem>>, vector<1x1x128xf32>
    %3 = vector.shape_cast %2 : vector<1x1x128xf32> to vector<1x128xf32>
    %4 = arith.extf %1 : vector<64x128xbf16> to vector<64x128xf32>
    %5 = vector.broadcast %3 : vector<1x128xf32> to vector<64x128xf32>
    %6 = arith.mulf %4, %5 : vector<64x128xf32>
    %7 = arith.truncf %6 : vector<64x128xf32> to vector<64x128xbf16>
    %c0_5 = arith.constant 0 : index
    %c0_6 = arith.constant 0 : index
    %8 = vector.load %arg4[%c0_5, %c0_6] : memref<128x128xbf16, #tpu.memory_space<vmem>>, vector<128x128xbf16>
    %cst = arith.constant dense<0.000000e+00> : vector<64x128xf32>
    %9 = tpu.matmul %7, %8, %cst {dimension_numbers = #tpu.dot_dimension_numbers<[1], [0], [0], [1], [0, 0, 1, 1], [], []>} : vector<64x128xbf16>, vector<128x128xbf16>, vector<64x128xf32> -> vector<64x128xf32>
    %c0_7 = arith.constant 0 : index
    %c0_8 = arith.constant 0 : index
    %10 = vector.load %arg5[%c0_7, %c0_8] : memref<1x128xf32, #tpu.memory_space<vmem>>, vector<1x128xf32>
    %11 = vector.broadcast %10 : vector<1x128xf32> to vector<64x128xf32>
    %12 = arith.addf %9, %11 : vector<64x128xf32>
    %13 = arith.truncf %12 : vector<64x128xf32> to vector<64x128xbf16>
    %c0_9 = arith.constant 0 : index
    %c0_10 = arith.constant 0 : index
    %c0_11 = arith.constant 0 : index
    %14 = vector.load %arg6[%c0_9, %c0_10, %c0_11] : memref<1x64x128xbf16, #tpu.memory_space<vmem>>, vector<1x64x128xbf16>
    %15 = vector.shape_cast %14 : vector<1x64x128xbf16> to vector<64x128xbf16>
    %16 = vector.shape_cast %13 : vector<64x128xbf16> to vector<1x64x128xbf16>
    tpu.vector_store %arg6[%c0_9, %c0_10, %c0_11], %16 {strides = array<i32>} : memref<1x64x128xbf16, #tpu.memory_space<vmem>>, vector<1x64x128xbf16>,
    return
  }
  func.func @transform_0(%arg0: i32, %arg1: i32) -> (i32, i32, i32) {
    %c0_i32 = arith.constant 0 : i32
    %c0_i32_0 = arith.constant 0 : i32
    return %arg0, %arg1, %c0_i32 : i32, i32, i32
  }
  func.func @transform_1(%arg0: i32, %arg1: i32) -> (i32, i32, i32) {
    %c0_i32 = arith.constant 0 : i32
    %c0_i32_0 = arith.constant 0 : i32
    %c0_i32_1 = arith.constant 0 : i32
    return %arg0, %c0_i32, %c0_i32_0 : i32, i32, i32
  }
  func.func @transform_2(%arg0: i32, %arg1: i32) -> (i32, i32) {
    %c0_i32 = arith.constant 0 : i32
    %c0_i32_0 = arith.constant 0 : i32
    %c0_i32_1 = arith.constant 0 : i32
    return %c0_i32, %c0_i32_0 : i32, i32
  }
  func.func @transform_3(%arg0: i32, %arg1: i32) -> (i32, i32) {
    %c0_i32 = arith.constant 0 : i32
    %c0_i32_0 = arith.constant 0 : i32
    %c0_i32_1 = arith.constant 0 : i32
    return %c0_i32, %c0_i32_0 : i32, i32
  }
  func.func @transform_4(%arg0: i32, %arg1: i32) -> (i32, i32, i32) {
    %c0_i32 = arith.constant 0 : i32
    %c0_i32_0 = arith.constant 0 : i32
    return %arg0, %arg1, %c0_i32 : i32, i32, i32
  }
}

module attributes {stable_mosaic.version = 11 : i64} {
  func.func @_film_kernel(%arg0: i32, %arg1: memref<16x8x128xbf16, #tpu.memory_space<vmem>>, %arg2: memref<16x8xf32, #tpu.memory_space<vmem>>, %arg3: memref<16x1xf32, #tpu.memory_space<vmem>>, %arg4: memref<16x8x128xbf16, #tpu.memory_space<vmem>>) attributes {dimension_semantics = [#tpu.dimension_semantics<parallel>], iteration_bounds = array<i64: 1>, scalar_prefetch = 0 : i64, scratch_operands = 0 : i64, tpu.core_type = #tpu.core_type<tc>, window_params = [{transform_indices = @transform_0, window_bounds = array<i64: 16, 8, 128>}, {pipeline_mode = #tpu.pipeline_mode<synchronous>, transform_indices = @transform_1, window_bounds = array<i64: 16, 8>}, {pipeline_mode = #tpu.pipeline_mode<synchronous>, transform_indices = @transform_2, window_bounds = array<i64: 16, 1>}, {transform_indices = @transform_3, window_bounds = array<i64: 16, 8, 128>}]} {
    %c0 = arith.constant 0 : index
    %c0_0 = arith.constant 0 : index
    %c0_1 = arith.constant 0 : index
    %0 = vector.load %arg1[%c0, %c0_0, %c0_1] : memref<16x8x128xbf16, #tpu.memory_space<vmem>>, vector<16x8x128xbf16>
    %1 = arith.extf %0 : vector<16x8x128xbf16> to vector<16x8x128xf32>
    %c0_2 = arith.constant 0 : index
    %c0_3 = arith.constant 0 : index
    %2 = vector.load %arg2[%c0_2, %c0_3] : memref<16x8xf32, #tpu.memory_space<vmem>>, vector<16x8xf32>
    %3 = vector.shape_cast %2 : vector<16x8xf32> to vector<1x16x8xf32>
    %4 = vector.broadcast %3 : vector<1x16x8xf32> to vector<16x16x8xf32>
    "tpu.trace_start"() <{level = 10 : i32, message = "bow,bwc->boc"}> : () -> ()
    %cst = arith.constant dense<0.000000e+00> : vector<16x16x128xf32>
    %5 = tpu.matmul %4, %1, %cst {dimension_numbers = #tpu.dot_dimension_numbers<[2], [1], [1], [2], [0, 0, 0, 1, 1, 2], [0], [0]>} : vector<16x16x8xf32>, vector<16x8x128xf32>, vector<16x16x128xf32> -> vector<16x16x128xf32>
    "tpu.trace_stop"() : () -> ()
    %c0_4 = arith.constant 0 : index
    %c0_5 = arith.constant 0 : index
    %6 = vector.load %arg3[%c0_4, %c0_5] : memref<16x1xf32, #tpu.memory_space<vmem>>, vector<16x1xf32>
    %7 = vector.shape_cast %6 : vector<16x1xf32> to vector<1x16x1xf32>
    %8 = vector.broadcast %7 : vector<1x16x1xf32> to vector<16x16x128xf32>
    %9 = arith.addf %5, %8 : vector<16x16x128xf32>
    %10 = vector.extract_strided_slice %9 {offsets = [0, 0, 0], sizes = [16, 8, 128], strides = [1, 1, 1]} : vector<16x16x128xf32> to vector<16x8x128xf32>
    %11 = vector.extract_strided_slice %9 {offsets = [0, 8, 0], sizes = [16, 8, 128], strides = [1, 1, 1]} : vector<16x16x128xf32> to vector<16x8x128xf32>
    %12 = arith.mulf %10, %1 : vector<16x8x128xf32>
    %13 = arith.addf %12, %11 : vector<16x8x128xf32>
    %14 = arith.truncf %13 : vector<16x8x128xf32> to vector<16x8x128xbf16>
    %c0_6 = arith.constant 0 : index
    %c0_7 = arith.constant 0 : index
    %c0_8 = arith.constant 0 : index
    %15 = vector.load %arg4[%c0_6, %c0_7, %c0_8] : memref<16x8x128xbf16, #tpu.memory_space<vmem>>, vector<16x8x128xbf16>
    tpu.vector_store %arg4[%c0_6, %c0_7, %c0_8], %14 {strides = array<i32>} : memref<16x8x128xbf16, #tpu.memory_space<vmem>>, vector<16x8x128xbf16>,
    return
  }
  func.func @transform_0(%arg0: i32) -> (i32, i32, i32) {
    %c0_i32 = arith.constant 0 : i32
    %c0_i32_0 = arith.constant 0 : i32
    %c0_i32_1 = arith.constant 0 : i32
    return %arg0, %c0_i32, %c0_i32_0 : i32, i32, i32
  }
  func.func @transform_1(%arg0: i32) -> (i32, i32) {
    %c0_i32 = arith.constant 0 : i32
    %c0_i32_0 = arith.constant 0 : i32
    %c0_i32_1 = arith.constant 0 : i32
    return %c0_i32, %c0_i32_0 : i32, i32
  }
  func.func @transform_2(%arg0: i32) -> (i32, i32) {
    %c0_i32 = arith.constant 0 : i32
    %c0_i32_0 = arith.constant 0 : i32
    %c0_i32_1 = arith.constant 0 : i32
    return %c0_i32, %c0_i32_0 : i32, i32
  }
  func.func @transform_3(%arg0: i32) -> (i32, i32, i32) {
    %c0_i32 = arith.constant 0 : i32
    %c0_i32_0 = arith.constant 0 : i32
    %c0_i32_1 = arith.constant 0 : i32
    return %arg0, %c0_i32, %c0_i32_0 : i32, i32, i32
  }
}

module attributes {stable_mosaic.version = 11 : i64} {
  func.func @kernel(%arg0: i32, %arg1: i32, %arg2: memref<1x64x128xbf16, #tpu.memory_space<vmem>>, %arg3: memref<1x1x128xf32, #tpu.memory_space<vmem>>, %arg4: memref<128x128xbf16, #tpu.memory_space<vmem>>, %arg5: memref<1x128xf32, #tpu.memory_space<vmem>>, %arg6: memref<1x64x128xbf16, #tpu.memory_space<vmem>>, %arg7: memref<1x64x128xbf16, #tpu.memory_space<vmem>>) attributes {dimension_semantics = [#tpu.dimension_semantics<parallel>, #tpu.dimension_semantics<parallel>], iteration_bounds = array<i64: 2, 1>, scalar_prefetch = 0 : i64, scratch_operands = 0 : i64, tpu.core_type = #tpu.core_type<tc>, window_params = [{transform_indices = @transform_0, window_bounds = array<i64: 1, 64, 128>}, {transform_indices = @transform_1, window_bounds = array<i64: 1, 1, 128>}, {pipeline_mode = #tpu.pipeline_mode<synchronous>, transform_indices = @transform_2, window_bounds = array<i64: 128, 128>}, {pipeline_mode = #tpu.pipeline_mode<synchronous>, transform_indices = @transform_3, window_bounds = array<i64: 1, 128>}, {transform_indices = @transform_4, window_bounds = array<i64: 1, 64, 128>}, {transform_indices = @transform_5, window_bounds = array<i64: 1, 64, 128>}]} {
    %c0 = arith.constant 0 : index
    %c0_0 = arith.constant 0 : index
    %c0_1 = arith.constant 0 : index
    %0 = vector.load %arg2[%c0, %c0_0, %c0_1] : memref<1x64x128xbf16, #tpu.memory_space<vmem>>, vector<1x64x128xbf16>
    %1 = vector.shape_cast %0 : vector<1x64x128xbf16> to vector<64x128xbf16>
    %c0_2 = arith.constant 0 : index
    %c0_3 = arith.constant 0 : index
    %c0_4 = arith.constant 0 : index
    %2 = vector.load %arg3[%c0_2, %c0_3, %c0_4] : memref<1x1x128xf32, #tpu.memory_space<vmem>>, vector<1x1x128xf32>
    %3 = vector.shape_cast %2 : vector<1x1x128xf32> to vector<1x128xf32>
    %4 = arith.extf %1 : vector<64x128xbf16> to vector<64x128xf32>
    %5 = vector.broadcast %3 : vector<1x128xf32> to vector<64x128xf32>
    %6 = arith.mulf %4, %5 : vector<64x128xf32>
    %7 = arith.truncf %6 : vector<64x128xf32> to vector<64x128xbf16>
    %c0_5 = arith.constant 0 : index
    %c0_6 = arith.constant 0 : index
    %8 = vector.load %arg4[%c0_5, %c0_6] : memref<128x128xbf16, #tpu.memory_space<vmem>>, vector<128x128xbf16>
    %cst = arith.constant dense<0.000000e+00> : vector<64x128xf32>
    %9 = tpu.matmul %7, %8, %cst {dimension_numbers = #tpu.dot_dimension_numbers<[1], [0], [0], [1], [0, 0, 1, 1], [], []>} : vector<64x128xbf16>, vector<128x128xbf16>, vector<64x128xf32> -> vector<64x128xf32>
    %c0_7 = arith.constant 0 : index
    %c0_8 = arith.constant 0 : index
    %10 = vector.load %arg5[%c0_7, %c0_8] : memref<1x128xf32, #tpu.memory_space<vmem>>, vector<1x128xf32>
    %11 = vector.broadcast %10 : vector<1x128xf32> to vector<64x128xf32>
    %12 = arith.addf %9, %11 : vector<64x128xf32>
    %c0_9 = arith.constant 0 : index
    %c0_10 = arith.constant 0 : index
    %c0_11 = arith.constant 0 : index
    %13 = vector.load %arg6[%c0_9, %c0_10, %c0_11] : memref<1x64x128xbf16, #tpu.memory_space<vmem>>, vector<1x64x128xbf16>
    %14 = vector.shape_cast %13 : vector<1x64x128xbf16> to vector<64x128xbf16>
    %15 = arith.extf %14 : vector<64x128xbf16> to vector<64x128xf32>
    %16 = arith.addf %12, %15 : vector<64x128xf32>
    %17 = arith.truncf %16 : vector<64x128xf32> to vector<64x128xbf16>
    %c0_12 = arith.constant 0 : index
    %c0_13 = arith.constant 0 : index
    %c0_14 = arith.constant 0 : index
    %18 = vector.load %arg7[%c0_12, %c0_13, %c0_14] : memref<1x64x128xbf16, #tpu.memory_space<vmem>>, vector<1x64x128xbf16>
    %19 = vector.shape_cast %18 : vector<1x64x128xbf16> to vector<64x128xbf16>
    %20 = vector.shape_cast %17 : vector<64x128xbf16> to vector<1x64x128xbf16>
    tpu.vector_store %arg7[%c0_12, %c0_13, %c0_14], %20 {strides = array<i32>} : memref<1x64x128xbf16, #tpu.memory_space<vmem>>, vector<1x64x128xbf16>,
    return
  }
  func.func @transform_0(%arg0: i32, %arg1: i32) -> (i32, i32, i32) {
    %c0_i32 = arith.constant 0 : i32
    %c0_i32_0 = arith.constant 0 : i32
    return %arg0, %arg1, %c0_i32 : i32, i32, i32
  }
  func.func @transform_1(%arg0: i32, %arg1: i32) -> (i32, i32, i32) {
    %c0_i32 = arith.constant 0 : i32
    %c0_i32_0 = arith.constant 0 : i32
    %c0_i32_1 = arith.constant 0 : i32
    return %arg0, %c0_i32, %c0_i32_0 : i32, i32, i32
  }
  func.func @transform_2(%arg0: i32, %arg1: i32) -> (i32, i32) {
    %c0_i32 = arith.constant 0 : i32
    %c0_i32_0 = arith.constant 0 : i32
    %c0_i32_1 = arith.constant 0 : i32
    return %c0_i32, %c0_i32_0 : i32, i32
  }
  func.func @transform_3(%arg0: i32, %arg1: i32) -> (i32, i32) {
    %c0_i32 = arith.constant 0 : i32
    %c0_i32_0 = arith.constant 0 : i32
    %c0_i32_1 = arith.constant 0 : i32
    return %c0_i32, %c0_i32_0 : i32, i32
  }
  func.func @transform_4(%arg0: i32, %arg1: i32) -> (i32, i32, i32) {
    %c0_i32 = arith.constant 0 : i32
    %c0_i32_0 = arith.constant 0 : i32
    return %arg0, %arg1, %c0_i32 : i32, i32, i32
  }
  func.func @transform_5(%arg0: i32, %arg1: i32) -> (i32, i32, i32) {
    %c0_i32 = arith.constant 0 : i32
    %c0_i32_0 = arith.constant 0 : i32
    return %arg0, %arg1, %c0_i32 : i32, i32, i32
  }
}

module attributes {stable_mosaic.version = 11 : i64} {
  func.func @kernel(%arg0: i32, %arg1: i32, %arg2: memref<1x64x128xbf16, #tpu.memory_space<vmem>>, %arg3: memref<128x128xbf16, #tpu.memory_space<vmem>>, %arg4: memref<128x128xbf16, #tpu.memory_space<vmem>>, %arg5: memref<1x128xf32, #tpu.memory_space<vmem>>, %arg6: memref<1x1x128xf32, #tpu.memory_space<vmem>>, %arg7: memref<1x128xf32, #tpu.memory_space<vmem>>) attributes {dimension_semantics = [#tpu.dimension_semantics<parallel>, #tpu.dimension_semantics<arbitrary>], iteration_bounds = array<i64: 2, 1>, scalar_prefetch = 0 : i64, scratch_operands = 1 : i64, tpu.core_type = #tpu.core_type<tc>, window_params = [{transform_indices = @transform_0, window_bounds = array<i64: 1, 64, 128>}, {pipeline_mode = #tpu.pipeline_mode<synchronous>, transform_indices = @transform_1, window_bounds = array<i64: 128, 128>}, {pipeline_mode = #tpu.pipeline_mode<synchronous>, transform_indices = @transform_2, window_bounds = array<i64: 128, 128>}, {pipeline_mode = #tpu.pipeline_mode<synchronous>, transform_indices = @transform_3, window_bounds = array<i64: 1, 128>}, {transform_indices = @transform_4, window_bounds = array<i64: 1, 1, 128>}]} {
    %c0_i32 = arith.constant 0 : i32
    %0 = arith.cmpi eq, %arg1, %c0_i32 : i32
    %1 = arith.extui %0 : i1 to i32
    %c0_i32_0 = arith.constant 0 : i32
    %2 = arith.cmpi ne, %1, %c0_i32_0 : i32
    scf.if %2 {
      %cst_9 = arith.constant 0.000000e+00 : f32
      %14 = vector.broadcast %cst_9 : f32 to vector<1x128xf32>
      %c0_10 = arith.constant 0 : index
      %c0_11 = arith.constant 0 : index
      %15 = vector.load %arg7[%c0_10, %c0_11] : memref<1x128xf32, #tpu.memory_space<vmem>>, vector<1x128xf32>
      tpu.vector_store %arg7[%c0_10, %c0_11], %14 {strides = array<i32>} : memref<1x128xf32, #tpu.memory_space<vmem>>, vector<1x128xf32>,
    } else {
    }
    %c0 = arith.constant 0 : index
    %c0_1 = arith.constant 0 : index
    %3 = vector.load %arg7[%c0, %c0_1] : memref<1x128xf32, #tpu.memory_space<vmem>>, vector<1x128xf32>
    %c0_2 = arith.constant 0 : index
    %c0_3 = arith.constant 0 : index
    %c0_4 = arith.constant 0 : index
    %4 = vector.load %arg2[%c0_2, %c0_3, %c0_4] : memref<1x64x128xbf16, #tpu.memory_space<vmem>>, vector<1x64x128xbf16>
    %5 = vector.shape_cast %4 : vector<1x64x128xbf16> to vector<64x128xbf16>
    %6 = arith.extf %5 : vector<64x128xbf16> to vector<64x128xf32>
    %cst = arith.constant dense<0.000000e+00> : vector<128xf32>
    %7 = vector.multi_reduction <add>, %6, %cst [0] : vector<64x128xf32> to vector<128xf32>
    %8 = vector.shape_cast %7 : vector<128xf32> to vector<1x128xf32>
    %9 = arith.addf %3, %8 : vector<1x128xf32>
    %c0_5 = arith.constant 0 : index
    %c0_6 = arith.constant 0 : index
    %10 = vector.load %arg7[%c0_5, %c0_6] : memref<1x128xf32, #tpu.memory_space<vmem>>, vector<1x128xf32>
    tpu.vector_store %arg7[%c0_5, %c0_6], %9 {strides = array<i32>} : memref<1x128xf32, #tpu.memory_space<vmem>>, vector<1x128xf32>,
    %c0_i32_7 = arith.constant 0 : i32
    %11 = arith.cmpi eq, %arg1, %c0_i32_7 : i32
    %12 = arith.extui %11 : i1 to i32
    %c0_i32_8 = arith.constant 0 : i32
    %13 = arith.cmpi ne, %12, %c0_i32_8 : i32
    scf.if %13 {
      %c0_9 = arith.constant 0 : index
      %c0_10 = arith.constant 0 : index
      %14 = vector.load %arg7[%c0_9, %c0_10] : memref<1x128xf32, #tpu.memory_space<vmem>>, vector<1x128xf32>
      %cst_11 = arith.constant 1.562500e-02 : f32
      %15 = vector.broadcast %cst_11 : f32 to vector<1x128xf32>
      %16 = arith.mulf %14, %15 : vector<1x128xf32>
      %17 = arith.truncf %16 : vector<1x128xf32> to vector<1x128xbf16>
      %c0_12 = arith.constant 0 : index
      %c0_13 = arith.constant 0 : index
      %18 = vector.load %arg3[%c0_12, %c0_13] : memref<128x128xbf16, #tpu.memory_space<vmem>>, vector<128x128xbf16>
      %cst_14 = arith.constant dense<0.000000e+00> : vector<1x128xf32>
      %19 = tpu.matmul %17, %18, %cst_14 {dimension_numbers = #tpu.dot_dimension_numbers<[1], [0], [0], [1], [0, 0, 1, 1], [], []>} : vector<1x128xbf16>, vector<128x128xbf16>, vector<1x128xf32> -> vector<1x128xf32>
      %20 = arith.truncf %19 : vector<1x128xf32> to vector<1x128xbf16>
      %c0_15 = arith.constant 0 : index
      %c0_16 = arith.constant 0 : index
      %21 = vector.load %arg4[%c0_15, %c0_16] : memref<128x128xbf16, #tpu.memory_space<vmem>>, vector<128x128xbf16>
      %cst_17 = arith.constant dense<0.000000e+00> : vector<1x128xf32>
      %22 = tpu.matmul %20, %21, %cst_17 {dimension_numbers = #tpu.dot_dimension_numbers<[1], [0], [0], [1], [0, 0, 1, 1], [], []>} : vector<1x128xbf16>, vector<128x128xbf16>, vector<1x128xf32> -> vector<1x128xf32>
      %c0_18 = arith.constant 0 : index
      %c0_19 = arith.constant 0 : index
      %23 = vector.load %arg5[%c0_18, %c0_19] : memref<1x128xf32, #tpu.memory_space<vmem>>, vector<1x128xf32>
      %24 = arith.addf %22, %23 : vector<1x128xf32>
      %c0_20 = arith.constant 0 : index
      %c0_21 = arith.constant 0 : index
      %c0_22 = arith.constant 0 : index
      %25 = vector.load %arg6[%c0_20, %c0_21, %c0_22] : memref<1x1x128xf32, #tpu.memory_space<vmem>>, vector<1x1x128xf32>
      %26 = vector.shape_cast %25 : vector<1x1x128xf32> to vector<1x128xf32>
      %27 = vector.shape_cast %24 : vector<1x128xf32> to vector<1x1x128xf32>
      tpu.vector_store %arg6[%c0_20, %c0_21, %c0_22], %27 {strides = array<i32>} : memref<1x1x128xf32, #tpu.memory_space<vmem>>, vector<1x1x128xf32>,
    } else {
    }
    return
  }
  func.func @transform_0(%arg0: i32, %arg1: i32) -> (i32, i32, i32) {
    %c0_i32 = arith.constant 0 : i32
    %c0_i32_0 = arith.constant 0 : i32
    return %arg0, %arg1, %c0_i32 : i32, i32, i32
  }
  func.func @transform_1(%arg0: i32, %arg1: i32) -> (i32, i32) {
    %c0_i32 = arith.constant 0 : i32
    %c0_i32_0 = arith.constant 0 : i32
    %c0_i32_1 = arith.constant 0 : i32
    return %c0_i32, %c0_i32_0 : i32, i32
  }
  func.func @transform_2(%arg0: i32, %arg1: i32) -> (i32, i32) {
    %c0_i32 = arith.constant 0 : i32
    %c0_i32_0 = arith.constant 0 : i32
    %c0_i32_1 = arith.constant 0 : i32
    return %c0_i32, %c0_i32_0 : i32, i32
  }
  func.func @transform_3(%arg0: i32, %arg1: i32) -> (i32, i32) {
    %c0_i32 = arith.constant 0 : i32
    %c0_i32_0 = arith.constant 0 : i32
    %c0_i32_1 = arith.constant 0 : i32
    return %c0_i32, %c0_i32_0 : i32, i32
  }
  func.func @transform_4(%arg0: i32, %arg1: i32) -> (i32, i32, i32) {
    %c0_i32 = arith.constant 0 : i32
    %c0_i32_0 = arith.constant 0 : i32
    %c0_i32_1 = arith.constant 0 : i32
    return %arg0, %c0_i32, %c0_i32_0 : i32, i32, i32
  }
}

</mosaic_0001>

<bundles_post_ra>
// kernel: film_efficientnet_forward.16
= control target key start
LH: loop header
LB: loop body
LE: loop exit
PB: predicated region body
PF: predicated region fallthrough
CT: control target
= control target key end

     0   :  { %s790_s18 = smov 0   ;;  %s792_s19 = smov 0   ;;  %s900_s0 = inlined_call_operand.vmem [shape: bf16[2,64,128], index: 0, kind: input, shape index: {}]   ;;  %s901_s1 = inlined_call_operand.vmem [shape: bf16[128,128], index: 1, kind: input, shape index: {}]   ;;  %s902_s2 = inlined_call_operand.vmem [shape: f32[1,128], index: 2, kind: input, shape index: {}]   ;;  %s903_s3 = inlined_call_operand.vmem [shape: bf16[128,128], index: 3, kind: input, shape index: {}]   ;;  %s904_s4 = inlined_call_operand.vmem [shape: f32[1,128], index: 4, kind: input, shape index: {}]   ;;  %s905_s5 = inlined_call_operand.vmem [shape: f32[2,1,128], index: 5, kind: output, shape index: {}]  }
   0x1   :  { %s794_s20 = smov 0  }
   0x2 LB: > { %s27_s21 = sadd.s32 1, %s752_s19  ;;  %p583_p0 = scmp.ge.s32.totalorder %s756_s20, 1  ;;  %s756_s20 = sphi %s794_s20, %s15_s20   ;;  %s752_s19 = sphi %s792_s19, %s907_s19   ;;  %s748_s18 = sphi %s790_s18, %s906_s18  }
   0x3   : > { %p29_p1 = scmp.ge.s32.totalorder %s27_s21, 2  ;;  %p206_p2 = scmp.lt.s32.totalorder %s756_s20, 3 }
   0x5   : > { %s909_s21 = smov (%p29_p1, %s27_s21), 0  ;;  %p207_p3 = pnand %p583_p0, %p206_p2 }
   0x6   : > { %v710_v0 = vld [vmem:[%s901_s1] sm:$0xff] (!%p207_p3)   ;;  %v758_v1 = vmov (!%p207_p3), 0.0   ;;  %v711_v2 = vld [vmem:[%s901_s1 + $0x8] sm:$0xff] (!%p207_p3)   ;;  %vm759_vm0 = vmmov (!%p207_p3), 0   ;;  %p237_p4 = scmp.lt.s32.totalorder (!%p207_p3), %s748_s18, 1  ;;  %v712_v3 = vld [vmem:[%s901_s1 + $0x10] sm:$0xff] (!%p207_p3)  }
   0x7   : > { %210 = sbr.rel (%p207_p3) target bundleno = 545 (0x221), region = 40  ;;  %644 = vmatprep.subr.bf16.mxu0 (!%p207_p3), %v758_v1  ;;  %254 = vst [vmem:[#allocation2] sm:$0x1] (!%p207_p3), %v758_v1  ;;  %664 = vmatprep.subr.bf16.mxu1 (!%p207_p3), %v758_v1  ;;  %v713_v6 = vld [vmem:[%s901_s1 + $0x18] sm:$0xff] (!%p207_p3)   ;;  %v714_v13 = vld [vmem:[%s901_s1 + $0x20] sm:$0xff] (!%p207_p3)   ;;  %v715_v21 = vld [vmem:[%s901_s1 + $0x28] sm:$0xff] (!%p207_p3)  }
   0x8   : > { %645 = vmatpush3.bf16.msra.mxu0 (!%p207_p3), %v710_v0  ;;  %660 = vmatprep.mubr.msk.bf16.mxu0 (!%p207_p3), %vm759_vm0, %v758_v1  ;;  %v716_v25 = vld [vmem:[%s901_s1 + $0x30] sm:$0xff] (!%p207_p3)   ;;  %v717_v28 = vld [vmem:[%s901_s1 + $0x38] sm:$0xff] (!%p207_p3)   ;;  %v718_v39 = vld [vmem:[%s903_s3] sm:$0xff] (!%p207_p3)  }
   0x9   : > { %646 = vmatprep.subr.bf16.mxu0 (!%p207_p3), %v758_v1  ;;  %680 = vmatprep.mubr.msk.bf16.mxu1 (!%p207_p3), %vm759_vm0, %v758_v1  ;;  %v719_v40 = vld [vmem:[%s903_s3 + $0x8] sm:$0xff] (!%p207_p3)   ;;  %v720_v41 = vld [vmem:[%s903_s3 + $0x10] sm:$0xff] (!%p207_p3)   ;;  %v721_v42 = vld [vmem:[%s903_s3 + $0x18] sm:$0xff] (!%p207_p3)  }
   0xa   : > { %665 = vmatpush3.bf16.msra.mxu1 (!%p207_p3), %v718_v39  ;;  %v722_v43 = vld [vmem:[%s903_s3 + $0x20] sm:$0xff] (!%p207_p3)   ;;  %v723_v44 = vld [vmem:[%s903_s3 + $0x28] sm:$0xff] (!%p207_p3)   ;;  %v724_v45 = vld [vmem:[%s903_s3 + $0x30] sm:$0xff] (!%p207_p3)  }
   0xb   : > { %666 = vmatprep.subr.bf16.mxu1 (!%p207_p3), %v758_v1  ;;  %v725_v46 = vld [vmem:[%s903_s3 + $0x38] sm:$0xff] (!%p207_p3)   ;;  %v309_v47 = vld [vmem:[%s902_s2] sm:$0x1] (!%p207_p3) }
   0xc   : > { %647 = vmatpush3.bf16.msra.mxu0 (!%p207_p3), %v711_v2  ;;  %v422_v59 = vld [vmem:[%s904_s4] sm:$0x1] (!%p207_p3) }
   0xd   : > { %648 = vmatprep.subr.bf16.mxu0 (!%p207_p3), %v758_v1 }
   0xe   : > { %s911_s18 = smov (!%p237_p4, %s748_s18), 1  ;;  %v255_v33 = vld [vmem:[#allocation2] sm:$0x1]  ;;  %667 = vmatpush3.bf16.msra.mxu1 %v719_v40 }
   0xf   : > { %s606_s28 = sshll.u32 %s911_s18, 5  ;;  %668 = vmatprep.subr.bf16.mxu1 %v758_v1  ;;  %s248_s22 = scalar_lea.vmem %s905_s5, %s911_s18 }
  0x10   : > { %s244_s6 = scalar_lea.vmem %s900_s0, %s606_s28  ;;  %649 = vmatpush3.bf16.msra.mxu0 %v712_v3 }
  0x11   : > { %v608_v4 = vld [vmem:[%s244_s6] sm:$0xff]   ;;  %v623_v5 = vld [vmem:[%s244_s6 + $0x8] sm:$0xff]   ;;  %v624_v10 = vld [vmem:[%s244_s6 + $0x10] sm:$0xff]   ;;  %650 = vmatprep.subr.bf16.mxu0 %v758_v1 }
  0x12   : > { %v609_v7 = vunpack.c.l.bf16 %v608_v4  ;;  %v610_v8 = vunpack.c.h.bf16 %v608_v4  ;;  %v613_v9 = vunpack.c.l.bf16 %v623_v5  ;;  %v614_v11 = vunpack.c.h.bf16 %v623_v5  ;;  %v625_v14 = vld [vmem:[%s244_s6 + $0x18] sm:$0xff]   ;;  %669 = vmatpush3.bf16.msra.mxu1 %v720_v41 }
  0x13   : > { %v617_v15 = vunpack.c.l.bf16 %v624_v10  ;;  %v618_v17 = vunpack.c.h.bf16 %v624_v10  ;;  %v621_v19 = vunpack.c.l.bf16 %v625_v14  ;;  %v622_v22 = vunpack.c.h.bf16 %v625_v14  ;;  %670 = vmatprep.subr.bf16.mxu1 %v758_v1 }
  0x14   : > { %v272_v12 = vadd.f32 %v610_v8, %v609_v7  ;;  %651 = vmatpush3.bf16.msra.mxu0 %v713_v6 }
  0x15   : > { %652 = vmatprep.subr.bf16.mxu0 %v758_v1 }
  0x16   : > { %v273_v16 = vadd.f32 %v613_v9, %v272_v12  ;;  %671 = vmatpush3.bf16.msra.mxu1 %v721_v42 }
  0x17   : > { %672 = vmatprep.subr.bf16.mxu1 %v758_v1 }
  0x18   : > { %v274_v18 = vadd.f32 %v614_v11, %v273_v16  ;;  %653 = vmatpush3.bf16.msra.mxu0 %v714_v13 }
  0x19   : > { %654 = vmatprep.subr.bf16.mxu0 %v758_v1 }
  0x1a   : > { %v275_v20 = vadd.f32 %v617_v15, %v274_v18  ;;  %673 = vmatpush3.bf16.msra.mxu1 %v722_v43 }
  0x1b   : > { %674 = vmatprep.subr.bf16.mxu1 %v758_v1 }
  0x1c   : > { %v276_v23 = vadd.f32 %v618_v17, %v275_v20  ;;  %655 = vmatpush3.bf16.msra.mxu0 %v715_v21 }
  0x1d   : > { %656 = vmatprep.subr.bf16.mxu0 %v758_v1 }
  0x1e   : > { %v277_v24 = vadd.f32 %v621_v19, %v276_v23  ;;  %675 = vmatpush3.bf16.msra.mxu1 %v723_v44 }
  0x1f   : > { %676 = vmatprep.subr.bf16.mxu1 %v758_v1 }
  0x20   : > { %v278_v26 = vadd.f32 %v622_v22, %v277_v24  ;;  %657 = vmatpush3.bf16.msra.mxu0 %v716_v25 }
  0x21   : > { %658 = vmatprep.subr.bf16.mxu0 %v758_v1 }
  0x22   : > { %v279_v27 = vrot.slane %v278_v26, 4  ;;  %677 = vmatpush3.bf16.msra.mxu1 %v724_v45 }
  0x23   : > { %678 = vmatprep.subr.bf16.mxu1 %v758_v1 }
  0x24   : > { %v280_v29 = vadd.f32 %v279_v27, %v278_v26  ;;  %659 = vmatpush3.bf16.msra.mxu0 %v717_v28 }
  0x26   : > { %v281_v30 = vrot.slane %v280_v29, 2  ;;  %679 = vmatpush3.bf16.msra.mxu1 %v725_v46 }
  0x28   : > { %v282_v31 = vadd.f32 %v281_v30, %v280_v29 }
  0x2a   : > { %v283_v32 = vrot.slane %v282_v31, 1 }
  0x2c   : > { %v284_v34 = vadd.f32 %v283_v32, %v282_v31 }
  0x2e   : > { %v285_v35 = vadd.f32 %v284_v34, %v255_v33 }
  0x30   : > { %286 = vst [vmem:[#allocation2] sm:$0x1] %v285_v35 }
  0x37   : > { %v290_v36 = vld [vmem:[#allocation2] sm:$0x1] }
  0x38   : > { %v291_v37 = vmul.f32 0.015625, %v290_v36 }
  0x3a   : > { %v292_v38 = vpack.c.bf16 %v291_v37, %v291_v37 }
  0x3c   : > { %661 = vmatmul.mubr.bf16.vlgmr.msra.gmra.mrb[0].mxu0 %v292_v38 }
 0x10f   : > { %v392_v48 = vpop.f32.mrb[0].mxu0 }
 0x110   : > { %v393_v49 = vadd.f32 %v392_v48, %v309_v47  ;;  %v662_v50 = vpop.f32.mrb[1].mxu0 }
 0x111   : > { %v395_v51 = vpop.f32.mrb[2].mxu0 }
 0x112   : > { %v594_v52 = vmul.f32 -1.442695, %v393_v49  ;;  %v663_v53 = vpop.f32.mrb[3].mxu0 }
 0x114   : > { %726 = vpow2.f32 %v594_v52 }
 0x11e   : > { %v727_v54 = vpop.eup %726 }
 0x11f   : > { %v401_v55 = vadd.f32 1.0, %v727_v54 }
 0x121   : > { %728 = vrcp.f32 %v401_v55 }
 0x12b   : > { %v729_v56 = vpop.eup %728 }
 0x12c   : > { %v404_v57 = vmul.f32 %v729_v56, %v393_v49 }
 0x12e   : > { %v405_v58 = vpack.c.bf16 %v404_v57, %v404_v57 }
 0x130   : > { %681 = vmatmul.mubr.bf16.vlgmr.msra.gmra.mrb[0].mxu1 %v405_v58 }
 0x203   : > { %v505_v60 = vpop.f32.mrb[0].mxu1 }
 0x204   : > { %v506_v61 = vadd.f32 %v505_v60, %v422_v59  ;;  %v682_v62 = vpop.f32.mrb[1].mxu1 }
 0x205   : > { %v508_v63 = vpop.f32.mrb[2].mxu1 }
 0x206   : > { %v603_v0 = vmul.f32 -1.442695, %v506_v61  ;;  %v683_v1 = vpop.f32.mrb[3].mxu1 }
 0x208   : > { %730 = vpow2.f32 %v603_v0 }
 0x212   : > { %v731_v2 = vpop.eup %730 }
 0x213   : > { %v514_v3 = vadd.f32 1.0, %v731_v2 }
 0x215   : > { %732 = vrcp.f32 %v514_v3 }
 0x21f   : > { %v733_v4 = vpop.eup %732 }
 0x220   : > { %517 = vst [vmem:[%s248_s22] sm:$0x1] %v733_v4 }
 0x221 PF: > { %s15_s20 = sadd.s32 1, %s756_s20   ;;  %s906_s18 = smov %s752_s19 }
 0x222   : > { %p12_p5 = scmp.ge.s32.totalorder %s15_s20, 4   ;;  %s907_s19 = smov %s909_s21 }
 0x224   :  { %14 = sbr.rel (!%p12_p5) target bundleno = 2 (0x2), region = 78 }

// kernel: film_efficientnet_forward.17
= control target key start
LH: loop header
LB: loop body
LE: loop exit
PB: predicated region body
PF: predicated region fallthrough
CT: control target
= control target key end

     0   :  { %s773_s15 = smov 0   ;;  %s775_s16 = smov 0   ;;  %s850_s0 = inlined_call_operand.vmem [shape: bf16[2,64,128], index: 0, kind: input, shape index: {}]   ;;  %s851_s1 = inlined_call_operand.vmem [shape: f32[2,1,128], index: 1, kind: input, shape index: {}]   ;;  %s852_s2 = inlined_call_operand.vmem [shape: bf16[128,128], index: 2, kind: input, shape index: {}]   ;;  %s853_s3 = inlined_call_operand.vmem [shape: f32[1,128], index: 3, kind: input, shape index: {}]   ;;  %s854_s4 = inlined_call_operand.vmem [shape: bf16[2,64,128], index: 4, kind: output, shape index: {}]  }
   0x1   :  { %s777_s17 = smov 0  }
   0x2 LB: > { %s26_s18 = sadd.s32 1, %s742_s16  ;;  %p563_p0 = scmp.ge.s32.totalorder %s746_s17, 1  ;;  %s746_s17 = sphi %s777_s17, %s14_s17   ;;  %s742_s16 = sphi %s775_s16, %s856_s16   ;;  %s738_s15 = sphi %s773_s15, %s855_s15  }
   0x3   : > { %p28_p1 = scmp.ge.s32.totalorder %s26_s18, 2  ;;  %p191_p2 = scmp.lt.s32.totalorder %s746_s17, 3 }
   0x5   : > { %s858_s18 = smov (%p28_p1, %s26_s18), 0  ;;  %p192_p3 = pnand %p563_p0, %p191_p2 }
   0x6   : > { %v716_v0 = vld [vmem:[%s852_s2] sm:$0xff] (!%p192_p3)   ;;  %p229_p4 = scmp.lt.s32.totalorder (!%p192_p3), %s738_s15, 1  ;;  %v717_v1 = vld [vmem:[%s852_s2 + $0x8] sm:$0xff] (!%p192_p3)   ;;  %v718_v2 = vld [vmem:[%s852_s2 + $0x10] sm:$0xff] (!%p192_p3)  }
   0x7   : > { %195 = sbr.rel (%p192_p3) target bundleno = 260 (0x104), region = 36  ;;  %652 = vmatprep.subr.bf16.mxu0 (!%p192_p3), %v716_v0  ;;  %676 = vmatprep.subr.bf16.mxu1 (!%p192_p3), %v716_v0  ;;  %v719_v3 = vld [vmem:[%s852_s2 + $0x18] sm:$0xff] (!%p192_p3)   ;;  %v720_v14 = vld [vmem:[%s852_s2 + $0x20] sm:$0xff] (!%p192_p3)   ;;  %v721_v18 = vld [vmem:[%s852_s2 + $0x28] sm:$0xff] (!%p192_p3)  }
   0x8   : > { %653 = vmatpush3.bf16.msra.mxu0 (!%p192_p3), %v716_v0  ;;  %684 = vmatpush3.bf16.msra.mxu1 (!%p192_p3), %v716_v0  ;;  %v722_v21 = vld [vmem:[%s852_s2 + $0x30] sm:$0xff] (!%p192_p3)   ;;  %v723_v26 = vld [vmem:[%s852_s2 + $0x38] sm:$0xff] (!%p192_p3)   ;;  %v569_v34 = vld [vmem:[%s853_s3] ss:$0 sm:$0xff] (!%p192_p3) }
   0x9   : > { %654 = vmatprep.subr.bf16.mxu0 (!%p192_p3), %v717_v1  ;;  %677 = vmatprep.subr.bf16.mxu1 (!%p192_p3), %v717_v1 }
   0xc   : > { %655 = vmatpush3.bf16.msra.mxu0 (!%p192_p3), %v717_v1  ;;  %685 = vmatpush3.bf16.msra.mxu1 (!%p192_p3), %v717_v1 }
   0xd   : > { %656 = vmatprep.subr.bf16.mxu0 (!%p192_p3), %v718_v2  ;;  %678 = vmatprep.subr.bf16.mxu1 (!%p192_p3), %v718_v2 }
   0xe   : > { %s860_s15 = smov (!%p229_p4, %s738_s15), 1 }
   0xf   : > { %s588_s25 = sshll.u32 %s860_s15, 5  ;;  %s240_s5 = scalar_lea.vmem %s851_s1, %s860_s15 }
  0x10   : > { %s808_s28 = scalar_lea.vmem %s850_s0, %s588_s25  ;;  %v568_v5 = vld [vmem:[%s240_s5] ss:$0 sm:$0xff]  ;;  %657 = vmatpush3.bf16.msra.mxu0 %v718_v2  ;;  %686 = vmatpush3.bf16.msra.mxu1 %v718_v2  ;;  %s249_s24 = scalar_lea.vmem %s854_s4, %s588_s25 }
  0x11   : > { %v599_v4 = vld [vmem:[%s808_s28] sm:$0xff]   ;;  %v635_v6 = vld [vmem:[%s808_s28 + $0x10] sm:$0xff]   ;;  %658 = vmatprep.subr.bf16.mxu0 %v719_v3  ;;  %679 = vmatprep.subr.bf16.mxu1 %v719_v3  ;;  %v634_v19 = vld [vmem:[%s808_s28 + $0x8] sm:$0xff]  }
  0x12   : > { %v600_v7 = vunpack.c.l.bf16 %v599_v4  ;;  %v601_v8 = vunpack.c.h.bf16 %v599_v4  ;;  %v608_v9 = vunpack.c.l.bf16 %v635_v6  ;;  %v609_v10 = vunpack.c.h.bf16 %v635_v6  ;;  %v636_v20 = vld [vmem:[%s808_s28 + $0x18] sm:$0xff]  }
  0x13   : > { %v604_v22 = vunpack.c.l.bf16 %v634_v19  ;;  %v605_v23 = vunpack.c.h.bf16 %v634_v19  ;;  %v612_v24 = vunpack.c.l.bf16 %v636_v20  ;;  %v613_v25 = vunpack.c.h.bf16 %v636_v20 }
  0x14   : > { %v275_v11 = vmul.f32 %v600_v7, %v568_v5  ;;  %v276_v12 = vmul.f32 %v601_v8, %v568_v5  ;;  %v279_v13 = vmul.f32 %v608_v9, %v568_v5  ;;  %v280_v15 = vmul.f32 %v609_v10, %v568_v5  ;;  %659 = vmatpush3.bf16.msra.mxu0 %v719_v3 }
  0x15   : > { %687 = vmatpush3.bf16.msra.mxu1 %v719_v3  ;;  %660 = vmatprep.subr.bf16.mxu0 %v720_v14  ;;  %v277_v27 = vmul.f32 %v604_v22, %v568_v5  ;;  %v278_v28 = vmul.f32 %v605_v23, %v568_v5  ;;  %v281_v29 = vmul.f32 %v612_v24, %v568_v5 }
  0x16   : > { %v283_v16 = vpack.c.bf16 %v276_v12, %v275_v11  ;;  %v285_v17 = vpack.c.bf16 %v280_v15, %v279_v13  ;;  %680 = vmatprep.subr.bf16.mxu1 %v720_v14  ;;  %v282_v30 = vmul.f32 %v613_v25, %v568_v5 }
  0x17   : > { %v284_v31 = vpack.c.bf16 %v278_v28, %v277_v27 }
  0x18   : > { %668 = vmatprep.mubr.bf16.mxu0 %v283_v16  ;;  %672 = vmatprep.mubr.bf16.mxu1 %v285_v17  ;;  %v286_v32 = vpack.c.bf16 %v282_v30, %v281_v29 }
  0x19   : > { %661 = vmatpush3.bf16.msra.mxu0 %v720_v14  ;;  %688 = vmatpush3.bf16.msra.mxu1 %v720_v14 }
  0x1a   : > { %662 = vmatprep.subr.bf16.mxu0 %v721_v18  ;;  %681 = vmatprep.subr.bf16.mxu1 %v721_v18 }
  0x1d   : > { %663 = vmatpush3.bf16.msra.mxu0 %v721_v18  ;;  %689 = vmatpush3.bf16.msra.mxu1 %v721_v18 }
  0x1e   : > { %664 = vmatprep.subr.bf16.mxu0 %v722_v21  ;;  %682 = vmatprep.subr.bf16.mxu1 %v722_v21 }
  0x21   : > { %665 = vmatpush3.bf16.msra.mxu0 %v722_v21  ;;  %690 = vmatpush3.bf16.msra.mxu1 %v722_v21 }
  0x22   : > { %666 = vmatprep.subr.bf16.mxu0 %v723_v26  ;;  %683 = vmatprep.subr.bf16.mxu1 %v723_v26 }
  0x25   : > { %667 = vmatpush3.bf16.msra.mxu0 %v723_v26  ;;  %691 = vmatpush3.bf16.msra.mxu1 %v723_v26 }
  0x28   : > { %669 = vmatmul.mubr.bf16.vlgmr.msra.gmra.mrb[0].mxu0 %v284_v31  ;;  %673 = vmatmul.mubr.bf16.vlgmr.msra.gmra.mrb[0].mxu1 %v286_v32 }
  0xfb   : > { %v670_v33 = vpop.f32.mrb[0].mxu0  ;;  %v674_v35 = vpop.f32.mrb[0].mxu1 }
  0xfc   : > { %v392_v36 = vpop.f32.mrb[1].mxu0  ;;  %v408_v37 = vpop.f32.mrb[1].mxu1  ;;  %v401_v40 = vadd.f32 %v670_v33, %v569_v34  ;;  %v417_v41 = vadd.f32 %v674_v35, %v569_v34 }
  0xfd   : > { %v671_v38 = vpop.f32.mrb[2].mxu0  ;;  %v675_v39 = vpop.f32.mrb[2].mxu1  ;;  %v393_v46 = vadd.f32 %v569_v34, %v392_v36  ;;  %v409_v47 = vadd.f32 %v569_v34, %v408_v37 }
  0xfe   : > { %v404_v42 = vadd.f32 %v671_v38, %v569_v34  ;;  %v420_v43 = vadd.f32 %v675_v39, %v569_v34  ;;  %v395_v44 = vpop.f32.mrb[3].mxu0  ;;  %v411_v45 = vpop.f32.mrb[3].mxu1 }
  0xff   : > { %v396_v48 = vadd.f32 %v569_v34, %v395_v44  ;;  %v412_v49 = vadd.f32 %v569_v34, %v411_v45 }
 0x100   : > { %v622_v50 = vpack.c.bf16 %v404_v42, %v401_v40  ;;  %v632_v51 = vpack.c.bf16 %v420_v43, %v417_v41 }
 0x101   : > { %v617_v52 = vpack.c.bf16 %v396_v48, %v393_v46  ;;  %v627_v53 = vpack.c.bf16 %v412_v49, %v409_v47 }
 0x102   : > { %637 = vst [vmem:[%s249_s24 + $0x8] sm:$0xff] %v622_v50   ;;  %639 = vst [vmem:[%s249_s24 + $0x18] sm:$0xff] %v632_v51  }
 0x103   : > { %618 = vst [vmem:[%s249_s24] sm:$0xff] %v617_v52   ;;  %638 = vst [vmem:[%s249_s24 + $0x10] sm:$0xff] %v627_v53  }
 0x104 PF: > { %s14_s17 = sadd.s32 1, %s746_s17   ;;  %s855_s15 = smov %s742_s16 }
 0x105   : > { %p11_p5 = scmp.ge.s32.totalorder %s14_s17, 4   ;;  %s856_s16 = smov %s858_s18 }
 0x107   :  { %13 = sbr.rel (!%p11_p5) target bundleno = 2 (0x2), region = 69 }

// kernel: film_efficientnet_forward.14
= control target key start
LH: loop header
LB: loop body
LE: loop exit
PB: predicated region body
PF: predicated region fallthrough
CT: control target
= control target key end

     0   :  { %s979_s1 = inlined_call_operand.vmem [shape: bf16[128,128], index: 1, kind: input, shape index: {}]   ;;  %s980_s0 = inlined_call_operand.vmem [shape: bf16[128,128], index: 0, kind: input, shape index: {}]   ;;  %s981_s2 = inlined_call_operand.vmem [shape: f32[1,128], index: 2, kind: input, shape index: {}]   ;;  %s982_s3 = inlined_call_operand.vmem [shape: bf16[128,128], index: 3, kind: output, shape index: {}]  }
   0x1   :  { %v722_v0 = vld [vmem:[%s979_s1] sm:$0xff]   ;;  %v723_v1 = vld [vmem:[%s979_s1 + $0x8] sm:$0xff]   ;;  %v724_v2 = vld [vmem:[%s979_s1 + $0x10] sm:$0xff]  }
   0x2   :  { %674 = vmatprep.subr.bf16.mxu0 %v722_v0  ;;  %706 = vmatprep.subr.bf16.mxu1 %v722_v0  ;;  %v725_v3 = vld [vmem:[%s979_s1 + $0x18] sm:$0xff]   ;;  %v730_v4 = vld [vmem:[%s980_s0] sm:$0xff]   ;;  %v727_v7 = vld [vmem:[%s979_s1 + $0x28] sm:$0xff]  }
   0x3   :  { %675 = vmatpush3.bf16.msra.mxu0 %v722_v0  ;;  %714 = vmatpush3.bf16.msra.mxu1 %v722_v0  ;;  %v731_v5 = vld [vmem:[%s980_s0 + $0x20] sm:$0xff]   ;;  %v728_v8 = vld [vmem:[%s979_s1 + $0x30] sm:$0xff]   ;;  %v729_v9 = vld [vmem:[%s979_s1 + $0x38] sm:$0xff]  }
   0x4   :  { %676 = vmatprep.subr.bf16.mxu0 %v723_v1  ;;  %707 = vmatprep.subr.bf16.mxu1 %v723_v1  ;;  %v726_v6 = vld [vmem:[%s979_s1 + $0x20] sm:$0xff]   ;;  %v732_v10 = vld [vmem:[%s980_s0 + $0x8] sm:$0xff]   ;;  %v734_v12 = vld [vmem:[%s980_s0 + $0x10] sm:$0xff]  }
   0x5   :  { %690 = vmatprep.mubr.bf16.mxu0 %v730_v4  ;;  %698 = vmatprep.mubr.bf16.mxu1 %v731_v5  ;;  %v733_v11 = vld [vmem:[%s980_s0 + $0x28] sm:$0xff]   ;;  %v735_v13 = vld [vmem:[%s980_s0 + $0x30] sm:$0xff]   ;;  %v736_v14 = vld [vmem:[%s980_s0 + $0x18] sm:$0xff]  }
   0x6   :  { %v737_v15 = vld [vmem:[%s980_s0 + $0x38] sm:$0xff]   ;;  %v873_v16 = vld [vmem:[%s981_s2] ss:$0 sm:$0xff] }
   0x7   :  { %677 = vmatpush3.bf16.msra.mxu0 %v723_v1  ;;  %715 = vmatpush3.bf16.msra.mxu1 %v723_v1 }
   0x8   :  { %678 = vmatprep.subr.bf16.mxu0 %v724_v2  ;;  %708 = vmatprep.subr.bf16.mxu1 %v724_v2 }
   0xb   :  { %679 = vmatpush3.bf16.msra.mxu0 %v724_v2  ;;  %716 = vmatpush3.bf16.msra.mxu1 %v724_v2 }
   0xc   :  { %680 = vmatprep.subr.bf16.mxu0 %v725_v3  ;;  %709 = vmatprep.subr.bf16.mxu1 %v725_v3 }
   0xf   :  { %681 = vmatpush3.bf16.msra.mxu0 %v725_v3  ;;  %717 = vmatpush3.bf16.msra.mxu1 %v725_v3 }
  0x10   :  { %682 = vmatprep.subr.bf16.mxu0 %v726_v6  ;;  %710 = vmatprep.subr.bf16.mxu1 %v726_v6 }
  0x13   :  { %683 = vmatpush3.bf16.msra.mxu0 %v726_v6  ;;  %718 = vmatpush3.bf16.msra.mxu1 %v726_v6 }
  0x14   :  { %684 = vmatprep.subr.bf16.mxu0 %v727_v7  ;;  %711 = vmatprep.subr.bf16.mxu1 %v727_v7 }
  0x17   :  { %685 = vmatpush3.bf16.msra.mxu0 %v727_v7  ;;  %719 = vmatpush3.bf16.msra.mxu1 %v727_v7 }
  0x18   :  { %686 = vmatprep.subr.bf16.mxu0 %v728_v8  ;;  %712 = vmatprep.subr.bf16.mxu1 %v728_v8 }
  0x1b   :  { %687 = vmatpush3.bf16.msra.mxu0 %v728_v8  ;;  %720 = vmatpush3.bf16.msra.mxu1 %v728_v8 }
  0x1c   :  { %688 = vmatprep.subr.bf16.mxu0 %v729_v9  ;;  %713 = vmatprep.subr.bf16.mxu1 %v729_v9 }
  0x1f   :  { %689 = vmatpush3.bf16.msra.mxu0 %v729_v9  ;;  %721 = vmatpush3.bf16.msra.mxu1 %v729_v9 }
  0x22   :  { %691 = vmatmul.mubr.bf16.vlgmr.msra.gmra.mrb[0].mxu0 %v732_v10  ;;  %699 = vmatmul.mubr.bf16.vlgmr.msra.gmra.mrb[0].mxu1 %v733_v11 }
  0x23   :  { %694 = vmatprep.mubr.bf16.mxu0 %v734_v12  ;;  %702 = vmatprep.mubr.bf16.mxu1 %v735_v13 }
  0x2a   :  { %695 = vmatmul.mubr.bf16.gmra.mrb[4].mxu0 %v736_v14  ;;  %703 = vmatmul.mubr.bf16.gmra.mrb[4].mxu1 %v737_v15 }
  0xf5   :  { %v692_v17 = vpop.f32.mrb[0].mxu0  ;;  %v700_v18 = vpop.f32.mrb[0].mxu1 }
  0xf6   :  { %v876_v19 = vadd.f32 %v692_v17, %v873_v16  ;;  %v879_v20 = vadd.f32 %v700_v18, %v873_v16  ;;  %v213_v21 = vpop.f32.mrb[1].mxu0  ;;  %v245_v22 = vpop.f32.mrb[1].mxu1 }
  0xf7   :  { %v882_v23 = vadd.f32 %v873_v16, %v213_v21  ;;  %v885_v24 = vadd.f32 %v873_v16, %v245_v22  ;;  %v693_v25 = vpop.f32.mrb[2].mxu0  ;;  %v701_v26 = vpop.f32.mrb[2].mxu1 }
  0xf8   :  { %v565_v27 = vmul.f32 -1.442695, %v876_v19  ;;  %v573_v28 = vmul.f32 -1.442695, %v879_v20  ;;  %v890_v29 = vadd.f32 %v693_v25, %v873_v16  ;;  %v893_v30 = vadd.f32 %v701_v26, %v873_v16  ;;  %v216_v31 = vpop.f32.mrb[3].mxu0  ;;  %v248_v32 = vpop.f32.mrb[3].mxu1 }
  0xf9   :  { %v563_v33 = vmul.f32 -1.442695, %v882_v23  ;;  %v571_v34 = vmul.f32 -1.442695, %v885_v24  ;;  %v898_v35 = vadd.f32 %v873_v16, %v216_v31  ;;  %v901_v36 = vadd.f32 %v873_v16, %v248_v32 }
  0xfa   :  { %738 = vpow2.f32 %v565_v27  ;;  %v566_v37 = vmul.f32 -1.442695, %v890_v29  ;;  %v574_v38 = vmul.f32 -1.442695, %v893_v30 }
  0xfb   :  { %740 = vpow2.f32 %v573_v28  ;;  %v564_v39 = vmul.f32 -1.442695, %v898_v35  ;;  %v572_v40 = vmul.f32 -1.442695, %v901_v36 }
  0xfc   :  { %742 = vpow2.f32 %v563_v33 }
  0xfd   :  { %744 = vpow2.f32 %v571_v34  ;;  %v696_v41 = vpop.f32.mrb[4].mxu0  ;;  %v704_v42 = vpop.f32.mrb[4].mxu1 }
  0xfe   :  { %746 = vpow2.f32 %v566_v37  ;;  %v908_v43 = vadd.f32 %v696_v41, %v873_v16  ;;  %v911_v44 = vadd.f32 %v704_v42, %v873_v16  ;;  %v229_v45 = vpop.f32.mrb[5].mxu0  ;;  %v261_v46 = vpop.f32.mrb[5].mxu1 }
  0xff   :  { %748 = vpow2.f32 %v574_v38  ;;  %v914_v47 = vadd.f32 %v873_v16, %v229_v45  ;;  %v697_v48 = vpop.f32.mrb[6].mxu0  ;;  %v705_v49 = vpop.f32.mrb[6].mxu1  ;;  %v924_v0 = vadd.f32 %v873_v16, %v261_v46 }
 0x100   :  { %750 = vpow2.f32 %v564_v39  ;;  %v569_v50 = vmul.f32 -1.442695, %v908_v43  ;;  %v577_v51 = vmul.f32 -1.442695, %v911_v44  ;;  %v919_v52 = vadd.f32 %v697_v48, %v873_v16  ;;  %v232_v53 = vpop.f32.mrb[7].mxu0  ;;  %v264_v54 = vpop.f32.mrb[7].mxu1 }
 0x101   :  { %752 = vpow2.f32 %v572_v40  ;;  %v567_v55 = vmul.f32 -1.442695, %v914_v47  ;;  %v575_v9 = vmul.f32 -1.442695, %v924_v0  ;;  %v928_v12 = vadd.f32 %v705_v49, %v873_v16 }
 0x102   :  { %754 = vpow2.f32 %v569_v50  ;;  %v570_v56 = vmul.f32 -1.442695, %v919_v52  ;;  %v931_v14 = vadd.f32 %v873_v16, %v232_v53  ;;  %v934_v17 = vadd.f32 %v873_v16, %v264_v54 }
 0x103   :  { %756 = vpow2.f32 %v577_v51  ;;  %v578_v22 = vmul.f32 -1.442695, %v928_v12 }
 0x104   :  { %v739_v57 = vpop.eup %738  ;;  %758 = vpow2.f32 %v567_v55  ;;  %v568_v27 = vmul.f32 -1.442695, %v931_v14  ;;  %v576_v31 = vmul.f32 -1.442695, %v934_v17 }
 0x105   :  { %v741_v58 = vpop.eup %740  ;;  %v400_v59 = vadd.f32 1.0, %v739_v57  ;;  %760 = vpow2.f32 %v570_v56 }
 0x106   :  { %v743_v60 = vpop.eup %742  ;;  %v408_v61 = vadd.f32 1.0, %v741_v58 }
 0x107   :  { %v745_v62 = vpop.eup %744  ;;  %762 = vrcp.f32 %v400_v59  ;;  %v398_v63 = vadd.f32 1.0, %v743_v60 }
 0x108   :  { %v747_v1 = vpop.eup %746  ;;  %764 = vrcp.f32 %v408_v61  ;;  %v406_v2 = vadd.f32 1.0, %v745_v62 }
 0x109   :  { %v749_v3 = vpop.eup %748  ;;  %766 = vrcp.f32 %v398_v63  ;;  %v401_v4 = vadd.f32 1.0, %v747_v1 }
 0x10a   :  { %v751_v5 = vpop.eup %750  ;;  %768 = vrcp.f32 %v406_v2  ;;  %v409_v6 = vadd.f32 1.0, %v749_v3 }
 0x10b   :  { %v753_v7 = vpop.eup %752  ;;  %770 = vrcp.f32 %v401_v4  ;;  %v399_v8 = vadd.f32 1.0, %v751_v5 }
 0x10c   :  { %v755_v10 = vpop.eup %754  ;;  %772 = vrcp.f32 %v409_v6  ;;  %v407_v11 = vadd.f32 1.0, %v753_v7 }
 0x10d   :  { %774 = vrcp.f32 %v399_v8  ;;  %v404_v13 = vadd.f32 1.0, %v755_v10  ;;  %v757_v15 = vpop.eup %756 }
 0x10e   :  { %776 = vrcp.f32 %v407_v11  ;;  %v759_v18 = vpop.eup %758 }
 0x10f   :  { %778 = vpow2.f32 %v575_v9  ;;  %v761_v21 = vpop.eup %760 }
 0x110   :  { %780 = vrcp.f32 %v404_v13  ;;  %v405_v26 = vadd.f32 1.0, %v761_v21 }
 0x111   :  { %v763_v25 = vpop.eup %762 }
 0x112   :  { %v765_v28 = vpop.eup %764  ;;  %782 = vrcp.f32 %v405_v26  ;;  %v448_v37 = vmul.f32 %v763_v25, %v876_v19 }
 0x113   :  { %v767_v32 = vpop.eup %766  ;;  %784 = vpow2.f32 %v578_v22  ;;  %v456_v40 = vmul.f32 %v765_v28, %v879_v20  ;;  %v412_v20 = vadd.f32 1.0, %v757_v15 }
 0x114   :  { %v769_v33 = vpop.eup %768  ;;  %786 = vpow2.f32 %v568_v27  ;;  %v446_v45 = vmul.f32 %v767_v32, %v882_v23 }
 0x115   :  { %v771_v34 = vpop.eup %770  ;;  %788 = vpow2.f32 %v576_v31  ;;  %v454_v50 = vmul.f32 %v769_v33, %v885_v24 }
 0x116   :  { %v773_v16 = vpop.eup %772  ;;  %v449_v38 = vmul.f32 %v771_v34, %v890_v29  ;;  %790 = vrcp.f32 %v412_v20 }
 0x117   :  { %v775_v39 = vpop.eup %774  ;;  %v457_v41 = vmul.f32 %v773_v16, %v893_v30  ;;  %v402_v30 = vadd.f32 1.0, %v759_v18 }
 0x118   :  { %v777_v42 = vpop.eup %776  ;;  %v619_v46 = vpack.c.bf16 %v449_v38, %v448_v37  ;;  %v447_v48 = vmul.f32 %v775_v39, %v898_v35 }
 0x119   :  { %v779_v49 = vpop.eup %778  ;;  %v639_v51 = vpack.c.bf16 %v457_v41, %v456_v40  ;;  %v455_v19 = vmul.f32 %v777_v42, %v901_v36  ;;  %792 = vrcp.f32 %v402_v30 }
 0x11a   :  { %651 = vst [vmem:[%s982_s3 + $0x8] sm:$0xff] %v619_v46   ;;  %v614_v29 = vpack.c.bf16 %v447_v48, %v446_v45  ;;  %v781_v53 = vpop.eup %780  ;;  %v410_v24 = vadd.f32 1.0, %v779_v49 }
 0x11b   :  { %655 = vst [vmem:[%s982_s3 + $0x28] sm:$0xff] %v639_v51   ;;  %v634_v23 = vpack.c.bf16 %v455_v19, %v454_v50  ;;  %v452_v54 = vmul.f32 %v781_v53, %v908_v43 }
 0x11c   :  { %615 = vst [vmem:[%s982_s3] sm:$0xff] %v614_v29   ;;  %v783_v35 = vpop.eup %782  ;;  %794 = vrcp.f32 %v410_v24 }
 0x11d   :  { %654 = vst [vmem:[%s982_s3 + $0x20] sm:$0xff] %v634_v23   ;;  %v785_v36 = vpop.eup %784  ;;  %v453_v55 = vmul.f32 %v783_v35, %v919_v52 }
 0x11e   :  { %v787_v56 = vpop.eup %786  ;;  %v413_v57 = vadd.f32 1.0, %v785_v36 }
 0x11f   :  { %v789_v58 = vpop.eup %788  ;;  %v629_v59 = vpack.c.bf16 %v453_v55, %v452_v54  ;;  %v403_v60 = vadd.f32 1.0, %v787_v56 }
 0x120   :  { %796 = vrcp.f32 %v413_v57  ;;  %v411_v61 = vadd.f32 1.0, %v789_v58  ;;  %v791_v62 = vpop.eup %790 }
 0x121   :  { %653 = vst [vmem:[%s982_s3 + $0x18] sm:$0xff] %v629_v59   ;;  %798 = vrcp.f32 %v403_v60  ;;  %v460_v2 = vmul.f32 %v791_v62, %v911_v44 }
 0x122   :  { %800 = vrcp.f32 %v411_v61 }
 0x123   :  { %v793_v43 = vpop.eup %792 }
 0x124   :  { %v450_v5 = vmul.f32 %v793_v43, %v914_v47 }
 0x126   :  { %v795_v63 = vpop.eup %794 }
 0x127   :  { %v458_v7 = vmul.f32 %v795_v63, %v924_v0 }
 0x12a   :  { %v797_v1 = vpop.eup %796 }
 0x12b   :  { %v799_v52 = vpop.eup %798  ;;  %v461_v3 = vmul.f32 %v797_v1, %v928_v12 }
 0x12c   :  { %v801_v4 = vpop.eup %800  ;;  %v451_v6 = vmul.f32 %v799_v52, %v931_v14 }
 0x12d   :  { %v649_v8 = vpack.c.bf16 %v461_v3, %v460_v2  ;;  %v459_v9 = vmul.f32 %v801_v4, %v934_v17 }
 0x12e   :  { %v624_v10 = vpack.c.bf16 %v451_v6, %v450_v5 }
 0x12f   :  { %657 = vst [vmem:[%s982_s3 + $0x38] sm:$0xff] %v649_v8   ;;  %v644_v11 = vpack.c.bf16 %v459_v9, %v458_v7 }
 0x130   :  { %652 = vst [vmem:[%s982_s3 + $0x10] sm:$0xff] %v624_v10  }
 0x131   :  { %656 = vst [vmem:[%s982_s3 + $0x30] sm:$0xff] %v644_v11  }

// kernel: film_efficientnet_forward.15
= control target key start
LH: loop header
LB: loop body
LE: loop exit
PB: predicated region body
PF: predicated region fallthrough
CT: control target
= control target key end

     0   :  { %s1191_s18 = smov 0   ;;  %s1193_s19 = smov 0   ;;  %s1622_s0 = inlined_call_operand.vmem [shape: bf16[2,8,8,128], index: 0, kind: input, shape index: {}, may-alias: {0,1,2}]   ;;  %s1623_s1 = inlined_call_operand.vmem [shape: bf16[2,8,8,128], index: 1, kind: input, shape index: {}, may-alias: {0,1,2}]   ;;  %s1624_s2 = inlined_call_operand.vmem [shape: bf16[2,8,8,128], index: 2, kind: input, shape index: {}, may-alias: {0,1,2}]   ;;  %s1625_s3 = inlined_call_operand.vmem [shape: f32[9,128], index: 3, kind: input, shape index: {}]   ;;  %s1626_s4 = inlined_call_operand.vmem [shape: f32[1,128], index: 4, kind: input, shape index: {}]   ;;  %s1627_s5 = inlined_call_operand.vmem [shape: bf16[2,8,8,128], index: 5, kind: output, shape index: {}]  }
   0x1   :  { %s1195_s20 = smov 0  }
   0x2 LB: > { %s27_s21 = sadd.s32 1, %s1155_s19  ;;  %p1013_p0 = scmp.ge.s32.totalorder %s1159_s20, 1  ;;  %s1159_s20 = sphi %s1195_s20, %s15_s20   ;;  %s1155_s19 = sphi %s1193_s19, %s1648_s19   ;;  %s1151_s18 = sphi %s1191_s18, %s1647_s18  }
   0x3   : > { %p29_p1 = scmp.ge.s32.totalorder %s27_s21, 2  ;;  %p270_p2 = scmp.lt.s32.totalorder %s1159_s20, 3 }
   0x5   : > { %s1650_s21 = smov (%p29_p1, %s27_s21), 0  ;;  %p271_p3 = pnand %p1013_p0, %p270_p2 }
   0x7   : > { %274 = sbr.rel (%p271_p3) target bundleno = 127 (0x7f), region = 40 }
   0xe   : > { %p331_p4 = scmp.lt.s32.totalorder %s1151_s18, 1  ;;  %v605_v0 = vlaneseq  ;;  %v1214_v2 = vld [vmem:[%s1625_s3] sm:$0xff]  ;;  %vm539_vm0 = vcmask 1040384   ;;  %vm540_vm1 = vsmask.f32 256  ;;  %vm582_vm2 = vcmask 1043456  }
   0xf   : > { %vm583_vm3 = vsmask.f32 3328  ;;  %vm1344_vm4 = vmand %vm539_vm0, %vm540_vm1 }
  0x10   : > { %s1652_s18 = smov (!%p331_p4, %s1151_s18), 1  ;;  %v1209_v1 = vshrl.u32 %v605_v0, 7  ;;  %vm1388_vm5 = vmand %vm582_vm2, %vm583_vm3 }
  0x11   : > { %s1216_s24 = sshll.u32 %s1652_s18, 5 }
  0x12   : > { %v607_v3 = vsub.s32 0, %v1209_v1  ;;  %v627_v4 = vsub.s32 1, %v1209_v1  ;;  %v655_v5 = vsub.s32 2, %v1209_v1  ;;  %v676_v6 = vsub.s32 3, %v1209_v1  ;;  %s1226_s27 = scalar_lea.vmem %s1622_s0, %s1216_s24  ;;  %s351_s30 = scalar_lea.vmem %s1623_s1, %s1216_s24 }
  0x13   : > { %v697_v7 = vsub.s32 4, %v1209_v1  ;;  %s1047_s6 = sadd.s32 28, %s1216_s24  ;;  %v383_v11 = vld [vmem:[%s351_s30] sm:$0xf]  ;;  %v422_v18 = vld [vmem:[%s1226_s27 + $0x4] sm:$0xf]  ;;  %s380_s16 = scalar_lea.vmem %s1627_s5, %s1216_s24 }
  0x14   : > { %v1238_v12 = vld [vmem:[%s1226_s27] sm:$0xf]  ;;  %v1241_v13 = vrot.slane %v1214_v2, %v607_v3  ;;  %v1244_v14 = vrot.slane %v1214_v2, %v627_v4  ;;  %v1247_v15 = vrot.slane %v1214_v2, %v655_v5  ;;  %v1250_v16 = vrot.slane %v1214_v2, %v676_v6  ;;  %s367_s9 = scalar_lea.vmem %s1624_s2, %s1047_s6  ;;  %v423_v19 = vld [vmem:[%s1226_s27 + $0x8] sm:$0xf]  ;;  %v1268_v24 = vld [vmem:[%s1226_s27 + $0xc] sm:$0xf] }
  0x15   : > { %v1255_v17 = vmul.bf16 0.0, %v383_v11  ;;  %v1261_v20 = vcombine.low %v1238_v12, %v1238_v12  ;;  %v1628_v21 = vunpack.c.l.bf16 %v1238_v12  ;;  %v1265_v22 = vrot.slane %v1214_v2, %v697_v7  ;;  %v402_v23 = vld [vmem:[%s367_s9] sm:$0xf]  ;;  %v1271_v25 = vld [vmem:[%s1226_s27 + $0x10] sm:$0xf] }
  0x16   : > { %v1273_v26 = vcombine.low %v422_v18, %v422_v18  ;;  %v1275_v27 = vcombine.low %v423_v19, %v423_v19  ;;  %v1277_v28 = vunpack.c.l.bf16 %v422_v18  ;;  %v1279_v29 = vunpack.c.l.bf16 %v423_v19  ;;  %v1284_v31 = vld [vmem:[%s1226_s27 + $0x14] sm:$0xf]  ;;  %v1287_v32 = vld [vmem:[%s1226_s27 + $0x18] sm:$0xf]  ;;  %v1302_v36 = vld [vmem:[%s1226_s27 + $0x1c] sm:$0xf] }
  0x17   : > { %v1281_v30 = vmul.bf16 0.0, %v402_v23  ;;  %v1291_v33 = vcombine.low %v1255_v17, %v1255_v17  ;;  %v1295_v34 = vcombine.low %v1268_v24, %v1268_v24  ;;  %v1299_v35 = vcombine.low %v1271_v25, %v1271_v25 }
  0x18   : > { %v1306_v37 = vcombine.low %v1284_v31, %v1284_v31  ;;  %v1310_v38 = vcombine.low %v1287_v32, %v1287_v32  ;;  %v467_v39 = vshrl.u32 %v1261_v20, 16  ;;  %v470_v40 = vshll.u32 %v1261_v20, 16 }
  0x19   : > { %1631 = vst [vmem:[#allocation2_spill] sm:$0xff] %v1281_v30  ;;  %v1316_v41 = vcombine.low %v1302_v36, %v1302_v36  ;;  %v1320_v42 = vcombine.low %v1281_v30, %v1281_v30  ;;  %v460_v43 = vshrl.u32 %v1291_v33, 16  ;;  %v463_v44 = vshll.u32 %v1291_v33, 16 }
  0x1a   : > { %v469_v45 = vrot.slane %v467_v39, 7  ;;  %v474_v46 = vshrl.u32 %v1273_v26, 16  ;;  %v477_v47 = vshll.u32 %v1273_v26, 16  ;;  %v481_v48 = vshrl.u32 %v1275_v27, 16 }
  0x1b   : > { %v462_v49 = vrot.slane %v460_v43, 7  ;;  %v484_v50 = vshll.u32 %v1275_v27, 16  ;;  %v488_v51 = vshrl.u32 %v1295_v34, 16  ;;  %v491_v52 = vshll.u32 %v1295_v34, 16 }
  0x1c   : > { %v1330_v53 = vor.u32 %v470_v40, %v469_v45  ;;  %v476_v54 = vrot.slane %v474_v46, 7  ;;  %v483_v55 = vrot.slane %v481_v48, 7  ;;  %v495_v56 = vshrl.u32 %v1299_v35, 16 }
  0x1d   : > { %v1333_v57 = vor.u32 %v463_v44, %v462_v49  ;;  %v490_v58 = vrot.slane %v488_v51, 7  ;;  %v498_v59 = vshll.u32 %v1299_v35, 16  ;;  %v502_v60 = vshrl.u32 %v1306_v37, 16 }
  0x1e   : > { %v1337_v61 = vor.u32 %v477_v47, %v476_v54  ;;  %v1339_v62 = vor.u32 %v484_v50, %v483_v55  ;;  %v497_v63 = vrot.slane %v495_v56, 7  ;;  %v505_v0 = vshll.u32 %v1306_v37, 16 }
  0x1f   : > { %v493_v4 = vor.u32 %v491_v52, %v490_v58  ;;  %v504_v5 = vrot.slane %v502_v60, 7  ;;  %v509_v6 = vshrl.u32 %v1310_v38, 16  ;;  %v512_v7 = vshll.u32 %v1310_v38, 16 }
  0x20   : > { %v500_v11 = vor.u32 %v498_v59, %v497_v63  ;;  %v516_v18 = vshrl.u32 %v1316_v41, 16  ;;  %v519_v19 = vshll.u32 %v1316_v41, 16  ;;  %v523_v20 = vshrl.u32 %v1320_v42, 16 }
  0x21   : > { %v507_v23 = vor.u32 %v505_v0, %v504_v5  ;;  %v511_v26 = vrot.slane %v509_v6, 7  ;;  %v526_v27 = vshll.u32 %v1320_v42, 16  ;;  %v542_v33 = vsel %vm1344_vm4, 0, %v1333_v57 }
  0x22   : > { %v518_v34 = vrot.slane %v516_v18, 7  ;;  %v525_v35 = vrot.slane %v523_v20, 7  ;;  %v543_v37 = vsel %vm1344_vm4, 0, %v1330_v53  ;;  %v544_v38 = vsel %vm1344_vm4, 0, %v1337_v61 }
  0x23   : > { %v514_v41 = vor.u32 %v512_v7, %v511_v26  ;;  %v545_v45 = vsel %vm1344_vm4, 0, %v1339_v62  ;;  %v546_v42 = vsel %vm1344_vm4, 0, %v493_v4  ;;  %v547_v49 = vsel %vm1344_vm4, 0, %v500_v11 }
  0x24   : > { %v1370_v54 = vor.u32 %v519_v19, %v518_v34  ;;  %v1372_v55 = vor.u32 %v526_v27, %v525_v35  ;;  %v548_v53 = vsel %vm1344_vm4, 0, %v507_v23  ;;  %v552_v57 = vrot.slane %v463_v44, 1 }
  0x25   : > { %v549_v58 = vsel %vm1344_vm4, 0, %v514_v41  ;;  %v554_v61 = vrot.slane %v470_v40, 1  ;;  %v556_v63 = vrot.slane %v477_v47, 1  ;;  %v558_v62 = vrot.slane %v484_v50, 1 }
  0x26   : > { %v1384_v11 = vor.u32 %v552_v57, %v460_v43  ;;  %v560_v26 = vrot.slane %v491_v52, 1  ;;  %v562_v23 = vrot.slane %v498_v59, 1  ;;  %v564_v35 = vrot.slane %v505_v0, 1 }
  0x27   : > { %v555_v40 = vor.u32 %v554_v61, %v467_v39  ;;  %v557_v47 = vor.u32 %v556_v63, %v474_v46  ;;  %v559_v50 = vor.u32 %v558_v62, %v481_v48  ;;  %v566_v41 = vrot.slane %v512_v7, 1 }
  0x28   : > { %v561_v34 = vor.u32 %v560_v26, %v488_v51  ;;  %v568_v10 = vrot.slane %v519_v19, 1  ;;  %v563_v9 = vor.u32 %v562_v23, %v495_v56  ;;  %v570_v8 = vrot.slane %v526_v27, 1 }
  0x29   : > { %v585_v43 = vsel %vm1388_vm5, %v1384_v11, 0  ;;  %v586_v52 = vsel %vm1388_vm5, %v555_v40, 0  ;;  %v565_v57 = vor.u32 %v564_v35, %v502_v60  ;;  %v567_v5 = vor.u32 %v566_v41, %v509_v6 }
  0x2a   : > { %v1397_v4 = vor.u32 %v568_v10, %v516_v18  ;;  %v587_v39 = vsel %vm1388_vm5, %v557_v47, 0  ;;  %v1401_v46 = vor.u32 %v570_v8, %v523_v20  ;;  %v588_v48 = vsel %vm1388_vm5, %v559_v50, 0 }
  0x2b   : > { %v589_v51 = vsel %vm1388_vm5, %v561_v34, 0  ;;  %v590_v56 = vsel %vm1388_vm5, %v563_v9, 0  ;;  %v591_v59 = vsel %vm1388_vm5, %v565_v57, 0  ;;  %v592_v10 = vsel %vm1388_vm5, %v567_v5, 0 }
  0x2c   : > { %1636 = vst [vmem:[#allocation3_spill] sm:$0xff] %v1401_v46  ;;  %v597_v60 = vunpack.c.l.bf16 %v542_v33  ;;  %v598_v6 = vunpack.c.l.bf16 %v543_v37  ;;  %v1419_v7 = vunpack.c.l.bf16 %v544_v38  ;;  %v1421_v18 = vunpack.c.l.bf16 %v545_v45 }
  0x2d   : > { %v1423_v9 = vunpack.c.l.bf16 %v546_v42  ;;  %v1425_v19 = vunpack.c.l.bf16 %v547_v49  ;;  %v1427_v20 = vunpack.c.l.bf16 %v548_v53  ;;  %v1429_v27 = vunpack.c.l.bf16 %v549_v58 }
  0x2e   : > { %v609_v61 = vmul.f32 %v1241_v13, %v597_v60  ;;  %v610_v33 = vmul.f32 %v1241_v13, %v598_v6  ;;  %v611_v63 = vmul.f32 %v1241_v13, %v1419_v7  ;;  %v612_v37 = vmul.f32 %v1241_v13, %v1421_v18 }
  0x2f   : > { %v613_v38 = vmul.f32 %v1241_v13, %v1423_v9  ;;  %v614_v45 = vmul.f32 %v1241_v13, %v1425_v19  ;;  %v615_v42 = vmul.f32 %v1241_v13, %v1427_v20  ;;  %v616_v49 = vmul.f32 %v1241_v13, %v1429_v27 }
  0x30   : > { %v617_v53 = vunpack.c.l.bf16 %v1255_v17  ;;  %v1447_v58 = vunpack.c.l.bf16 %v1268_v24  ;;  %v1450_v62 = vunpack.c.l.bf16 %v1271_v25  ;;  %v1453_v5 = vunpack.c.l.bf16 %v1284_v31 }
  0x31   : > { %v1456_v11 = vunpack.c.l.bf16 %v1287_v32  ;;  %v630_v26 = vmul.f32 %v1244_v14, %v1628_v21  ;;  %v631_v13 = vmul.f32 %v1244_v14, %v1277_v28  ;;  %v632_v17 = vmul.f32 %v1244_v14, %v1279_v29 }
  0x32   : > { %v629_v24 = vmul.f32 %v1244_v14, %v617_v53  ;;  %v633_v25 = vmul.f32 %v1244_v14, %v1447_v58  ;;  %v634_v31 = vmul.f32 %v1244_v14, %v1450_v62  ;;  %v635_v32 = vmul.f32 %v1244_v14, %v1453_v5 }
  0x33   : > { %v636_v40 = vmul.f32 %v1244_v14, %v1456_v11  ;;  %v638_v47 = vadd.f32 %v630_v26, %v610_v33  ;;  %v639_v50 = vadd.f32 %v631_v13, %v611_v63  ;;  %v640_v23 = vadd.f32 %v632_v17, %v612_v37 }
  0x34   : > { %v637_v34 = vadd.f32 %v629_v24, %v609_v61  ;;  %v641_v35 = vadd.f32 %v633_v25, %v613_v38  ;;  %v642_v41 = vadd.f32 %v634_v31, %v614_v45  ;;  %v643_v57 = vadd.f32 %v635_v32, %v615_v42 }
  0x35   : > { %v644_v60 = vadd.f32 %v636_v40, %v616_v49  ;;  %v645_v53 = vunpack.c.l.bf16 %v585_v43  ;;  %v1474_v0 = vunpack.c.l.bf16 %v586_v52  ;;  %v1476_v8 = vunpack.c.l.bf16 %v587_v39 }
  0x36   : > { %v1478_v21 = vunpack.c.l.bf16 %v588_v48  ;;  %v1480_v46 = vunpack.c.l.bf16 %v589_v51  ;;  %v1482_v30 = vunpack.c.l.bf16 %v590_v56  ;;  %v1484_v14 = vunpack.c.l.bf16 %v591_v59 }
  0x37   : > { %v1486_v33 = vunpack.c.l.bf16 %v592_v10  ;;  %v657_v61 = vmul.f32 %v1247_v15, %v645_v53  ;;  %v658_v63 = vmul.f32 %v1247_v15, %v1474_v0  ;;  %v659_v43 = vmul.f32 %v1247_v15, %v1476_v8 }
  0x38   : > { %v660_v52 = vmul.f32 %v1247_v15, %v1478_v21  ;;  %v661_v39 = vmul.f32 %v1247_v15, %v1480_v46  ;;  %v662_v48 = vmul.f32 %v1247_v15, %v1482_v30  ;;  %v663_v51 = vmul.f32 %v1247_v15, %v1484_v14 }
  0x39   : > { %v664_v56 = vmul.f32 %v1247_v15, %v1486_v33  ;;  %v665_v59 = vadd.f32 %v657_v61, %v637_v34  ;;  %v666_v10 = vadd.f32 %v658_v63, %v638_v47  ;;  %v667_v37 = vadd.f32 %v659_v43, %v639_v50 }
  0x3a   : > { %v668_v38 = vadd.f32 %v660_v52, %v640_v23  ;;  %v669_v45 = vadd.f32 %v661_v39, %v641_v35  ;;  %v670_v42 = vadd.f32 %v662_v48, %v642_v41  ;;  %v671_v49 = vadd.f32 %v663_v51, %v643_v57 }
  0x3b   : > { %v672_v26 = vadd.f32 %v664_v56, %v644_v60  ;;  %v1637_v13 = vsel %vm1344_vm4, 0, %v1370_v54  ;;  %v678_v24 = vmul.f32 %v1250_v16, %v598_v6  ;;  %v679_v25 = vmul.f32 %v1250_v16, %v1419_v7 }
  0x3c   : > { %v1507_v17 = vunpack.c.l.bf16 %v1637_v13  ;;  %v680_v15 = vmul.f32 %v1250_v16, %v1421_v18  ;;  %v681_v31 = vmul.f32 %v1250_v16, %v1423_v9  ;;  %v682_v32 = vmul.f32 %v1250_v16, %v1425_v19 }
  0x3d   : > { %v683_v40 = vmul.f32 %v1250_v16, %v1427_v20  ;;  %v684_v54 = vmul.f32 %v1250_v16, %v1429_v27  ;;  %v686_v47 = vadd.f32 %v678_v24, %v665_v59  ;;  %v687_v50 = vadd.f32 %v679_v25, %v666_v10  ;;  %v1546_v59 = vld [vmem:[%s1625_s3 + $0x8] ss:$0 sm:$0xff] }
  0x3e   : > { %v685_v6 = vmul.f32 %v1250_v16, %v1507_v17  ;;  %v688_v23 = vadd.f32 %v680_v15, %v667_v37  ;;  %v689_v34 = vadd.f32 %v681_v31, %v668_v38  ;;  %v690_v35 = vadd.f32 %v682_v32, %v669_v45 }
  0x3f   : > { %v691_v41 = vadd.f32 %v683_v40, %v670_v42  ;;  %v692_v57 = vadd.f32 %v684_v54, %v671_v49  ;;  %v694_v53 = vunpack.c.l.bf16 %v1302_v36  ;;  %v1638_v61 = vunpack.c.l.bf16 %v1238_v12  ;;  %v1643_v54 = vld [vmem:[#allocation2_spill] sm:$0xff] }
  0x40   : > { %v693_v60 = vadd.f32 %v685_v6, %v672_v26  ;;  %v700_v43 = vmul.f32 %v1265_v22, %v1277_v28  ;;  %v701_v16 = vmul.f32 %v1265_v22, %v1279_v29  ;;  %v702_v52 = vmul.f32 %v1265_v22, %v1447_v58 }
  0x41   : > { %v699_v63 = vmul.f32 %v1265_v22, %v1638_v61  ;;  %v703_v39 = vmul.f32 %v1265_v22, %v1450_v62  ;;  %v704_v48 = vmul.f32 %v1265_v22, %v1453_v5  ;;  %v705_v12 = vmul.f32 %v1265_v22, %v1456_v11 }
  0x42   : > { %v706_v51 = vmul.f32 %v1265_v22, %v694_v53  ;;  %v708_v10 = vadd.f32 %v700_v43, %v687_v50  ;;  %v709_v37 = vadd.f32 %v701_v16, %v688_v23  ;;  %v710_v38 = vadd.f32 %v702_v52, %v689_v34  ;;  %v1645_v50 = vld [vmem:[#allocation3_spill] sm:$0xff] }
  0x43   : > { %v707_v56 = vadd.f32 %v699_v63, %v686_v47  ;;  %v711_v45 = vadd.f32 %v703_v39, %v690_v35  ;;  %v712_v42 = vadd.f32 %v704_v48, %v691_v41  ;;  %v713_v49 = vadd.f32 %v705_v12, %v692_v57 }
  0x44   : > { %v714_v26 = vadd.f32 %v706_v51, %v693_v60  ;;  %v1639_v13 = vsel %vm1388_vm5, %v1397_v4, 0  ;;  %v1640_v22 = vsub.s32 5, %v1209_v1  ;;  %v1641_v15 = vsel %vm1344_vm4, 0, %v1372_v55 }
  0x45   : > { %v715_v24 = vunpack.c.l.bf16 %v1639_v13  ;;  %v736_v31 = vunpack.c.l.bf16 %v1641_v15  ;;  %v1642_v32 = vsub.s32 6, %v1209_v1  ;;  %v757_v6 = vunpack.c.l.bf16 %v1643_v54 }
  0x46   : > { %v719_v25 = vrot.slane %v1214_v2, %v1640_v22  ;;  %v1644_v47 = vsub.s32 7, %v1209_v1  ;;  %v1646_v23 = vsel %vm1388_vm5, %v1645_v50, 0  ;;  %v783_v3 = vmul.f32 %v1546_v59, %v1476_v8 }
  0x47   : > { %v740_v40 = vrot.slane %v1214_v2, %v1642_v32  ;;  %v778_v34 = vunpack.c.l.bf16 %v1646_v23  ;;  %v784_v55 = vmul.f32 %v1546_v59, %v1478_v21  ;;  %v788_v36 = vmul.f32 %v1546_v59, %v1486_v33 }
  0x48   : > { %v761_v4 = vrot.slane %v1214_v2, %v1644_v47  ;;  %v720_v35 = vmul.f32 %v719_v25, %v1474_v0  ;;  %v721_v41 = vmul.f32 %v719_v25, %v1476_v8  ;;  %v722_v57 = vmul.f32 %v719_v25, %v1478_v21 }
  0x49   : > { %v723_v1 = vmul.f32 %v719_v25, %v1480_v46  ;;  %v724_v2 = vmul.f32 %v719_v25, %v1482_v30  ;;  %v725_v44 = vmul.f32 %v719_v25, %v1484_v14  ;;  %v726_v60 = vmul.f32 %v719_v25, %v1486_v33 }
  0x4a   : > { %v727_v61 = vmul.f32 %v719_v25, %v715_v24  ;;  %v728_v63 = vadd.f32 %v720_v35, %v707_v56  ;;  %v729_v43 = vadd.f32 %v721_v41, %v708_v10  ;;  %v730_v16 = vadd.f32 %v722_v57, %v709_v37 }
  0x4b   : > { %v731_v52 = vadd.f32 %v723_v1, %v710_v38  ;;  %v732_v39 = vadd.f32 %v724_v2, %v711_v45  ;;  %v733_v48 = vadd.f32 %v725_v44, %v712_v42  ;;  %v734_v0 = vadd.f32 %v726_v60, %v713_v49 }
  0x4c   : > { %v735_v12 = vadd.f32 %v727_v61, %v714_v26  ;;  %v741_v8 = vmul.f32 %v740_v40, %v1419_v7  ;;  %v742_v21 = vmul.f32 %v740_v40, %v1421_v18  ;;  %v743_v51 = vmul.f32 %v740_v40, %v1423_v9 }
  0x4d   : > { %v744_v13 = vmul.f32 %v740_v40, %v1425_v19  ;;  %v745_v22 = vmul.f32 %v740_v40, %v1427_v20  ;;  %v746_v25 = vmul.f32 %v740_v40, %v1429_v27  ;;  %v747_v56 = vmul.f32 %v740_v40, %v1507_v17 }
  0x4e   : > { %v748_v10 = vmul.f32 %v740_v40, %v736_v31  ;;  %v749_v37 = vadd.f32 %v741_v8, %v728_v63  ;;  %v750_v38 = vadd.f32 %v742_v21, %v729_v43  ;;  %v751_v45 = vadd.f32 %v743_v51, %v730_v16 }
  0x4f   : > { %v752_v42 = vadd.f32 %v744_v13, %v731_v52  ;;  %v753_v49 = vadd.f32 %v745_v22, %v732_v39  ;;  %v754_v26 = vadd.f32 %v746_v25, %v733_v48  ;;  %v755_v7 = vadd.f32 %v747_v56, %v734_v0 }
  0x50   : > { %v756_v15 = vadd.f32 %v748_v10, %v735_v12  ;;  %v762_v18 = vmul.f32 %v761_v4, %v1277_v28  ;;  %v763_v9 = vmul.f32 %v761_v4, %v1279_v29  ;;  %v764_v19 = vmul.f32 %v761_v4, %v1447_v58 }
  0x51   : > { %v765_v20 = vmul.f32 %v761_v4, %v1450_v62  ;;  %v766_v27 = vmul.f32 %v761_v4, %v1453_v5  ;;  %v767_v17 = vmul.f32 %v761_v4, %v1456_v11  ;;  %v768_v31 = vmul.f32 %v761_v4, %v694_v53  ;;  %v1033_v11 = vld [vmem:[%s1626_s4] ss:$0 sm:$0xff] }
  0x52   : > { %v769_v32 = vmul.f32 %v761_v4, %v757_v6  ;;  %v770_v40 = vadd.f32 %v762_v18, %v749_v37  ;;  %v771_v54 = vadd.f32 %v763_v9, %v750_v38  ;;  %v772_v47 = vadd.f32 %v764_v19, %v751_v45 }
  0x53   : > { %v773_v50 = vadd.f32 %v765_v20, %v752_v42  ;;  %v774_v23 = vadd.f32 %v766_v27, %v753_v49  ;;  %v775_v28 = vadd.f32 %v767_v17, %v754_v26  ;;  %v776_v35 = vadd.f32 %v768_v31, %v755_v7 }
  0x54   : > { %v777_v29 = vadd.f32 %v769_v32, %v756_v15  ;;  %v785_v58 = vmul.f32 %v1546_v59, %v1480_v46  ;;  %v786_v62 = vmul.f32 %v1546_v59, %v1482_v30  ;;  %v787_v5 = vmul.f32 %v1546_v59, %v1484_v14 }
  0x55   : > { %v789_v53 = vmul.f32 %v1546_v59, %v715_v24  ;;  %v790_v6 = vmul.f32 %v1546_v59, %v778_v34  ;;  %v791_v4 = vadd.f32 %v783_v3, %v770_v40  ;;  %v792_v41 = vadd.f32 %v784_v55, %v771_v54 }
  0x56   : > { %v793_v46 = vadd.f32 %v785_v58, %v772_v47  ;;  %v794_v57 = vadd.f32 %v786_v62, %v773_v50  ;;  %v795_v1 = vadd.f32 %v787_v5, %v774_v23  ;;  %v796_v30 = vadd.f32 %v788_v36, %v775_v28 }
  0x57   : > { %v797_v2 = vadd.f32 %v789_v53, %v776_v35  ;;  %v798_v44 = vadd.f32 %v790_v6, %v777_v29  ;;  %v806_v14 = vadd.f32 %v1033_v11, %v791_v4  ;;  %v807_v60 = vadd.f32 %v1033_v11, %v792_v41 }
  0x58   : > { %v808_v61 = vadd.f32 %v1033_v11, %v793_v46  ;;  %v809_v33 = vadd.f32 %v1033_v11, %v794_v57  ;;  %v810_v63 = vadd.f32 %v1033_v11, %v795_v1  ;;  %v811_v43 = vadd.f32 %v1033_v11, %v796_v30 }
  0x59   : > { %v812_v16 = vadd.f32 %v1033_v11, %v797_v2  ;;  %v1034_v52 = vmul.f32 -1.442695, %v806_v14  ;;  %v1035_v39 = vmul.f32 -1.442695, %v807_v60  ;;  %v813_v24 = vadd.f32 %v1033_v11, %v798_v44 }
  0x5a   : > { %v1036_v48 = vmul.f32 -1.442695, %v808_v61  ;;  %v1037_v59 = vmul.f32 -1.442695, %v809_v33  ;;  %v1038_v34 = vmul.f32 -1.442695, %v810_v63 }
  0x5b   : > { %1105 = vpow2.f32 %v1034_v52  ;;  %v1039_v3 = vmul.f32 -1.442695, %v811_v43  ;;  %v1040_v55 = vmul.f32 -1.442695, %v812_v16  ;;  %v1041_v0 = vmul.f32 -1.442695, %v813_v24 }
  0x5c   : > { %1107 = vpow2.f32 %v1035_v39 }
  0x5d   : > { %1109 = vpow2.f32 %v1036_v48 }
  0x5e   : > { %1111 = vpow2.f32 %v1037_v59 }
  0x5f   : > { %1113 = vpow2.f32 %v1038_v34 }
  0x60   : > { %1115 = vpow2.f32 %v1039_v3 }
  0x61   : > { %1117 = vpow2.f32 %v1040_v55 }
  0x62   : > { %1119 = vpow2.f32 %v1041_v0 }
  0x65   : > { %v1106_v12 = vpop.eup %1105 }
  0x66   : > { %v1108_v8 = vpop.eup %1107  ;;  %v838_v21 = vadd.f32 1.0, %v1106_v12 }
  0x67   : > { %v1110_v51 = vpop.eup %1109  ;;  %v839_v13 = vadd.f32 1.0, %v1108_v8 }
  0x68   : > { %v1112_v22 = vpop.eup %1111  ;;  %v840_v25 = vadd.f32 1.0, %v1110_v51  ;;  %1121 = vrcp.f32 %v838_v21 }
  0x69   : > { %v1114_v56 = vpop.eup %1113  ;;  %v841_v10 = vadd.f32 1.0, %v1112_v22  ;;  %1123 = vrcp.f32 %v839_v13 }
  0x6a   : > { %v1116_v37 = vpop.eup %1115  ;;  %v842_v38 = vadd.f32 1.0, %v1114_v56  ;;  %1125 = vrcp.f32 %v840_v25 }
  0x6b   : > { %v1118_v45 = vpop.eup %1117  ;;  %v843_v42 = vadd.f32 1.0, %v1116_v37  ;;  %1127 = vrcp.f32 %v841_v10 }
  0x6c   : > { %v1120_v49 = vpop.eup %1119  ;;  %v844_v26 = vadd.f32 1.0, %v1118_v45  ;;  %1129 = vrcp.f32 %v842_v38 }
  0x6d   : > { %v845_v7 = vadd.f32 1.0, %v1120_v49  ;;  %1131 = vrcp.f32 %v843_v42 }
  0x6e   : > { %1133 = vrcp.f32 %v844_v26 }
  0x6f   : > { %1135 = vrcp.f32 %v845_v7 }
  0x72   : > { %v1122_v15 = vpop.eup %1121 }
  0x73   : > { %v1124_v18 = vpop.eup %1123  ;;  %v862_v9 = vmul.f32 %v1122_v15, %v806_v14 }
  0x74   : > { %v1126_v19 = vpop.eup %1125  ;;  %v863_v20 = vmul.f32 %v1124_v18, %v807_v60 }
  0x75   : > { %v1128_v27 = vpop.eup %1127  ;;  %v864_v17 = vmul.f32 %v1126_v19, %v808_v61 }
  0x76   : > { %v1130_v31 = vpop.eup %1129  ;;  %v865_v32 = vmul.f32 %v1128_v27, %v809_v33  ;;  %v1052_v40 = vpack.c.bf16 %v863_v20, %v862_v9 }
  0x77   : > { %v1132_v54 = vpop.eup %1131  ;;  %v866_v47 = vmul.f32 %v1130_v31, %v810_v63 }
  0x78   : > { %v1134_v50 = vpop.eup %1133  ;;  %v867_v23 = vmul.f32 %v1132_v54, %v811_v43  ;;  %1053 = vst [vmem:[%s380_s16] sm:$0xff] %v1052_v40   ;;  %v1057_v28 = vpack.c.bf16 %v865_v32, %v864_v17 }
  0x79   : > { %v1136_v35 = vpop.eup %1135  ;;  %v868_v29 = vmul.f32 %v1134_v50, %v812_v16 }
  0x7a   : > { %v869_v58 = vmul.f32 %v1136_v35, %v813_v24  ;;  %1070 = vst [vmem:[%s380_s16 + $0x8] sm:$0xff] %v1057_v28   ;;  %v1062_v62 = vpack.c.bf16 %v867_v23, %v866_v47 }
  0x7c   : > { %1071 = vst [vmem:[%s380_s16 + $0x10] sm:$0xff] %v1062_v62   ;;  %v1067_v5 = vpack.c.bf16 %v869_v58, %v868_v29 }
  0x7e   : > { %1072 = vst [vmem:[%s380_s16 + $0x18] sm:$0xff] %v1067_v5  }
  0x7f PF: > { %s15_s20 = sadd.s32 1, %s1159_s20   ;;  %s1647_s18 = smov %s1155_s19 }
  0x80   : > { %p12_p5 = scmp.ge.s32.totalorder %s15_s20, 4   ;;  %s1648_s19 = smov %s1650_s21 }
  0x82   :  { %14 = sbr.rel (!%p12_p5) target bundleno = 2 (0x2), region = 76 }

// kernel: film_efficientnet_forward.21
= control target key start
LH: loop header
LB: loop body
LE: loop exit
PB: predicated region body
PF: predicated region fallthrough
CT: control target
= control target key end

     0   :  { %s905_s18 = smov 0   ;;  %s907_s19 = smov 0   ;;  %s982_s0 = inlined_call_operand.vmem [shape: bf16[2,64,128], index: 0, kind: input, shape index: {}]   ;;  %s983_s1 = inlined_call_operand.vmem [shape: f32[2,1,128], index: 1, kind: input, shape index: {}]   ;;  %s984_s2 = inlined_call_operand.vmem [shape: bf16[128,128], index: 2, kind: input, shape index: {}]   ;;  %s985_s3 = inlined_call_operand.vmem [shape: f32[1,128], index: 3, kind: input, shape index: {}]   ;;  %s986_s4 = inlined_call_operand.vmem [shape: bf16[2,64,128], index: 4, kind: input, shape index: {}]   ;;  %s987_s5 = inlined_call_operand.vmem [shape: bf16[2,64,128], index: 5, kind: output, shape index: {}]  }
   0x1   :  { %s909_s20 = smov 0  }
   0x2 LB: > { %s27_s21 = sadd.s32 1, %s869_s19  ;;  %p668_p0 = scmp.ge.s32.totalorder %s873_s20, 1  ;;  %s873_s20 = sphi %s909_s20, %s15_s20   ;;  %s869_s19 = sphi %s907_s19, %s989_s19   ;;  %s865_s18 = sphi %s905_s18, %s988_s18  }
   0x3   : > { %p29_p1 = scmp.ge.s32.totalorder %s27_s21, 2  ;;  %p233_p2 = scmp.lt.s32.totalorder %s873_s20, 3 }
   0x5   : > { %s991_s21 = smov (%p29_p1, %s27_s21), 0  ;;  %p234_p3 = pnand %p668_p0, %p233_p2 }
   0x6   : > { %v843_v0 = vld [vmem:[%s984_s2] sm:$0xff] (!%p234_p3)   ;;  %p282_p4 = scmp.lt.s32.totalorder (!%p234_p3), %s865_s18, 1  ;;  %v844_v1 = vld [vmem:[%s984_s2 + $0x8] sm:$0xff] (!%p234_p3)   ;;  %v845_v2 = vld [vmem:[%s984_s2 + $0x10] sm:$0xff] (!%p234_p3)  }
   0x7   : > { %237 = sbr.rel (%p234_p3) target bundleno = 262 (0x106), region = 40  ;;  %779 = vmatprep.subr.bf16.mxu0 (!%p234_p3), %v843_v0  ;;  %803 = vmatprep.subr.bf16.mxu1 (!%p234_p3), %v843_v0  ;;  %v846_v3 = vld [vmem:[%s984_s2 + $0x18] sm:$0xff] (!%p234_p3)   ;;  %v847_v14 = vld [vmem:[%s984_s2 + $0x20] sm:$0xff] (!%p234_p3)   ;;  %v848_v18 = vld [vmem:[%s984_s2 + $0x28] sm:$0xff] (!%p234_p3)  }
   0x8   : > { %780 = vmatpush3.bf16.msra.mxu0 (!%p234_p3), %v843_v0  ;;  %811 = vmatpush3.bf16.msra.mxu1 (!%p234_p3), %v843_v0  ;;  %v849_v21 = vld [vmem:[%s984_s2 + $0x30] sm:$0xff] (!%p234_p3)   ;;  %v850_v26 = vld [vmem:[%s984_s2 + $0x38] sm:$0xff] (!%p234_p3)   ;;  %v676_v37 = vld [vmem:[%s985_s3] ss:$0 sm:$0xff] (!%p234_p3) }
   0x9   : > { %781 = vmatprep.subr.bf16.mxu0 (!%p234_p3), %v844_v1  ;;  %804 = vmatprep.subr.bf16.mxu1 (!%p234_p3), %v844_v1 }
   0xc   : > { %782 = vmatpush3.bf16.msra.mxu0 (!%p234_p3), %v844_v1  ;;  %812 = vmatpush3.bf16.msra.mxu1 (!%p234_p3), %v844_v1 }
   0xd   : > { %783 = vmatprep.subr.bf16.mxu0 (!%p234_p3), %v845_v2  ;;  %805 = vmatprep.subr.bf16.mxu1 (!%p234_p3), %v845_v2 }
   0xe   : > { %s993_s18 = smov (!%p282_p4, %s865_s18), 1 }
   0xf   : > { %s932_s28 = sshll.u32 %s993_s18, 5  ;;  %s293_s9 = scalar_lea.vmem %s983_s1, %s993_s18 }
  0x10   : > { %s938_s6 = scalar_lea.vmem %s982_s0, %s932_s28  ;;  %v675_v5 = vld [vmem:[%s293_s9] ss:$0 sm:$0xff]  ;;  %784 = vmatpush3.bf16.msra.mxu0 %v845_v2  ;;  %813 = vmatpush3.bf16.msra.mxu1 %v845_v2  ;;  %s302_s25 = scalar_lea.vmem %s986_s4, %s932_s28 }
  0x11   : > { %v707_v4 = vld [vmem:[%s938_s6] sm:$0xff]   ;;  %v759_v6 = vld [vmem:[%s938_s6 + $0x10] sm:$0xff]   ;;  %785 = vmatprep.subr.bf16.mxu0 %v846_v3  ;;  %806 = vmatprep.subr.bf16.mxu1 %v846_v3  ;;  %v758_v19 = vld [vmem:[%s938_s6 + $0x8] sm:$0xff]  }
  0x12   : > { %v708_v7 = vunpack.c.l.bf16 %v707_v4  ;;  %v709_v8 = vunpack.c.h.bf16 %v707_v4  ;;  %v716_v9 = vunpack.c.l.bf16 %v759_v6  ;;  %v717_v10 = vunpack.c.h.bf16 %v759_v6  ;;  %v760_v20 = vld [vmem:[%s938_s6 + $0x18] sm:$0xff]   ;;  %v761_v33 = vld [vmem:[%s302_s25 + $0x8] sm:$0xff]   ;;  %v723_v35 = vld [vmem:[%s302_s25] sm:$0xff]   ;;  %s312_s6 = scalar_lea.vmem %s987_s5, %s932_s28 }
  0x13   : > { %v712_v22 = vunpack.c.l.bf16 %v758_v19  ;;  %v713_v23 = vunpack.c.h.bf16 %v758_v19  ;;  %v720_v24 = vunpack.c.l.bf16 %v760_v20  ;;  %v721_v25 = vunpack.c.h.bf16 %v760_v20  ;;  %v763_v34 = vld [vmem:[%s302_s25 + $0x18] sm:$0xff]   ;;  %v762_v36 = vld [vmem:[%s302_s25 + $0x10] sm:$0xff]  }
  0x14   : > { %v338_v11 = vmul.f32 %v708_v7, %v675_v5  ;;  %v339_v12 = vmul.f32 %v709_v8, %v675_v5  ;;  %v342_v13 = vmul.f32 %v716_v9, %v675_v5  ;;  %v343_v15 = vmul.f32 %v717_v10, %v675_v5  ;;  %786 = vmatpush3.bf16.msra.mxu0 %v846_v3 }
  0x15   : > { %814 = vmatpush3.bf16.msra.mxu1 %v846_v3  ;;  %787 = vmatprep.subr.bf16.mxu0 %v847_v14  ;;  %v340_v27 = vmul.f32 %v712_v22, %v675_v5  ;;  %v341_v28 = vmul.f32 %v713_v23, %v675_v5  ;;  %v344_v29 = vmul.f32 %v720_v24, %v675_v5  ;;  %v728_v39 = vunpack.c.l.bf16 %v761_v33 }
  0x16   : > { %v346_v16 = vpack.c.bf16 %v339_v12, %v338_v11  ;;  %v348_v17 = vpack.c.bf16 %v343_v15, %v342_v13  ;;  %807 = vmatprep.subr.bf16.mxu1 %v847_v14  ;;  %v345_v30 = vmul.f32 %v721_v25, %v675_v5  ;;  %v736_v41 = vunpack.c.l.bf16 %v763_v34 }
  0x17   : > { %v347_v31 = vpack.c.bf16 %v341_v28, %v340_v27  ;;  %v724_v42 = vunpack.c.l.bf16 %v723_v35  ;;  %v732_v43 = vunpack.c.l.bf16 %v762_v36  ;;  %v729_v48 = vunpack.c.h.bf16 %v761_v33 }
  0x18   : > { %795 = vmatprep.mubr.bf16.mxu0 %v346_v16  ;;  %799 = vmatprep.mubr.bf16.mxu1 %v348_v17  ;;  %v349_v32 = vpack.c.bf16 %v345_v30, %v344_v29  ;;  %v737_v49 = vunpack.c.h.bf16 %v763_v34  ;;  %v725_v54 = vunpack.c.h.bf16 %v723_v35  ;;  %v733_v55 = vunpack.c.h.bf16 %v762_v36 }
  0x19   : > { %788 = vmatpush3.bf16.msra.mxu0 %v847_v14  ;;  %815 = vmatpush3.bf16.msra.mxu1 %v847_v14 }
  0x1a   : > { %789 = vmatprep.subr.bf16.mxu0 %v848_v18  ;;  %808 = vmatprep.subr.bf16.mxu1 %v848_v18 }
  0x1d   : > { %790 = vmatpush3.bf16.msra.mxu0 %v848_v18  ;;  %816 = vmatpush3.bf16.msra.mxu1 %v848_v18 }
  0x1e   : > { %791 = vmatprep.subr.bf16.mxu0 %v849_v21  ;;  %809 = vmatprep.subr.bf16.mxu1 %v849_v21 }
  0x21   : > { %792 = vmatpush3.bf16.msra.mxu0 %v849_v21  ;;  %817 = vmatpush3.bf16.msra.mxu1 %v849_v21 }
  0x22   : > { %793 = vmatprep.subr.bf16.mxu0 %v850_v26  ;;  %810 = vmatprep.subr.bf16.mxu1 %v850_v26 }
  0x25   : > { %794 = vmatpush3.bf16.msra.mxu0 %v850_v26  ;;  %818 = vmatpush3.bf16.msra.mxu1 %v850_v26 }
  0x28   : > { %796 = vmatmul.mubr.bf16.vlgmr.msra.gmra.mrb[0].mxu0 %v347_v31  ;;  %800 = vmatmul.mubr.bf16.vlgmr.msra.gmra.mrb[0].mxu1 %v349_v32 }
  0xfb   : > { %v797_v38 = vpop.f32.mrb[0].mxu0  ;;  %v801_v40 = vpop.f32.mrb[0].mxu1 }
  0xfc   : > { %v464_v44 = vadd.f32 %v797_v38, %v676_v37  ;;  %v480_v45 = vadd.f32 %v801_v40, %v676_v37  ;;  %v455_v46 = vpop.f32.mrb[1].mxu0  ;;  %v471_v47 = vpop.f32.mrb[1].mxu1 }
  0xfd   : > { %v456_v50 = vadd.f32 %v676_v37, %v455_v46  ;;  %v472_v51 = vadd.f32 %v676_v37, %v471_v47  ;;  %v798_v52 = vpop.f32.mrb[2].mxu0  ;;  %v802_v53 = vpop.f32.mrb[2].mxu1 }
  0xfe   : > { %v467_v56 = vadd.f32 %v798_v52, %v676_v37  ;;  %v483_v57 = vadd.f32 %v802_v53, %v676_v37  ;;  %v458_v58 = vpop.f32.mrb[3].mxu0  ;;  %v474_v59 = vpop.f32.mrb[3].mxu1  ;;  %v504_v62 = vadd.f32 %v728_v39, %v464_v44  ;;  %v508_v63 = vadd.f32 %v736_v41, %v480_v45 }
  0xff   : > { %v459_v60 = vadd.f32 %v676_v37, %v458_v58  ;;  %v475_v61 = vadd.f32 %v676_v37, %v474_v59  ;;  %v502_v2 = vadd.f32 %v724_v42, %v456_v50  ;;  %v506_v3 = vadd.f32 %v732_v43, %v472_v51 }
 0x100   : > { %v505_v0 = vadd.f32 %v729_v48, %v467_v56  ;;  %v509_v1 = vadd.f32 %v737_v49, %v483_v57 }
 0x101   : > { %v503_v4 = vadd.f32 %v725_v54, %v459_v60  ;;  %v507_v5 = vadd.f32 %v733_v55, %v475_v61 }
 0x102   : > { %v746_v6 = vpack.c.bf16 %v505_v0, %v504_v62  ;;  %v756_v7 = vpack.c.bf16 %v509_v1, %v508_v63 }
 0x103   : > { %v741_v8 = vpack.c.bf16 %v503_v4, %v502_v2  ;;  %v751_v9 = vpack.c.bf16 %v507_v5, %v506_v3 }
 0x104   : > { %764 = vst [vmem:[%s312_s6 + $0x8] sm:$0xff] %v746_v6   ;;  %766 = vst [vmem:[%s312_s6 + $0x18] sm:$0xff] %v756_v7  }
 0x105   : > { %742 = vst [vmem:[%s312_s6] sm:$0xff] %v741_v8   ;;  %765 = vst [vmem:[%s312_s6 + $0x10] sm:$0xff] %v751_v9  }
 0x106 PF: > { %s15_s20 = sadd.s32 1, %s873_s20   ;;  %s988_s18 = smov %s869_s19 }
 0x107   : > { %p12_p5 = scmp.ge.s32.totalorder %s15_s20, 4   ;;  %s989_s19 = smov %s991_s21 }
 0x109   :  { %14 = sbr.rel (!%p12_p5) target bundleno = 2 (0x2), region = 76 }

// kernel: film_efficientnet_forward.27
= control target key start
LH: loop header
LB: loop body
LE: loop exit
PB: predicated region body
PF: predicated region fallthrough
CT: control target
= control target key end

     0   :  { %9 = vsyncpa [#allocation4], 0  ;;  %s1027_s0 = inlined_call_operand.vmem [shape: bf16[2,64,128], index: 0, kind: input, shape index: {}]   ;;  %s1028_s1 = inlined_call_operand.vmem [shape: bf16[128,128], index: 1, kind: input, shape index: {}]   ;;  %s1029_s2 = inlined_call_operand.vmem [shape: bf16[128,128], index: 2, kind: input, shape index: {}]   ;;  %s1030_s3 = inlined_call_operand.vmem [shape: f32[1,128], index: 3, kind: input, shape index: {}]   ;;  %s1031_s4 = inlined_call_operand.hbm [shape: f32[2,1,128], index: 4, kind: output, shape index: {}]  }
   0x1   :  { %11 = vsyncpa [#allocation4 + $0x1], 0  ;;  %s845_s15 = smov 0   ;;  %s847_s16 = smov 0  }
   0x2   :  { %s849_s17 = smov 0   ;;  %s851_s18 = smov 0  }
   0x3   :  { %s853_s19 = smov 0   ;;  %s855_s20 = smov 0  }
   0x4 LB: > { %s560_s21 = sadd.s32 4294967295, %s815_s20   ;;  %s561_s22 = sadd.s32 4294967294, %s815_s20   ;;  %s815_s20 = sphi %s855_s20, %s17_s20   ;;  %s811_s19 = sphi %s853_s19, %s1038_s19   ;;  %s807_s18 = sphi %s851_s18, %s1037_s18   ;;  %s803_s17 = sphi %s849_s17, %s1036_s17   ;;  %s799_s16 = sphi %s847_s16, %s1035_s16   ;;  %s795_s15 = sphi %s845_s15, %s1034_s15  }
   0x5   : > { %s29_s23 = sadd.s32 1, %s811_s19  ;;  %s127_s24 = sadd.s32 1, %s803_s17 }
   0x6   : > { %p31_p0 = scmp.ge.s32.totalorder %s29_s23, 2  ;;  %p137_p1 = scmp.ne.s32.totalorder %s803_s17, %s799_s16 }
   0x7   : > { %p138_p2 = scmp.eq.s32.totalorder %s560_s21, 1  ;;  %p143_p3 = scmp.ne.s32.totalorder %s799_s16, %s795_s15 }
   0x8   : > { %s1040_s23 = smov (%p31_p0, %s29_s23), 0  ;;  %p144_p5 = scmp.eq.s32.totalorder %s561_s22, 1 }
   0x9   : > { %p885_p4 = por %p138_p2, %p137_p1  ;;  %s124_s26 = ssub.s32 %s811_s19, %s1040_s23 }
   0xa   : > { %p564_p6 = scmp.ge.s32.totalorder %s815_s20, 1  ;;  %p125_p7 = scmp.eq.s32.totalorder %s124_s26, 0 }
   0xb   : > { %p892_p8 = por %p144_p5, %p143_p3  ;;  %p184_p9 = scmp.lt.s32.totalorder %s815_s20, 3 }
   0xc   : > { %s898_s28 = scalar_select %p125_p7, %s803_s17, %s127_s24  }
   0xd   : > { %p185_p10 = pnand %p564_p6, %p184_p9 }
   0xe   : > { %v721_v0 = vld [vmem:[%s1028_s1] sm:$0xff] (!%p185_p10)   ;;  %v817_v1 = vmov (!%p185_p10), 0.0   ;;  %v722_v2 = vld [vmem:[%s1028_s1 + $0x8] sm:$0xff] (!%p185_p10)   ;;  %vm818_vm0 = vmmov (!%p185_p10), 0   ;;  %p214_p11 = scmp.lt.s32.totalorder (!%p185_p10), %s807_s18, 1  ;;  %v723_v3 = vld [vmem:[%s1028_s1 + $0x10] sm:$0xff] (!%p185_p10)  }
   0xf   : > { %188 = sbr.rel (%p185_p10) target bundleno = 511 (0x1ff), region = 36  ;;  %624 = vmatprep.subr.bf16.mxu0 (!%p185_p10), %v817_v1  ;;  %228 = vst [vmem:[#allocation2] sm:$0x1] (!%p185_p10), %v817_v1  ;;  %644 = vmatprep.subr.bf16.mxu1 (!%p185_p10), %v817_v1  ;;  %v724_v6 = vld [vmem:[%s1028_s1 + $0x18] sm:$0xff] (!%p185_p10)   ;;  %v729_v11 = vld [vmem:[%s1029_s2] sm:$0xff] (!%p185_p10)   ;;  %v730_v14 = vld [vmem:[%s1029_s2 + $0x8] sm:$0xff] (!%p185_p10)  }
  0x10   : > { %625 = vmatpush3.bf16.msra.mxu0 (!%p185_p10), %v721_v0  ;;  %640 = vmatprep.mubr.msk.bf16.mxu0 (!%p185_p10), %vm818_vm0, %v817_v1  ;;  %v725_v15 = vld [vmem:[%s1028_s1 + $0x20] sm:$0xff] (!%p185_p10)   ;;  %v731_v21 = vld [vmem:[%s1029_s2 + $0x10] sm:$0xff] (!%p185_p10)   ;;  %v726_v24 = vld [vmem:[%s1028_s1 + $0x28] sm:$0xff] (!%p185_p10)   ;;  %s211_s8 = sand.u32 (!%p185_p10), 1, %s799_s16   ;;  %s583_s11 = sshll.u32 (!%p185_p10), %s807_s18, 4 }
  0x11   : > { %626 = vmatprep.subr.bf16.mxu0 (!%p185_p10), %v817_v1  ;;  %660 = vmatprep.mubr.msk.bf16.mxu1 (!%p185_p10), %vm818_vm0, %v817_v1  ;;  %v732_v27 = vld [vmem:[%s1029_s2 + $0x18] sm:$0xff] (!%p185_p10)   ;;  %v727_v29 = vld [vmem:[%s1028_s1 + $0x30] sm:$0xff] (!%p185_p10)   ;;  %v733_v31 = vld [vmem:[%s1029_s2 + $0x20] sm:$0xff] (!%p185_p10)   ;;  %s212_s12 = scalar_lea.vmem (!%p185_p10), [#allocation3], %s211_s8  ;;  %s980_s22 = scalar_lea.hbm (!%p185_p10), %s1031_s4, %s583_s11 }
  0x12   : > { %645 = vmatpush3.bf16.msra.mxu1 (!%p185_p10), %v729_v11  ;;  %v728_v33 = vld [vmem:[%s1028_s1 + $0x38] sm:$0xff] (!%p185_p10)   ;;  %v734_v35 = vld [vmem:[%s1029_s2 + $0x28] sm:$0xff] (!%p185_p10)   ;;  %v735_v38 = vld [vmem:[%s1029_s2 + $0x30] sm:$0xff] (!%p185_p10)   ;;  %s479_s24 = scalar_lea.sflag (!%p185_p10), [#allocation4], %s211_s8  ;;  %s819_s26 = smov (!%p185_p10), [#allocation3]  }
  0x13   : > { %646 = vmatprep.subr.bf16.mxu1 (!%p185_p10), %v817_v1  ;;  %v736_v46 = vld [vmem:[%s1029_s2 + $0x38] sm:$0xff] (!%p185_p10)   ;;  %v388_v52 = vld [vmem:[%s1030_s3] sm:$0x1] (!%p185_p10)  ;;  %s741_s29 = sshll.u32 (!%p185_p10), %s819_s26, 4  ;;  %s742_s29 = int_to_ptr.vmem [resolvable:$false] %s741_s29 }
  0x14   : > { %627 = vmatpush3.bf16.msra.mxu0 (!%p185_p10), %v722_v2  ;;  %s743_s30 = scalar_lea.vmem (!%p185_p10), %s742_s29, 32 }
  0x15   : > { %628 = vmatprep.subr.bf16.mxu0 (!%p185_p10), %v817_v1 }
  0x16   : > { %s215_s7 = scalar_select %p214_p11, %s807_s18, 1  ;;  %647 = vmatpush3.bf16.msra.mxu1 %v730_v14  ;;  %v229_v40 = vld [vmem:[#allocation2] sm:$0x1] }
  0x17   : > { %648 = vmatprep.subr.bf16.mxu1 %v817_v1 }
  0x18   : > { %s586_s10 = sshll.u32 %s215_s7, 5  ;;  %629 = vmatpush3.bf16.msra.mxu0 %v723_v3 }
  0x19   : > { %s221_s13 = scalar_lea.vmem %s1027_s0, %s586_s10  ;;  %630 = vmatprep.subr.bf16.mxu0 %v817_v1 }
  0x1a   : > { %v588_v4 = vld [vmem:[%s221_s13] sm:$0xff]   ;;  %v603_v5 = vld [vmem:[%s221_s13 + $0x8] sm:$0xff]   ;;  %v604_v10 = vld [vmem:[%s221_s13 + $0x10] sm:$0xff]   ;;  %649 = vmatpush3.bf16.msra.mxu1 %v731_v21 }
  0x1b   : > { %v589_v7 = vunpack.c.l.bf16 %v588_v4  ;;  %v590_v8 = vunpack.c.h.bf16 %v588_v4  ;;  %v593_v9 = vunpack.c.l.bf16 %v603_v5  ;;  %v594_v12 = vunpack.c.h.bf16 %v603_v5  ;;  %v605_v18 = vld [vmem:[%s221_s13 + $0x18] sm:$0xff]   ;;  %650 = vmatprep.subr.bf16.mxu1 %v817_v1  ;;  %s491_s13 = sshll.u32 %s212_s12, 4  ;;  %s982_s13 = int_to_ptr.vmem [resolvable:$true] %s491_s13 }
  0x1c   : > { %v597_v16 = vunpack.c.l.bf16 %v604_v10  ;;  %631 = vmatpush3.bf16.msra.mxu0 %v724_v6  ;;  %v598_v19 = vunpack.c.h.bf16 %v604_v10  ;;  %v601_v22 = vunpack.c.l.bf16 %v605_v18  ;;  %v602_v25 = vunpack.c.h.bf16 %v605_v18  ;;  %s737_s18 = scalar_lea.vmem %s982_s13, 16  ;;  %p744_p1 = scmp.lt.s32.totalorder %s982_s13, %s742_s29 }
  0x1d   : > { %v246_v13 = vadd.f32 %v590_v8, %v589_v7  ;;  %632 = vmatprep.subr.bf16.mxu0 %v817_v1  ;;  %p738_p12 = scmp.ne.s32.totalorder %s982_s13, %s737_s18  ;;  %p745_p2 = scmp.lt.s32.totalorder %s743_s30, %s737_s18 }
  0x1e   : > { %651 = vmatpush3.bf16.msra.mxu1 %v732_v27 }
  0x1f   : > { %v247_v17 = vadd.f32 %v593_v9, %v246_v13  ;;  %652 = vmatprep.subr.bf16.mxu1 %v817_v1  ;;  %p739_p13 = pnand %p738_p12, %p885_p4  ;;  %p746_p3 = por %p745_p2, %p744_p1 }
  0x20   : > { %633 = vmatpush3.bf16.msra.mxu0 %v725_v15 }
  0x21   : > { %v248_v20 = vadd.f32 %v594_v12, %v247_v17  ;;  %634 = vmatprep.subr.bf16.mxu0 %v817_v1  ;;  %p740_p0 = pneg %p739_p13 }
  0x22   : > { %653 = vmatpush3.bf16.msra.mxu1 %v733_v31 }
  0x23   : > { %v249_v23 = vadd.f32 %v597_v16, %v248_v20  ;;  %654 = vmatprep.subr.bf16.mxu1 %v817_v1  ;;  %p747_p5 = pnand %p746_p3, %p740_p0 }
  0x24   : > { %635 = vmatpush3.bf16.msra.mxu0 %v726_v24 }
  0x25   : > { %v250_v26 = vadd.f32 %v598_v19, %v249_v23  ;;  %636 = vmatprep.subr.bf16.mxu0 %v817_v1 }
  0x26   : > { %655 = vmatpush3.bf16.msra.mxu1 %v734_v35 }
  0x27   : > { %v251_v28 = vadd.f32 %v601_v22, %v250_v26  ;;  %656 = vmatprep.subr.bf16.mxu1 %v817_v1 }
  0x28   : > { %637 = vmatpush3.bf16.msra.mxu0 %v727_v29 }
  0x29   : > { %v252_v30 = vadd.f32 %v602_v25, %v251_v28  ;;  %638 = vmatprep.subr.bf16.mxu0 %v817_v1 }
  0x2a   : > { %657 = vmatpush3.bf16.msra.mxu1 %v735_v38 }
  0x2b   : > { %v253_v32 = vrot.slane %v252_v30, 4  ;;  %658 = vmatprep.subr.bf16.mxu1 %v817_v1 }
  0x2c   : > { %639 = vmatpush3.bf16.msra.mxu0 %v728_v33 }
  0x2d   : > { %v254_v34 = vadd.f32 %v253_v32, %v252_v30 }
  0x2e   : > { %659 = vmatpush3.bf16.msra.mxu1 %v736_v46 }
  0x2f   : > { %v255_v36 = vrot.slane %v254_v34, 2 }
  0x31   : > { %v256_v37 = vadd.f32 %v255_v36, %v254_v34 }
  0x33   : > { %v257_v39 = vrot.slane %v256_v37, 1 }
  0x35   : > { %v258_v41 = vadd.f32 %v257_v39, %v256_v37 }
  0x37   : > { %v259_v42 = vadd.f32 %v258_v41, %v229_v40 }
  0x39   : > { %260 = vst [vmem:[#allocation2] sm:$0x1] %v259_v42 }
  0x40   : > { %v264_v43 = vld [vmem:[#allocation2] sm:$0x1] }
  0x41   : > { %v265_v44 = vmul.f32 0.015625, %v264_v43 }
  0x43   : > { %v266_v45 = vpack.c.bf16 %v265_v44, %v265_v44 }
  0x45   : > { %641 = vmatmul.mubr.bf16.vlgmr.msra.gmra.mrb[0].mxu0 %v266_v45 }
 0x118   : > { %v365_v47 = vpop.f32.mrb[0].mxu0 }
 0x119   : > { %v371_v48 = vpack.c.bf16 %v365_v47, %v365_v47  ;;  %v642_v49 = vpop.f32.mrb[1].mxu0 }
 0x11a   : > { %v368_v50 = vpop.f32.mrb[2].mxu0 }
 0x11b   : > { %v643_v51 = vpop.f32.mrb[3].mxu0  ;;  %661 = vmatmul.mubr.bf16.vlgmr.msra.gmra.mrb[0].mxu1 %v371_v48 }
 0x1ee   : > { %v471_v53 = vpop.f32.mrb[0].mxu1 }
 0x1ef   : > { %v472_v54 = vadd.f32 %v471_v53, %v388_v52  ;;  %v662_v55 = vpop.f32.mrb[1].mxu1 }
 0x1f0   : > { %v474_v56 = vpop.f32.mrb[2].mxu1 }
 0x1f1   : > { %477 = vst [vmem:[%s212_s12] sm:$0x1] %v472_v54  ;;  %v663_v57 = vpop.f32.mrb[3].mxu1 }
 0x1f2   : > { %750 = shalt.err (!%p747_p5)
}
 0x1f3   : > { %s751_s5 = scalar_lea.hbm %s980_s22, 16  ;;  %s755_s8 = scalar_lea.hbm %s1031_s4, 32 }
 0x1f4   : > { %p752_p6 = scmp.ne.s32.totalorder %s980_s22, %s751_s5  ;;  %p756_p10 = scmp.lt.u32.totalorder %s980_s22, %s1031_s4 }
 0x1f5   : > { %p757_p11 = scmp.lt.u32.totalorder %s755_s8, %s751_s5  ;;  %p759_p13 = scmp.lt.u32.totalorder %s751_s5, %s980_s22 }
 0x1f6   : > { %p753_p7 = pnand %p752_p6, %p885_p4 }
 0x1f7   : > { %p758_p12 = por %p757_p11, %p756_p10 }
 0x1f8   : > { %p754_p9 = pneg %p753_p7 }
 0x1f9   : > { %p760_p0 = por %p759_p13, %p758_p12 }
 0x1fb   : > { %p761_p1 = pnand %p760_p0, %p754_p9 }
 0x1fd   : > { %764 = shalt.err (!%p761_p1)
}
 0x1fe   : > { %664 = dma.vmem_to_hbm [thread:$0]  (%p885_p4), %s982_s13, 16, %s980_s22, %s479_s24  }
 0x1ff PF: > { %p670_p2 = scmp.ge.s32.totalorder %s815_s20, 2  ;;  %s503_s11 = sand.u32 1, %s795_s15  }
 0x200   : > { %s504_s12 = scalar_lea.sflag [#allocation4], %s503_s11 }
 0x201   : > { %p667_p3 = pnand %p670_p2, %p892_p8 }
 0x203   : > { %790 = dma.done.wait (!%p667_p3), %s504_s12, 16  }
 0x204   : > { %792 = vsyncadd (!%p667_p3), %s504_s12, 4294967280  ;;  %s17_s20 = sadd.s32 1, %s815_s20   ;;  %s1034_s15 = smov %s799_s16 }
 0x205   : > { %p14_p5 = scmp.ge.s32.totalorder %s17_s20, 4   ;;  %s1035_s16 = smov %s803_s17 }
 0x206   : > { %s1036_s17 = smov %s898_s28  ;;  %s1037_s18 = smov %s811_s19 }
 0x207   : > { %s1038_s19 = smov %s1040_s23  ;;  %16 = sbr.rel (!%p14_p5) target bundleno = 4 (0x4), region = 79 }
 0x20e   :  { %508 = vsyncpa [#allocation4], 1 }
 0x20f   :  { %510 = vsyncpa [#allocation4 + $0x1], 1 }

// kernel: film_efficientnet_forward.26
= control target key start
LH: loop header
LB: loop body
LE: loop exit
PB: predicated region body
PF: predicated region fallthrough
CT: control target
= control target key end

     0   :  { %vm60_vm0 = vcmask 64512   ;;  %v1583_v2 = vmov 0   ;;  %s1848_s0 = inlined_call_operand.vmem [shape: bf16[16,8,128], index: 0, kind: input, shape index: {}]   ;;  %s1849_s1 = inlined_call_operand.vmem [shape: f32[16,8], index: 1, kind: input, shape index: {}]   ;;  %s1850_s2 = inlined_call_operand.vmem [shape: f32[16,1], index: 2, kind: input, shape index: {}]   ;;  %s1851_s3 = inlined_call_operand.vmem [shape: bf16[16,8,128], index: 3, kind: output, shape index: {}]  }
   0x1   :  { %v1368_v0 = vld [vmem:[%s1848_s0] sm:$0xff]   ;;  %1582 = vset.pattern.permute.xlu0 %v1583_v2  ;;  %v1439_v5 = vld [vmem:[%s1848_s0 + $0x8] sm:$0xff]   ;;  %v1440_v9 = vld [vmem:[%s1848_s0 + $0x10] sm:$0xff]  }
   0x2   :  { %v1610_v1 = vld [vmem:[%s1849_s1] sm:$0xff]  ;;  %v1612_v3 = vunpack.c.l.bf16 %v1368_v0  ;;  %v1614_v4 = vunpack.c.h.bf16 %v1368_v0  ;;  %v1626_v6 = vld [vmem:[%s1849_s1 + $0x8] sm:$0xff]  ;;  %v1628_v7 = vunpack.c.l.bf16 %v1439_v5  ;;  %v1630_v8 = vunpack.c.h.bf16 %v1439_v5  ;;  %v1441_v12 = vld [vmem:[%s1848_s0 + $0x18] sm:$0xff]  }
   0x3   :  { %1503 = vmatprep.mubr.msk.f32.mxu0 %vm60_vm0, %v1610_v1  ;;  %1508 = vmatprep.mubr.msk.f32.mxu1 %vm60_vm0, %v1610_v1  ;;  %v1645_v10 = vunpack.c.l.bf16 %v1440_v9  ;;  %v1647_v11 = vunpack.c.h.bf16 %v1440_v9  ;;  %v1664_v13 = vunpack.c.l.bf16 %v1441_v12  ;;  %v1666_v14 = vunpack.c.h.bf16 %v1441_v12  ;;  %v1442_v15 = vld [vmem:[%s1848_s0 + $0x20] sm:$0xff]   ;;  %v1443_v18 = vld [vmem:[%s1848_s0 + $0x28] sm:$0xff]   ;;  %v1444_v21 = vld [vmem:[%s1848_s0 + $0x30] sm:$0xff]  }
   0x4   :  { %1501 = vmatprep.subr.mxu0 %v1612_v3  ;;  %1506 = vmatprep.subr.mxu1 %v1614_v4  ;;  %v1683_v16 = vunpack.c.l.bf16 %v1442_v15  ;;  %v1685_v17 = vunpack.c.h.bf16 %v1442_v15  ;;  %v1702_v19 = vunpack.c.l.bf16 %v1443_v18  ;;  %v1704_v20 = vunpack.c.h.bf16 %v1443_v18  ;;  %v1445_v24 = vld [vmem:[%s1848_s0 + $0x38] sm:$0xff]   ;;  %v48_v27 = vld [vmem:[%s1850_s2] sm:$0xff]  ;;  %v49_v28 = vld [vmem:[%s1850_s2 + $0x8] sm:$0xff] }
   0x5   :  { %1502 = vmatpush3.msra.mxu0 %v1612_v3  ;;  %1507 = vmatpush3.msra.mxu1 %v1614_v4  ;;  %v1721_v22 = vunpack.c.l.bf16 %v1444_v21  ;;  %v1723_v23 = vunpack.c.h.bf16 %v1444_v21  ;;  %v1740_v25 = vunpack.c.l.bf16 %v1445_v24  ;;  %v1742_v26 = vunpack.c.h.bf16 %v1445_v24 }
   0x6   :  { %1504 = vmatmul.mubr.msk.f32.vlgmr.msra.gmra.mrb[0].mxu0 %vm60_vm0, %v1626_v6  ;;  %1509 = vmatmul.mubr.msk.f32.vlgmr.msra.gmra.mrb[0].mxu1 %vm60_vm0, %v1626_v6 }
   0x7   :  { %1511 = vmatprep.subr.mxu0 %v1628_v7  ;;  %1516 = vmatprep.subr.mxu1 %v1630_v8 }
   0x8   :  { %1512 = vmatpush3.msra.mxu0 %v1628_v7  ;;  %1517 = vmatpush3.msra.mxu1 %v1630_v8 }
   0x9   :  { %1513 = vmatprep.mubr.msk.f32.mxu0 %vm60_vm0, %v1610_v1  ;;  %1518 = vmatprep.mubr.msk.f32.mxu1 %vm60_vm0, %v1610_v1 }
   0xa   :  { %1514 = vmatmul.mubr.msk.f32.vlgmr.msra.gmra.mrb[2].mxu0 %vm60_vm0, %v1626_v6  ;;  %1519 = vmatmul.mubr.msk.f32.vlgmr.msra.gmra.mrb[2].mxu1 %vm60_vm0, %v1626_v6 }
   0xb   :  { %1521 = vmatprep.subr.mxu0 %v1645_v10  ;;  %1526 = vmatprep.subr.mxu1 %v1647_v11 }
   0xc   :  { %1522 = vmatpush3.msra.mxu0 %v1645_v10  ;;  %1527 = vmatpush3.msra.mxu1 %v1647_v11 }
   0xd   :  { %1523 = vmatprep.mubr.msk.f32.mxu0 %vm60_vm0, %v1610_v1  ;;  %1528 = vmatprep.mubr.msk.f32.mxu1 %vm60_vm0, %v1610_v1 }
   0xe   :  { %1524 = vmatmul.mubr.msk.f32.vlgmr.msra.gmra.mrb[4].mxu0 %vm60_vm0, %v1626_v6  ;;  %1529 = vmatmul.mubr.msk.f32.vlgmr.msra.gmra.mrb[4].mxu1 %vm60_vm0, %v1626_v6 }
   0xf   :  { %1531 = vmatprep.subr.mxu0 %v1664_v13  ;;  %1536 = vmatprep.subr.mxu1 %v1666_v14 }
  0x10   :  { %1532 = vmatpush3.msra.mxu0 %v1664_v13  ;;  %1537 = vmatpush3.msra.mxu1 %v1666_v14 }
  0x11   :  { %1533 = vmatprep.mubr.msk.f32.mxu0 %vm60_vm0, %v1610_v1  ;;  %1538 = vmatprep.mubr.msk.f32.mxu1 %vm60_vm0, %v1610_v1 }
  0x12   :  { %1534 = vmatmul.mubr.msk.f32.vlgmr.msra.gmra.mrb[6].mxu0 %vm60_vm0, %v1626_v6  ;;  %1539 = vmatmul.mubr.msk.f32.vlgmr.msra.gmra.mrb[6].mxu1 %vm60_vm0, %v1626_v6 }
  0x13   :  { %1541 = vmatprep.subr.mxu0 %v1683_v16  ;;  %1546 = vmatprep.subr.mxu1 %v1685_v17 }
  0x14   :  { %1542 = vmatpush3.msra.mxu0 %v1683_v16  ;;  %1547 = vmatpush3.msra.mxu1 %v1685_v17 }
  0x15   :  { %1543 = vmatprep.mubr.msk.f32.mxu0 %vm60_vm0, %v1610_v1  ;;  %1548 = vmatprep.mubr.msk.f32.mxu1 %vm60_vm0, %v1610_v1 }
  0x16   :  { %1544 = vmatmul.mubr.msk.f32.vlgmr.msra.gmra.mrb[8].mxu0 %vm60_vm0, %v1626_v6  ;;  %1549 = vmatmul.mubr.msk.f32.vlgmr.msra.gmra.mrb[8].mxu1 %vm60_vm0, %v1626_v6 }
  0x17   :  { %1551 = vmatprep.subr.mxu0 %v1702_v19  ;;  %1556 = vmatprep.subr.mxu1 %v1704_v20 }
  0x18   :  { %1552 = vmatpush3.msra.mxu0 %v1702_v19  ;;  %1557 = vmatpush3.msra.mxu1 %v1704_v20 }
  0x19   :  { %1553 = vmatprep.mubr.msk.f32.mxu0 %vm60_vm0, %v1610_v1  ;;  %1558 = vmatprep.mubr.msk.f32.mxu1 %vm60_vm0, %v1610_v1 }
  0x1a   :  { %1554 = vmatmul.mubr.msk.f32.vlgmr.msra.gmra.mrb[10].mxu0 %vm60_vm0, %v1626_v6  ;;  %1559 = vmatmul.mubr.msk.f32.vlgmr.msra.gmra.mrb[10].mxu1 %vm60_vm0, %v1626_v6 }
  0x1b   :  { %1561 = vmatprep.subr.mxu0 %v1721_v22  ;;  %1566 = vmatprep.subr.mxu1 %v1723_v23 }
  0x1c   :  { %1562 = vmatpush3.msra.mxu0 %v1721_v22  ;;  %1567 = vmatpush3.msra.mxu1 %v1723_v23 }
  0x1d   :  { %1563 = vmatprep.mubr.msk.f32.mxu0 %vm60_vm0, %v1610_v1  ;;  %1568 = vmatprep.mubr.msk.f32.mxu1 %vm60_vm0, %v1610_v1 }
  0x1e   :  { %1564 = vmatmul.mubr.msk.f32.vlgmr.msra.gmra.mrb[12].mxu0 %vm60_vm0, %v1626_v6  ;;  %1569 = vmatmul.mubr.msk.f32.vlgmr.msra.gmra.mrb[12].mxu1 %vm60_vm0, %v1626_v6 }
  0x1f   :  { %1571 = vmatprep.subr.mxu0 %v1740_v25  ;;  %1576 = vmatprep.subr.mxu1 %v1742_v26 }
  0x20   :  { %1572 = vmatpush3.msra.mxu0 %v1740_v25  ;;  %1577 = vmatpush3.msra.mxu1 %v1742_v26 }
  0x21   :  { %1573 = vmatprep.mubr.msk.f32.mxu0 %vm60_vm0, %v1610_v1  ;;  %1578 = vmatprep.mubr.msk.f32.mxu1 %vm60_vm0, %v1610_v1 }
  0x22   :  { %1574 = vmatmul.mubr.msk.f32.vlgmr.msra.gmra.mrb[14].mxu0 %vm60_vm0, %v1626_v6  ;;  %1579 = vmatmul.mubr.msk.f32.vlgmr.msra.gmra.mrb[14].mxu1 %vm60_vm0, %v1626_v6 }
  0x23   :  { %52 = vperm.xlu0 %1582, %v48_v27  }
  0x27   :  { %57 = vperm.xlu0 %1582, %v49_v28  }
  0xa2   :  { %v1772_v29 = vpop.permute.xlu0 %52 }
  0xa6   :  { %v1774_v30 = vpop.permute.xlu0 %57 }
  0xd9   :  { %v1505_v31 = vpop.f32.mrb[0].mxu0  ;;  %v1510_v32 = vpop.f32.mrb[0].mxu1 }
  0xda   :  { %v133_v33 = vpop.f32.mrb[1].mxu0  ;;  %v208_v34 = vpop.f32.mrb[1].mxu1  ;;  %v139_v37 = vadd.f32 %v1505_v31, %v1774_v30  ;;  %v214_v39 = vadd.f32 %v1510_v32, %v1774_v30 }
  0xdb   :  { %v134_v35 = vadd.f32 %v133_v33, %v1772_v29  ;;  %v209_v36 = vadd.f32 %v208_v34, %v1772_v29 }
  0xdd   :  { %v1267_v38 = vmul.f32 %v1612_v3, %v134_v35  ;;  %v1268_v40 = vmul.f32 %v1614_v4, %v209_v36  ;;  %v1515_v41 = vpop.f32.mrb[2].mxu0  ;;  %v1520_v42 = vpop.f32.mrb[2].mxu1 }
  0xde   :  { %v283_v43 = vpop.f32.mrb[3].mxu0  ;;  %v358_v44 = vpop.f32.mrb[3].mxu1  ;;  %v289_v49 = vadd.f32 %v1515_v41, %v1774_v30  ;;  %v364_v51 = vadd.f32 %v1520_v42, %v1774_v30 }
  0xdf   :  { %v1283_v45 = vadd.f32 %v1267_v38, %v139_v37  ;;  %v1284_v46 = vadd.f32 %v1268_v40, %v214_v39  ;;  %v284_v47 = vadd.f32 %v283_v43, %v1772_v29  ;;  %v359_v48 = vadd.f32 %v358_v44, %v1772_v29 }
  0xe1   :  { %v1402_v50 = vpack.c.bf16 %v1284_v46, %v1283_v45  ;;  %v1269_v52 = vmul.f32 %v1628_v7, %v284_v47  ;;  %v1270_v53 = vmul.f32 %v1630_v8, %v359_v48  ;;  %v1525_v54 = vpop.f32.mrb[4].mxu0  ;;  %v1530_v55 = vpop.f32.mrb[4].mxu1 }
  0xe2   :  { %v433_v56 = vpop.f32.mrb[5].mxu0  ;;  %v508_v57 = vpop.f32.mrb[5].mxu1  ;;  %v439_v62 = vadd.f32 %v1525_v54, %v1774_v30  ;;  %v514_v0 = vadd.f32 %v1530_v55, %v1774_v30 }
  0xe3   :  { %1403 = vst [vmem:[%s1851_s3] sm:$0xff] %v1402_v50   ;;  %v1285_v58 = vadd.f32 %v1269_v52, %v289_v49  ;;  %v1286_v59 = vadd.f32 %v1270_v53, %v364_v51  ;;  %v434_v60 = vadd.f32 %v433_v56, %v1772_v29  ;;  %v509_v61 = vadd.f32 %v508_v57, %v1772_v29 }
  0xe5   :  { %v1407_v63 = vpack.c.bf16 %v1286_v59, %v1285_v58  ;;  %v1271_v1 = vmul.f32 %v1645_v10, %v434_v60  ;;  %v1272_v2 = vmul.f32 %v1647_v11, %v509_v61  ;;  %v1535_v3 = vpop.f32.mrb[6].mxu0  ;;  %v1540_v4 = vpop.f32.mrb[6].mxu1 }
  0xe6   :  { %v583_v5 = vpop.f32.mrb[7].mxu0  ;;  %v658_v6 = vpop.f32.mrb[7].mxu1  ;;  %v589_v15 = vadd.f32 %v1535_v3, %v1774_v30  ;;  %v664_v10 = vadd.f32 %v1540_v4, %v1774_v30 }
  0xe7   :  { %1446 = vst [vmem:[%s1851_s3 + $0x8] sm:$0xff] %v1407_v63   ;;  %v1287_v7 = vadd.f32 %v1271_v1, %v439_v62  ;;  %v1288_v8 = vadd.f32 %v1272_v2, %v514_v0  ;;  %v584_v9 = vadd.f32 %v583_v5, %v1772_v29  ;;  %v659_v12 = vadd.f32 %v658_v6, %v1772_v29 }
  0xe9   :  { %v1412_v18 = vpack.c.bf16 %v1288_v8, %v1287_v7  ;;  %v1273_v11 = vmul.f32 %v1664_v13, %v584_v9  ;;  %v1274_v21 = vmul.f32 %v1666_v14, %v659_v12  ;;  %v1545_v24 = vpop.f32.mrb[8].mxu0  ;;  %v1550_v27 = vpop.f32.mrb[8].mxu1 }
  0xea   :  { %v733_v28 = vpop.f32.mrb[9].mxu0  ;;  %v808_v31 = vpop.f32.mrb[9].mxu1  ;;  %v739_v36 = vadd.f32 %v1545_v24, %v1774_v30  ;;  %v814_v13 = vadd.f32 %v1550_v27, %v1774_v30 }
  0xeb   :  { %1447 = vst [vmem:[%s1851_s3 + $0x10] sm:$0xff] %v1412_v18   ;;  %v1289_v32 = vadd.f32 %v1273_v11, %v589_v15  ;;  %v1290_v33 = vadd.f32 %v1274_v21, %v664_v10  ;;  %v734_v34 = vadd.f32 %v733_v28, %v1772_v29  ;;  %v809_v35 = vadd.f32 %v808_v31, %v1772_v29 }
  0xed   :  { %v1417_v37 = vpack.c.bf16 %v1290_v33, %v1289_v32  ;;  %v1275_v14 = vmul.f32 %v1683_v16, %v734_v34  ;;  %v1276_v38 = vmul.f32 %v1685_v17, %v809_v35  ;;  %v1555_v39 = vpop.f32.mrb[10].mxu0  ;;  %v1560_v40 = vpop.f32.mrb[10].mxu1 }
  0xee   :  { %v883_v41 = vpop.f32.mrb[11].mxu0  ;;  %v958_v42 = vpop.f32.mrb[11].mxu1  ;;  %v889_v47 = vadd.f32 %v1555_v39, %v1774_v30  ;;  %v964_v16 = vadd.f32 %v1560_v40, %v1774_v30 }
  0xef   :  { %1448 = vst [vmem:[%s1851_s3 + $0x18] sm:$0xff] %v1417_v37   ;;  %v1291_v43 = vadd.f32 %v1275_v14, %v739_v36  ;;  %v1292_v44 = vadd.f32 %v1276_v38, %v814_v13  ;;  %v884_v45 = vadd.f32 %v883_v41, %v1772_v29  ;;  %v959_v46 = vadd.f32 %v958_v42, %v1772_v29 }
  0xf1   :  { %v1422_v48 = vpack.c.bf16 %v1292_v44, %v1291_v43  ;;  %v1277_v17 = vmul.f32 %v1702_v19, %v884_v45  ;;  %v1278_v49 = vmul.f32 %v1704_v20, %v959_v46  ;;  %v1565_v50 = vpop.f32.mrb[12].mxu0  ;;  %v1570_v51 = vpop.f32.mrb[12].mxu1 }
  0xf2   :  { %v1033_v52 = vpop.f32.mrb[13].mxu0  ;;  %v1108_v53 = vpop.f32.mrb[13].mxu1  ;;  %v1039_v58 = vadd.f32 %v1565_v50, %v1774_v30  ;;  %v1114_v19 = vadd.f32 %v1570_v51, %v1774_v30 }
  0xf3   :  { %1449 = vst [vmem:[%s1851_s3 + $0x20] sm:$0xff] %v1422_v48   ;;  %v1293_v54 = vadd.f32 %v1277_v17, %v889_v47  ;;  %v1294_v55 = vadd.f32 %v1278_v49, %v964_v16  ;;  %v1034_v56 = vadd.f32 %v1033_v52, %v1772_v29  ;;  %v1109_v57 = vadd.f32 %v1108_v53, %v1772_v29 }
  0xf5   :  { %v1427_v59 = vpack.c.bf16 %v1294_v55, %v1293_v54  ;;  %v1279_v20 = vmul.f32 %v1721_v22, %v1034_v56  ;;  %v1280_v60 = vmul.f32 %v1723_v23, %v1109_v57  ;;  %v1575_v61 = vpop.f32.mrb[14].mxu0  ;;  %v1580_v62 = vpop.f32.mrb[14].mxu1 }
  0xf6   :  { %v1183_v63 = vpop.f32.mrb[15].mxu0  ;;  %v1258_v0 = vpop.f32.mrb[15].mxu1  ;;  %v1189_v5 = vadd.f32 %v1575_v61, %v1774_v30  ;;  %v1264_v22 = vadd.f32 %v1580_v62, %v1774_v30 }
  0xf7   :  { %1450 = vst [vmem:[%s1851_s3 + $0x28] sm:$0xff] %v1427_v59   ;;  %v1295_v1 = vadd.f32 %v1279_v20, %v1039_v58  ;;  %v1296_v2 = vadd.f32 %v1280_v60, %v1114_v19  ;;  %v1184_v3 = vadd.f32 %v1183_v63, %v1772_v29  ;;  %v1259_v4 = vadd.f32 %v1258_v0, %v1772_v29 }
  0xf9   :  { %v1432_v6 = vpack.c.bf16 %v1296_v2, %v1295_v1  ;;  %v1281_v23 = vmul.f32 %v1740_v25, %v1184_v3  ;;  %v1282_v7 = vmul.f32 %v1742_v26, %v1259_v4 }
  0xfb   :  { %1451 = vst [vmem:[%s1851_s3 + $0x30] sm:$0xff] %v1432_v6   ;;  %v1297_v8 = vadd.f32 %v1281_v23, %v1189_v5  ;;  %v1298_v9 = vadd.f32 %v1282_v7, %v1264_v22 }
  0xfd   :  { %v1437_v12 = vpack.c.bf16 %v1298_v9, %v1297_v8 }
  0xff   :  { %1452 = vst [vmem:[%s1851_s3 + $0x38] sm:$0xff] %v1437_v12  }

</bundles_post_ra>
